<compile_context>
chip_gen: v5e
topology: v5e:2x2
jax: 0.10.0
libtpu: 0.0.40
codegen_flags: <defaults>
</compile_context>

<pallas_src>
import functools

import jax
import jax.numpy as jnp
from jax.experimental import pallas as pl
from jax.experimental.pallas import tpu as pltpu


# (kh, dh) taps contributing to output row 2*i + ph (identical structure for columns / pw):
#   ph = 0 -> kh=1 @ dh=0,  kh=3 @ dh=-1
#   ph = 1 -> kh=0 @ dh=+1, kh=2 @ dh=0
_TAPS = {0: ((1, 0), (3, -1)), 1: ((0, 1), (2, 0))}
_DWS = (-1, 0, 1)   # column shifts needed once pw is fused into the matmul N-dim


def _convt_kernel(x_ref, w_ref, b_ref, o_ref, patch_ref, *, th, W, Cin, Cout, activation):
    # x_ref:     (1, th+2, W+2, Cin)   bf16  input row-slab with 1-pixel halo
    # w_ref:     (2, 6*Cin, 2*Cout)    bf16  per-ph fused weights (VMEM-resident, fetched once)
    # b_ref:     (1, 2*Cout)           f32   bias duplicated for both pw phases
    # o_ref:     (1, th, 2, W, 2*Cout)       output slab (dim 2 = output-row phase ph)
    # patch_ref: (th*W, 6*Cin)         bf16  scratch: in-VMEM "im2col" patch
    for ph in (0, 1):                      # static Python loop -> unrolled at trace time
        # slab row offset for tap dh is (1 + dh); order must match the weight row-blocks.
        row_offs = tuple(1 + dh for (_, dh) in _TAPS[ph])
        blk = 0
        for ro in row_offs:
            for dw in _DWS:
                co = 1 + dw
                tap = x_ref[0, ro:ro + th, co:co + W, :]              # (th, W, Cin)
                patch_ref[:, blk * Cin:(blk + 1) * Cin] = tap.reshape(th * W, Cin)
                blk += 1
        acc = jnp.dot(patch_ref[...], w_ref[ph],                      # MXU, bf16 in / f32 acc
                      preferred_element_type=jnp.float32)             # (th*W, 2*Cout)
        acc = acc + b_ref[...]                                        # (1, 2*Cout) broadcast
        y = activation(acc).astype(o_ref.dtype)
        o_ref[0, :, ph, :, :] = y.reshape(th, W, 2 * Cout)            # lane-packed (pw, Cout)


def _build_weights(weight, Cin, Cout):
    """Per-ph fused RHS: rows = (dh-tap, dw in {-1,0,1}, Cin), cols = (pw, Cout)."""
    wmats = []
    for ph in (0, 1):
        rows = []
        for (kh, _dh) in _TAPS[ph]:
            for dw in _DWS:
                cols = []
                for pw in (0, 1):
                    kw = None
                    for (kw_c, dw_c) in _TAPS[pw]:
                        if dw_c == dw:
                            kw = kw_c
                    if kw is None:                       # this dw unused by this pw -> zeros
                        cols.append(jnp.zeros((Cin, Cout), weight.dtype))
                    else:
                        cols.append(weight[:, :, kh, kw])
                rows.append(jnp.concatenate(cols, axis=1))   # (Cin, 2*Cout)
        wmats.append(jnp.concatenate(rows, axis=0))          # (6*Cin, 2*Cout)
    return jnp.stack(wmats).astype(jnp.bfloat16)             # (2, 6*Cin, 2*Cout)


def _pick_row_tile(H, W, Cin, Cout, vmem_budget=24 * 1024 * 1024):
    """Whole-row tile th | H with M = th*W near the mem-bound knee (>=512) and under budget."""
    def est(th):
        pad = lambda x: -(-x // 128) * 128        # conservative lane padding
        slab = (th + 2) * (W + 2) * pad(Cin) * 2          # bf16, double buffered
        outb = th * 2 * W * pad(2 * Cout) * 4             # f32, double buffered
        patch = th * W * pad(6 * Cin) * 2
        wts = 2 * 6 * Cin * pad(2 * Cout) * 2
        return 2 * slab + 2 * outb + patch + wts
    divisors = [d for d in range(1, H + 1) if H % d == 0]
    fitting = [d for d in divisors if est(d) <= vmem_budget]
    if not fitting:
        return 1
    for d in fitting:                 # smallest tile reaching M >= 512 (roofline knee)
        if d * W >= 512:
            return d
    return fitting[-1]                # otherwise: the biggest tile that fits


def conv_transpose_block(x, weight, bias, activation, *, out_nchw=True):
    """ConvTranspose2d(kernel=4, stride=2, padding=1) + activation.

    x:      (N, C_in, H, W)       NCHW (PyTorch layout)
    weight: (C_in, C_out, 4, 4)   PyTorch ConvTranspose2d weight
    bias:   (C_out,)
    returns (N, C_out, 2H, 2W)    if out_nchw else (N, 2H, 2W, C_out)
    """
    N, Cin, H, W = x.shape
    Cout = weight.shape[1]

    th = _pick_row_tile(H, W, Cin, Cout)
    HB = H // th
    NB = N * HB

    # channels-last + 1-pixel zero halo; bf16 for the dominant HBM stream (f32 accumulation in-kernel).
    xt = jnp.transpose(x, (0, 2, 3, 1))                                      # (N, H, W, Cin)
    xp = jnp.pad(xt, ((0, 0), (1, 1), (1, 1), (0, 0))).astype(jnp.bfloat16)  # (N, H+2, W+2, Cin)
    if HB == 1:
        x_halo = xp                                                          # no duplication at all
    else:
        # overlapping row slabs carry their own halo: only (th+2)/th duplication of x.
        slabs = [xp[:, rb * th: rb * th + th + 2] for rb in range(HB)]
        x_halo = jnp.stack(slabs, axis=1).reshape(NB, th + 2, W + 2, Cin)

    wmats = _build_weights(weight, Cin, Cout)                                # (2, 6*Cin, 2*Cout) bf16
    b2 = jnp.concatenate([bias, bias]).reshape(1, 2 * Cout).astype(jnp.float32)

    kernel = functools.partial(_convt_kernel, th=th, W=W, Cin=Cin, Cout=Cout,
                               activation=activation)

    out = pl.pallas_call(
        kernel,
        out_shape=jax.ShapeDtypeStruct((NB, th, 2, W, 2 * Cout), x.dtype),
        grid_spec=pltpu.PrefetchScalarGridSpec(
            num_scalar_prefetch=0,
            grid=(NB,),
            in_specs=[
                pl.BlockSpec((1, th + 2, W + 2, Cin), lambda s: (s, 0, 0, 0)),
                pl.BlockSpec((2, 6 * Cin, 2 * Cout), lambda s: (0, 0, 0)),   # resident weights
                pl.BlockSpec((1, 2 * Cout), lambda s: (0, 0)),               # resident bias
            ],
            out_specs=pl.BlockSpec((1, th, 2, W, 2 * Cout), lambda s: (s, 0, 0, 0, 0)),
            scratch_shapes=[pltpu.VMEM((th * W, 6 * Cin), jnp.bfloat16)],
        ),
        compiler_params=pltpu.CompilerParams(
            dimension_semantics=("parallel",),            # row/batch tiles shard across v7x TCs
            vmem_limit_bytes=48 * 1024 * 1024,            # explicit budget (v7x: 64 MiB physical)
        ),
    )(x_halo, wmats, b2)

    # free interleave: (NB, th, 2, W, 2*Cout) row-major == (N, 2H, 2W, Cout) row-major
    y = out.reshape(N, 2 * H, 2 * W, Cout)
    if out_nchw:
        y = jnp.transpose(y, (0, 3, 1, 2))                # only remaining layout pass (module is NCHW)
    return y


if __name__ == "__main__":
    key = jax.random.PRNGKey(0)
    k1, k2, k3 = jax.random.split(key, 3)

    N, Cin, Cout, H, W = 2, 4, 8, 16, 16
    x = jax.random.normal(k1, (N, Cin, H, W), jnp.float32)
    weight = jax.random.normal(k2, (Cin, Cout, 4, 4), jnp.float32) * 0.1
    bias = jax.random.normal(k3, (Cout,), jnp.float32) * 0.1
    activation = jax.nn.relu   # the module takes `activation` as a ctor arg; ReLU chosen here

    out = conv_transpose_block(x, weight, bias, activation)
    out = jax.block_until_ready(out)

    # pure-JAX reference (f32): ConvTranspose2d == dilated conv with flipped/transposed kernel
    Wt = jnp.transpose(weight[:, :, ::-1, ::-1], (1, 0, 2, 3))   # (Cout, Cin, 4, 4)
    ref = jax.lax.conv_general_dilated(
        x, Wt, window_strides=(1, 1), padding=[(2, 2), (2, 2)],
        lhs_dilation=(2, 2),
        dimension_numbers=("NCHW", "OIHW", "NCHW"))
    ref = activation(ref + bias[None, :, None, None])

    assert out.shape == (N, Cout, 2 * H, 2 * W), out.shape
    # inputs are fed to the MXU in bf16 (f32 accumulation), so compare at bf16-level tolerance
    assert jnp.allclose(out, ref, atol=2e-2, rtol=2e-2), float(jnp.max(jnp.abs(out - ref)))
    print("KERNEL_OK")
</pallas_src>

<mosaic_0001>
module attributes {stable_mosaic.version = 11 : i64} {
  func.func @_convt_kernel(%arg0: i32, %arg1: memref<1x18x18x4xbf16, #tpu.memory_space<vmem>>, %arg2: memref<2x24x16xbf16, #tpu.memory_space<vmem>>, %arg3: memref<1x16xf32, #tpu.memory_space<vmem>>, %arg4: memref<1x16x2x16x16xf32, #tpu.memory_space<vmem>>, %arg5: memref<256x24xbf16, #tpu.memory_space<vmem>>) attributes {dimension_semantics = [#tpu.dimension_semantics<parallel>], iteration_bounds = array<i64: 2>, scalar_prefetch = 0 : i64, scratch_operands = 1 : i64, tpu.core_type = #tpu.core_type<tc>, window_params = [{transform_indices = @transform_0, window_bounds = array<i64: 1, 18, 18, 4>}, {pipeline_mode = #tpu.pipeline_mode<synchronous>, transform_indices = @transform_1, window_bounds = array<i64: 2, 24, 16>}, {pipeline_mode = #tpu.pipeline_mode<synchronous>, transform_indices = @transform_2, window_bounds = array<i64: 1, 16>}, {transform_indices = @transform_3, window_bounds = array<i64: 1, 16, 2, 16, 16>}]} {
    %c0 = arith.constant 0 : index
    %c1 = arith.constant 1 : index
    %c0_0 = arith.constant 0 : index
    %c0_1 = arith.constant 0 : index
    %0 = vector.load %arg1[%c0, %c1, %c0_0, %c0_1] : memref<1x18x18x4xbf16, #tpu.memory_space<vmem>>, vector<1x16x16x4xbf16>
    %1 = vector.shape_cast %0 : vector<1x16x16x4xbf16> to vector<16x16x4xbf16>
    %2 = vector.shape_cast %1 : vector<16x16x4xbf16> to vector<256x4xbf16>
    %c0_2 = arith.constant 0 : index
    %c0_3 = arith.constant 0 : index
    %3 = vector.load %arg5[%c0_2, %c0_3] : memref<256x24xbf16, #tpu.memory_space<vmem>>, vector<256x4xbf16>
    tpu.vector_store %arg5[%c0_2, %c0_3], %2 {strides = array<i32>} : memref<256x24xbf16, #tpu.memory_space<vmem>>, vector<256x4xbf16>,
    %c0_4 = arith.constant 0 : index
    %c1_5 = arith.constant 1 : index
    %c1_6 = arith.constant 1 : index
    %c0_7 = arith.constant 0 : index
    %4 = vector.load %arg1[%c0_4, %c1_5, %c1_6, %c0_7] : memref<1x18x18x4xbf16, #tpu.memory_space<vmem>>, vector<1x16x16x4xbf16>
    %5 = vector.shape_cast %4 : vector<1x16x16x4xbf16> to vector<16x16x4xbf16>
    %6 = vector.shape_cast %5 : vector<16x16x4xbf16> to vector<256x4xbf16>
    %c0_8 = arith.constant 0 : index
    %c4 = arith.constant 4 : index
    %7 = vector.load %arg5[%c0_8, %c4] : memref<256x24xbf16, #tpu.memory_space<vmem>>, vector<256x4xbf16>
    tpu.vector_store %arg5[%c0_8, %c4], %6 {strides = array<i32>} : memref<256x24xbf16, #tpu.memory_space<vmem>>, vector<256x4xbf16>,
    %c0_9 = arith.constant 0 : index
    %c1_10 = arith.constant 1 : index
    %c2 = arith.constant 2 : index
    %c0_11 = arith.constant 0 : index
    %8 = vector.load %arg1[%c0_9, %c1_10, %c2, %c0_11] : memref<1x18x18x4xbf16, #tpu.memory_space<vmem>>, vector<1x16x16x4xbf16>
    %9 = vector.shape_cast %8 : vector<1x16x16x4xbf16> to vector<16x16x4xbf16>
    %10 = vector.shape_cast %9 : vector<16x16x4xbf16> to vector<256x4xbf16>
    %c0_12 = arith.constant 0 : index
    %c8 = arith.constant 8 : index
    %11 = vector.load %arg5[%c0_12, %c8] : memref<256x24xbf16, #tpu.memory_space<vmem>>, vector<256x4xbf16>
    tpu.vector_store %arg5[%c0_12, %c8], %10 {strides = array<i32>} : memref<256x24xbf16, #tpu.memory_space<vmem>>, vector<256x4xbf16>,
    %c0_13 = arith.constant 0 : index
    %c0_14 = arith.constant 0 : index
    %c0_15 = arith.constant 0 : index
    %c0_16 = arith.constant 0 : index
    %12 = vector.load %arg1[%c0_13, %c0_14, %c0_15, %c0_16] : memref<1x18x18x4xbf16, #tpu.memory_space<vmem>>, vector<1x16x16x4xbf16>
    %13 = vector.shape_cast %12 : vector<1x16x16x4xbf16> to vector<16x16x4xbf16>
    %14 = vector.shape_cast %13 : vector<16x16x4xbf16> to vector<256x4xbf16>
    %c0_17 = arith.constant 0 : index
    %c12 = arith.constant 12 : index
    %15 = vector.load %arg5[%c0_17, %c12] : memref<256x24xbf16, #tpu.memory_space<vmem>>, vector<256x4xbf16>
    tpu.vector_store %arg5[%c0_17, %c12], %14 {strides = array<i32>} : memref<256x24xbf16, #tpu.memory_space<vmem>>, vector<256x4xbf16>,
    %c0_18 = arith.constant 0 : index
    %c0_19 = arith.constant 0 : index
    %c1_20 = arith.constant 1 : index
    %c0_21 = arith.constant 0 : index
    %16 = vector.load %arg1[%c0_18, %c0_19, %c1_20, %c0_21] : memref<1x18x18x4xbf16, #tpu.memory_space<vmem>>, vector<1x16x16x4xbf16>
    %17 = vector.shape_cast %16 : vector<1x16x16x4xbf16> to vector<16x16x4xbf16>
    %18 = vector.shape_cast %17 : vector<16x16x4xbf16> to vector<256x4xbf16>
    %c0_22 = arith.constant 0 : index
    %c16 = arith.constant 16 : index
    %19 = vector.load %arg5[%c0_22, %c16] : memref<256x24xbf16, #tpu.memory_space<vmem>>, vector<256x4xbf16>
    tpu.vector_store %arg5[%c0_22, %c16], %18 {strides = array<i32>} : memref<256x24xbf16, #tpu.memory_space<vmem>>, vector<256x4xbf16>,
    %c0_23 = arith.constant 0 : index
    %c0_24 = arith.constant 0 : index
    %c2_25 = arith.constant 2 : index
    %c0_26 = arith.constant 0 : index
    %20 = vector.load %arg1[%c0_23, %c0_24, %c2_25, %c0_26] : memref<1x18x18x4xbf16, #tpu.memory_space<vmem>>, vector<1x16x16x4xbf16>
    %21 = vector.shape_cast %20 : vector<1x16x16x4xbf16> to vector<16x16x4xbf16>
    %22 = vector.shape_cast %21 : vector<16x16x4xbf16> to vector<256x4xbf16>
    %c0_27 = arith.constant 0 : index
    %c20 = arith.constant 20 : index
    %23 = vector.load %arg5[%c0_27, %c20] : memref<256x24xbf16, #tpu.memory_space<vmem>>, vector<256x4xbf16>
    tpu.vector_store %arg5[%c0_27, %c20], %22 {strides = array<i32>} : memref<256x24xbf16, #tpu.memory_space<vmem>>, vector<256x4xbf16>,
    %c0_28 = arith.constant 0 : index
    %c0_29 = arith.constant 0 : index
    %24 = vector.load %arg5[%c0_28, %c0_29] : memref<256x24xbf16, #tpu.memory_space<vmem>>, vector<256x24xbf16>
    %c0_30 = arith.constant 0 : index
    %c0_31 = arith.constant 0 : index
    %c0_32 = arith.constant 0 : index
    %25 = vector.load %arg2[%c0_30, %c0_31, %c0_32] : memref<2x24x16xbf16, #tpu.memory_space<vmem>>, vector<1x24x16xbf16>
    %26 = vector.shape_cast %25 : vector<1x24x16xbf16> to vector<24x16xbf16>
    %cst = arith.constant dense<0.000000e+00> : vector<256x16xf32>
    %27 = tpu.matmul %24, %26, %cst {dimension_numbers = #tpu.dot_dimension_numbers<[1], [0], [0], [1], [0, 0, 1, 1], [], []>} : vector<256x24xbf16>, vector<24x16xbf16>, vector<256x16xf32> -> vector<256x16xf32>
    %c0_33 = arith.constant 0 : index
    %c0_34 = arith.constant 0 : index
    %28 = vector.load %arg3[%c0_33, %c0_34] : memref<1x16xf32, #tpu.memory_space<vmem>>, vector<1x16xf32>
    %29 = vector.broadcast %28 : vector<1x16xf32> to vector<256x16xf32>
    %30 = arith.addf %27, %29 : vector<256x16xf32>
    %cst_35 = arith.constant 0.000000e+00 : f32
    %31 = vector.broadcast %cst_35 : f32 to vector<256x16xf32>
    %32 = arith.maximumf %30, %31 : vector<256x16xf32>
    %33 = vector.shape_cast %32 : vector<256x16xf32> to vector<16x16x16xf32>
    %c0_36 = arith.constant 0 : index
    %c0_37 = arith.constant 0 : index
    %c0_38 = arith.constant 0 : index
    %c0_39 = arith.constant 0 : index
    %c0_40 = arith.constant 0 : index
    %34 = vector.load %arg4[%c0_36, %c0_37, %c0_38, %c0_39, %c0_40] : memref<1x16x2x16x16xf32, #tpu.memory_space<vmem>>, vector<1x16x1x16x16xf32>
    %35 = vector.shape_cast %34 : vector<1x16x1x16x16xf32> to vector<16x16x16xf32>
    %36 = vector.shape_cast %33 : vector<16x16x16xf32> to vector<1x16x1x16x16xf32>
    tpu.vector_store %arg4[%c0_36, %c0_37, %c0_38, %c0_39, %c0_40], %36 {strides = array<i32>} : memref<1x16x2x16x16xf32, #tpu.memory_space<vmem>>, vector<1x16x1x16x16xf32>,
    %c0_41 = arith.constant 0 : index
    %c2_42 = arith.constant 2 : index
    %c0_43 = arith.constant 0 : index
    %c0_44 = arith.constant 0 : index
    %37 = vector.load %arg1[%c0_41, %c2_42, %c0_43, %c0_44] : memref<1x18x18x4xbf16, #tpu.memory_space<vmem>>, vector<1x16x16x4xbf16>
    %38 = vector.shape_cast %37 : vector<1x16x16x4xbf16> to vector<16x16x4xbf16>
    %39 = vector.shape_cast %38 : vector<16x16x4xbf16> to vector<256x4xbf16>
    %c0_45 = arith.constant 0 : index
    %c0_46 = arith.constant 0 : index
    %40 = vector.load %arg5[%c0_45, %c0_46] : memref<256x24xbf16, #tpu.memory_space<vmem>>, vector<256x4xbf16>
    tpu.vector_store %arg5[%c0_45, %c0_46], %39 {strides = array<i32>} : memref<256x24xbf16, #tpu.memory_space<vmem>>, vector<256x4xbf16>,
    %c0_47 = arith.constant 0 : index
    %c2_48 = arith.constant 2 : index
    %c1_49 = arith.constant 1 : index
    %c0_50 = arith.constant 0 : index
    %41 = vector.load %arg1[%c0_47, %c2_48, %c1_49, %c0_50] : memref<1x18x18x4xbf16, #tpu.memory_space<vmem>>, vector<1x16x16x4xbf16>
    %42 = vector.shape_cast %41 : vector<1x16x16x4xbf16> to vector<16x16x4xbf16>
    %43 = vector.shape_cast %42 : vector<16x16x4xbf16> to vector<256x4xbf16>
    %c0_51 = arith.constant 0 : index
    %c4_52 = arith.constant 4 : index
    %44 = vector.load %arg5[%c0_51, %c4_52] : memref<256x24xbf16, #tpu.memory_space<vmem>>, vector<256x4xbf16>
    tpu.vector_store %arg5[%c0_51, %c4_52], %43 {strides = array<i32>} : memref<256x24xbf16, #tpu.memory_space<vmem>>, vector<256x4xbf16>,
    %c0_53 = arith.constant 0 : index
    %c2_54 = arith.constant 2 : index
    %c2_55 = arith.constant 2 : index
    %c0_56 = arith.constant 0 : index
    %45 = vector.load %arg1[%c0_53, %c2_54, %c2_55, %c0_56] : memref<1x18x18x4xbf16, #tpu.memory_space<vmem>>, vector<1x16x16x4xbf16>
    %46 = vector.shape_cast %45 : vector<1x16x16x4xbf16> to vector<16x16x4xbf16>
    %47 = vector.shape_cast %46 : vector<16x16x4xbf16> to vector<256x4xbf16>
    %c0_57 = arith.constant 0 : index
    %c8_58 = arith.constant 8 : index
    %48 = vector.load %arg5[%c0_57, %c8_58] : memref<256x24xbf16, #tpu.memory_space<vmem>>, vector<256x4xbf16>
    tpu.vector_store %arg5[%c0_57, %c8_58], %47 {strides = array<i32>} : memref<256x24xbf16, #tpu.memory_space<vmem>>, vector<256x4xbf16>,
    %c0_59 = arith.constant 0 : index
    %c1_60 = arith.constant 1 : index
    %c0_61 = arith.constant 0 : index
    %c0_62 = arith.constant 0 : index
    %49 = vector.load %arg1[%c0_59, %c1_60, %c0_61, %c0_62] : memref<1x18x18x4xbf16, #tpu.memory_space<vmem>>, vector<1x16x16x4xbf16>
    %50 = vector.shape_cast %49 : vector<1x16x16x4xbf16> to vector<16x16x4xbf16>
    %51 = vector.shape_cast %50 : vector<16x16x4xbf16> to vector<256x4xbf16>
    %c0_63 = arith.constant 0 : index
    %c12_64 = arith.constant 12 : index
    %52 = vector.load %arg5[%c0_63, %c12_64] : memref<256x24xbf16, #tpu.memory_space<vmem>>, vector<256x4xbf16>
    tpu.vector_store %arg5[%c0_63, %c12_64], %51 {strides = array<i32>} : memref<256x24xbf16, #tpu.memory_space<vmem>>, vector<256x4xbf16>,
    %c0_65 = arith.constant 0 : index
    %c1_66 = arith.constant 1 : index
    %c1_67 = arith.constant 1 : index
    %c0_68 = arith.constant 0 : index
    %53 = vector.load %arg1[%c0_65, %c1_66, %c1_67, %c0_68] : memref<1x18x18x4xbf16, #tpu.memory_space<vmem>>, vector<1x16x16x4xbf16>
    %54 = vector.shape_cast %53 : vector<1x16x16x4xbf16> to vector<16x16x4xbf16>
    %55 = vector.shape_cast %54 : vector<16x16x4xbf16> to vector<256x4xbf16>
    %c0_69 = arith.constant 0 : index
    %c16_70 = arith.constant 16 : index
    %56 = vector.load %arg5[%c0_69, %c16_70] : memref<256x24xbf16, #tpu.memory_space<vmem>>, vector<256x4xbf16>
    tpu.vector_store %arg5[%c0_69, %c16_70], %55 {strides = array<i32>} : memref<256x24xbf16, #tpu.memory_space<vmem>>, vector<256x4xbf16>,
    %c0_71 = arith.constant 0 : index
    %c1_72 = arith.constant 1 : index
    %c2_73 = arith.constant 2 : index
    %c0_74 = arith.constant 0 : index
    %57 = vector.load %arg1[%c0_71, %c1_72, %c2_73, %c0_74] : memref<1x18x18x4xbf16, #tpu.memory_space<vmem>>, vector<1x16x16x4xbf16>
    %58 = vector.shape_cast %57 : vector<1x16x16x4xbf16> to vector<16x16x4xbf16>
    %59 = vector.shape_cast %58 : vector<16x16x4xbf16> to vector<256x4xbf16>
    %c0_75 = arith.constant 0 : index
    %c20_76 = arith.constant 20 : index
    %60 = vector.load %arg5[%c0_75, %c20_76] : memref<256x24xbf16, #tpu.memory_space<vmem>>, vector<256x4xbf16>
    tpu.vector_store %arg5[%c0_75, %c20_76], %59 {strides = array<i32>} : memref<256x24xbf16, #tpu.memory_space<vmem>>, vector<256x4xbf16>,
    %c0_77 = arith.constant 0 : index
    %c0_78 = arith.constant 0 : index
    %61 = vector.load %arg5[%c0_77, %c0_78] : memref<256x24xbf16, #tpu.memory_space<vmem>>, vector<256x24xbf16>
    %c1_79 = arith.constant 1 : index
    %c0_80 = arith.constant 0 : index
    %c0_81 = arith.constant 0 : index
    %62 = vector.load %arg2[%c1_79, %c0_80, %c0_81] : memref<2x24x16xbf16, #tpu.memory_space<vmem>>, vector<1x24x16xbf16>
    %63 = vector.shape_cast %62 : vector<1x24x16xbf16> to vector<24x16xbf16>
    %cst_82 = arith.constant dense<0.000000e+00> : vector<256x16xf32>
    %64 = tpu.matmul %61, %63, %cst_82 {dimension_numbers = #tpu.dot_dimension_numbers<[1], [0], [0], [1], [0, 0, 1, 1], [], []>} : vector<256x24xbf16>, vector<24x16xbf16>, vector<256x16xf32> -> vector<256x16xf32>
    %c0_83 = arith.constant 0 : index
    %c0_84 = arith.constant 0 : index
    %65 = vector.load %arg3[%c0_83, %c0_84] : memref<1x16xf32, #tpu.memory_space<vmem>>, vector<1x16xf32>
    %66 = vector.broadcast %65 : vector<1x16xf32> to vector<256x16xf32>
    %67 = arith.addf %64, %66 : vector<256x16xf32>
    %cst_85 = arith.constant 0.000000e+00 : f32
    %68 = vector.broadcast %cst_85 : f32 to vector<256x16xf32>
    %69 = arith.maximumf %67, %68 : vector<256x16xf32>
    %70 = vector.shape_cast %69 : vector<256x16xf32> to vector<16x16x16xf32>
    %c0_86 = arith.constant 0 : index
    %c0_87 = arith.constant 0 : index
    %c1_88 = arith.constant 1 : index
    %c0_89 = arith.constant 0 : index
    %c0_90 = arith.constant 0 : index
    %71 = vector.load %arg4[%c0_86, %c0_87, %c1_88, %c0_89, %c0_90] : memref<1x16x2x16x16xf32, #tpu.memory_space<vmem>>, vector<1x16x1x16x16xf32>
    %72 = vector.shape_cast %71 : vector<1x16x1x16x16xf32> to vector<16x16x16xf32>
    %73 = vector.shape_cast %70 : vector<16x16x16xf32> to vector<1x16x1x16x16xf32>
    tpu.vector_store %arg4[%c0_86, %c0_87, %c1_88, %c0_89, %c0_90], %73 {strides = array<i32>} : memref<1x16x2x16x16xf32, #tpu.memory_space<vmem>>, vector<1x16x1x16x16xf32>,
    return
  }
  func.func @transform_0(%arg0: i32) -> (i32, i32, i32, i32) {
    %c0_i32 = arith.constant 0 : i32
    %c0_i32_0 = arith.constant 0 : i32
    %c0_i32_1 = arith.constant 0 : i32
    %c0_i32_2 = arith.constant 0 : i32
    return %arg0, %c0_i32, %c0_i32_0, %c0_i32_1 : i32, i32, i32, i32
  }
  func.func @transform_1(%arg0: i32) -> (i32, i32, i32) {
    %c0_i32 = arith.constant 0 : i32
    %c0_i32_0 = arith.constant 0 : i32
    %c0_i32_1 = arith.constant 0 : i32
    %c0_i32_2 = arith.constant 0 : i32
    return %c0_i32, %c0_i32_0, %c0_i32_1 : i32, i32, i32
  }
  func.func @transform_2(%arg0: i32) -> (i32, i32) {
    %c0_i32 = arith.constant 0 : i32
    %c0_i32_0 = arith.constant 0 : i32
    %c0_i32_1 = arith.constant 0 : i32
    return %c0_i32, %c0_i32_0 : i32, i32
  }
  func.func @transform_3(%arg0: i32) -> (i32, i32, i32, i32, i32) {
    %c0_i32 = arith.constant 0 : i32
    %c0_i32_0 = arith.constant 0 : i32
    %c0_i32_1 = arith.constant 0 : i32
    %c0_i32_2 = arith.constant 0 : i32
    %c0_i32_3 = arith.constant 0 : i32
    return %arg0, %c0_i32, %c0_i32_0, %c0_i32_1, %c0_i32_2 : i32, i32, i32, i32, i32
  }
}

</mosaic_0001>

<bundles_post_ra>
// kernel: tpu_custom_call.1
= control target key start
LH: loop header
LB: loop body
LE: loop exit
PB: predicated region body
PF: predicated region fallthrough
CT: control target
= control target key end

     0   :  { %8 = vsyncpa [#allocation4], 0  ;;  %s8162_s0 = inlined_call_operand.vmem [shape: bf16[2,18,18,4], index: 0, kind: input, shape index: {}]   ;;  %s8163_s1 = inlined_call_operand.vmem [shape: bf16[2,24,16], index: 1, kind: input, shape index: {}]   ;;  %s8164_s2 = inlined_call_operand.vmem [shape: f32[1,16], index: 2, kind: input, shape index: {}]   ;;  %s8165_s3 = inlined_call_operand.hbm [shape: f32[2,16,2,16,16], index: 3, kind: output, shape index: {}]  }
   0x1   :  { %10 = vsyncpa [#allocation4 + $0x1], 0  ;;  %s5867_s12 = smov 0   ;;  %s5869_s13 = smov 0  }
   0x2   :  { %s5871_s14 = smov 0   ;;  %s5873_s15 = smov 0  }
   0x3 LB: > { %s5888_s16 = sadd.s32 4294967295, %s5839_s15   ;;  %s5027_s17 = sadd.s32 4294967294, %s5839_s15   ;;  %s5839_s15 = sphi %s5873_s15, %s8175_s15   ;;  %s5835_s14 = sphi %s5871_s14, %s8174_s14   ;;  %s5831_s13 = sphi %s5869_s13, %s8173_s13   ;;  %s5827_s12 = sphi %s5867_s12, %s8172_s12  }
   0x4   : > { %s5892_s18 = sadd.s32 1, %s5839_s15   ;;  %s91_s19 = sadd.s32 1, %s5835_s14 }
   0x5   : > { %s88_s20 = ssub.s32 %s5839_s15, %s5892_s18  ;;  %p101_p0 = scmp.ne.s32.totalorder %s5835_s14, %s5831_s13 }
   0x6   : > { %p89_p1 = scmp.eq.s32.totalorder %s88_s20, 0  ;;  %p102_p2 = scmp.eq.s32.totalorder %s5888_s16, 1 }
   0x7   : > { %p107_p3 = scmp.ne.s32.totalorder %s5831_s13, %s5827_s12  ;;  %p108_p4 = scmp.eq.s32.totalorder %s5027_s17, 1 }
   0x8   : > { %s5903_s21 = scalar_select %p89_p1, %s5835_s14, %s91_s19  }
   0x9   : > { %p5905_p5 = por %p102_p2, %p101_p0  ;;  %p5909_p6 = por %p108_p4, %p107_p3 }
   0xa   : > { %p5030_p7 = scmp.ge.s32.totalorder %s5839_s15, 1  ;;  %p140_p8 = scmp.lt.s32.totalorder %s5839_s15, 3 }
   0xc   : > { %p141_p9 = pnand %p5030_p7, %p140_p8 }
   0xd   : > { %p164_p10 = scmp.lt.s32.totalorder (!%p141_p9), %s5888_s16, 1  ;;  %s5841_s29 = smov (!%p141_p9), 4  }
   0xe   : > { %144 = sbr.rel (%p141_p9) target bundleno = 1148 (0x47c), region = 32  ;;  %s5842_s30 = smov (!%p141_p9), 8  }
   0xf   : > { %s5843_s4 = smov (!%p141_p9), 12   ;;  %s5844_s5 = smov (!%p141_p9), 16  }
  0x10   : > { %s5845_s6 = smov (!%p141_p9), 20   ;;  %s161_s11 = sand.u32 (!%p141_p9), 1, %s5831_s13  }
  0x11   : > { %s5031_s20 = sshll.u32 (!%p141_p9), %s161_s11, 9 }
  0x13   : > { %s165_s24 = scalar_select %p164_p10, %s5888_s16, 1  ;;  %vm284_vm0 = vsmask.f32 3328  ;;  %vm285_vm1 = vsmask.f32 7440  ;;  %vm896_vm3 = vcmask 1042432  }
  0x14   : > { %vm5931_vm2 = vmor %vm284_vm0, %vm285_vm1  ;;  %vm897_vm4 = vcmask 1046532   ;;  %vm203_vm5 = vcmask 27648   ;;  %vm767_vm7 = vcmask 60448   ;;  %vm1107_vm8 = vcmask 93248  }
  0x15   : > { %s5728_s25 = smul.u32 216, %s165_s24  ;;  %vm6106_vm6 = vmor %vm896_vm3, %vm897_vm4  ;;  %vm1300_vm9 = vcmask 126048   ;;  %vm1861_vm10 = vcmask 158848   ;;  %vm2408_vm11 = vcmask 1043456   ;;  %vm2198_vm12 = vcmask 191648   ;;  %s7405_s24 = scalar_lea.vmem [#allocation3], %s5031_s20 }
  0x16   : > { %vm2359_vm13 = vcmask 195584   ;;  %vm2533_vm14 = vcmask 130048   ;;  %s4962_s17 = sshll.u32 %s7405_s24, 4  ;;  %s4963_s17 = int_to_ptr.vmem [resolvable:$true] %s4962_s17 }
  0x17   : > { %s5920_s28 = scalar_lea.vmem %s8162_s0, %s5728_s25 }
  0x18   : > { %v5068_v0 = vld [vmem:[%s5920_s28 + $0x18] sm:$0xf]  ;;  %v5069_v1 = vld [vmem:[%s5920_s28 + $0x1c] sm:$0xf]  ;;  %v5065_v2 = vld [vmem:[%s5920_s28 + $0xc] sm:$0xf] }
  0x19   : > { %v312_v3 = vshrl.u32 %v5068_v0, 16  ;;  %v315_v4 = vshll.u32 %v5068_v0, 16  ;;  %v321_v5 = vshll.u32 %v5069_v1, 16  ;;  %v325_v6 = vshrl.u32 %v5069_v1, 16  ;;  %v5066_v7 = vld [vmem:[%s5920_s28 + $0x10] sm:$0xf] }
  0x1a   : > { %v288_v8 = vshrl.u32 %v5065_v2, 16  ;;  %v291_v9 = vshll.u32 %v5065_v2, 16  ;;  %v297_v10 = vshll.u32 %v5066_v7, 16  ;;  %v301_v11 = vshrl.u32 %v5066_v7, 16  ;;  %v5070_v12 = vld [vmem:[%s5920_s28 + $0x20] sm:$0x1] }
  0x1b   : > { %v314_v13 = vrot.slane %v312_v3, 4  ;;  %v317_v14 = vrot.slane %v315_v4, 5  ;;  %v323_v15 = vrot.slane %v321_v5, 5  ;;  %v327_v16 = vrot.slane %v325_v6, 4  ;;  %v5067_v17 = vld [vmem:[%s5920_s28 + $0x14] sm:$0x1] }
  0x1c   : > { %v290_v18 = vrot.slane %v288_v8, 4  ;;  %v293_v19 = vrot.slane %v291_v9, 5  ;;  %v303_v20 = vrot.slane %v301_v11, 4  ;;  %v5075_v21 = vld [vmem:[%s5920_s28 + $0x34] sm:$0xf]  ;;  %v331_v24 = vshll.u32 %v5070_v12, 16 }
  0x1d   : > { %v318_v22 = vor.u32 %v317_v14, %v314_v13  ;;  %v328_v23 = vor.u32 %v327_v16, %v323_v15  ;;  %v299_v27 = vrot.slane %v297_v10, 5  ;;  %v369_v28 = vshll.u32 %v5075_v21, 16  ;;  %v5074_v30 = vld [vmem:[%s5920_s28 + $0x30] sm:$0xf]  ;;  %v5071_v35 = vld [vmem:[%s5920_s28 + $0x24] sm:$0xf] }
  0x1e   : > { %v294_v26 = vor.u32 %v293_v19, %v290_v18  ;;  %v373_v29 = vshrl.u32 %v5075_v21, 16  ;;  %v307_v32 = vshll.u32 %v5067_v17, 16  ;;  %v333_v38 = vrot.slane %v331_v24, 5  ;;  %v5072_v40 = vld [vmem:[%s5920_s28 + $0x28] sm:$0xf] }
  0x1f   : > { %v319_v31 = vrot.slane %v318_v22, 4  ;;  %v304_v34 = vor.u32 %v303_v20, %v299_v27  ;;  %v329_v37 = vrot.slane %v328_v23, 4  ;;  %v360_v39 = vshrl.u32 %v5074_v30, 16  ;;  %v5076_v42 = vld [vmem:[%s5920_s28 + $0x38] sm:$0x1] }
  0x20   : > { %v295_v33 = vrot.slane %v294_v26, 4  ;;  %v5944_v43 = vrot.slane %v369_v28, 5  ;;  %v375_v44 = vrot.slane %v373_v29, 4  ;;  %v363_v45 = vshll.u32 %v5074_v30, 16  ;;  %v5080_v50 = vld [vmem:[%s5920_s28 + $0x48] sm:$0xf] }
  0x21   : > { %v324_v36 = vsel %vm5931_vm2, %v319_v31, %v323_v15  ;;  %v309_v46 = vrot.slane %v307_v32, 5  ;;  %v362_v47 = vrot.slane %v360_v39, 4  ;;  %v336_v48 = vshrl.u32 %v5071_v35, 16  ;;  %v5078_v58 = vld [vmem:[%s5920_s28 + $0x40] sm:$0xf] }
  0x22   : > { %675 = vrot.lane.b32.xlu1 %v324_v36, %s5841_s29  ;;  %v300_v41 = vsel %vm5931_vm2, %v295_v33, %v299_v27  ;;  %v339_v49 = vshll.u32 %v5071_v35, 16  ;;  %v305_v51 = vrot.slane %v304_v34, 4  ;;  %v365_v52 = vrot.slane %v363_v45, 5  ;;  %v5073_v6 = vld [vmem:[%s5920_s28 + $0x2c] sm:$0x1] }
  0x23   : > { %671 = vrot.lane.b32.xlu0 %v300_v41, %s5841_s29  ;;  %v345_v53 = vshll.u32 %v5072_v40, 16  ;;  %v349_v54 = vshrl.u32 %v5072_v40, 16  ;;  %v379_v55 = vshll.u32 %v5076_v42, 16  ;;  %v338_v56 = vrot.slane %v336_v48, 4  ;;  %v5081_v15 = vld [vmem:[%s5920_s28 + $0x4c] sm:$0xf] }
  0x24   : > { %v341_v57 = vrot.slane %v339_v49, 5  ;;  %v376_v59 = vor.u32 %v375_v44, %v5944_v43  ;;  %v408_v61 = vshrl.u32 %v5080_v50, 16  ;;  %v411_v62 = vshll.u32 %v5080_v50, 16  ;;  %v5079_v16 = vld [vmem:[%s5920_s28 + $0x44] sm:$0x1] }
  0x25   : > { %v351_v60 = vrot.slane %v349_v54, 4  ;;  %v334_v63 = vsel %vm5931_vm2, %v329_v37, %v333_v38  ;;  %v366_v0 = vor.u32 %v365_v52, %v362_v47  ;;  %v347_v2 = vrot.slane %v345_v53, 5  ;;  %v5084_v20 = vld [vmem:[%s5920_s28 + $0x58] sm:$0xf]  ;;  %v5077_v21 = vld [vmem:[%s5920_s28 + $0x3c] sm:$0xf] }
  0x26   : > { %v342_v1 = vor.u32 %v341_v57, %v338_v56  ;;  %v310_v3 = vsel %vm5931_vm2, %v305_v51, %v309_v46  ;;  %v393_v4 = vshll.u32 %v5078_v58, 16  ;;  %v397_v5 = vshrl.u32 %v5078_v58, 16  ;;  %v5083_v24 = vld [vmem:[%s5920_s28 + $0x54] sm:$0xf]  ;;  %v5089_v47 = vld [vmem:[%s5920_s28 + $0x6c] sm:$0xf] }
  0x27   : > { %v381_v7 = vrot.slane %v379_v55, 5  ;;  %v377_v9 = vrot.slane %v376_v59, 4  ;;  %v410_v10 = vrot.slane %v408_v61, 4  ;;  %v413_v11 = vrot.slane %v411_v62, 5  ;;  %v5085_v49 = vld [vmem:[%s5920_s28 + $0x5c] sm:$0x1] }
  0x28   : > { %v343_v8 = vrot.slane %v342_v1, 4  ;;  %v352_v12 = vor.u32 %v351_v60, %v347_v2  ;;  %v367_v13 = vrot.slane %v366_v0, 4  ;;  %v355_v17 = vshll.u32 %v5073_v6, 16  ;;  %v5087_v53 = vld [vmem:[%s5920_s28 + $0x64] sm:$0xf] }
  0x29   : > { %v5962_v18 = vrot.slane %v393_v4, 5  ;;  %v399_v19 = vrot.slane %v397_v5, 4  ;;  %v382_v26 = vsel %vm5931_vm2, %v377_v9, %v381_v7  ;;  %v414_v27 = vor.u32 %v413_v11, %v410_v10  ;;  %v5082_v58 = vld [vmem:[%s5920_s28 + $0x50] sm:$0x1]  ;;  %v5093_v11 = vld [vmem:[%s5920_s28 + $0x7c] sm:$0xf] }
  0x2a   : > { %677 = vrot.lane.b32.xlu1 %v334_v63, %s5841_s29  ;;  %v348_v14 = vsel %vm5931_vm2, %v343_v8, %v347_v2  ;;  %v353_v22 = vrot.slane %v352_v12, 4  ;;  %v357_v23 = vrot.slane %v355_v17, 5  ;;  %v417_v28 = vshll.u32 %v5081_v15, 16  ;;  %v5086_v2 = vld [vmem:[%s5920_s28 + $0x60] sm:$0xf] }
  0x2b   : > { %673 = vrot.lane.b32.xlu0 %v310_v3, %s5841_s29  ;;  %679 = vrot.lane.b32.xlu2 %v348_v14, %s5841_s29  ;;  %v403_v29 = vshll.u32 %v5079_v16, 16  ;;  %v372_v30 = vsel %vm5931_vm2, %v367_v13, %v5944_v43  ;;  %v441_v31 = vshll.u32 %v5084_v20, 16  ;;  %v445_v32 = vshrl.u32 %v5084_v20, 16  ;;  %v5090_v6 = vld [vmem:[%s5920_s28 + $0x70] sm:$0xf] }
  0x2c   : > { %v384_v33 = vshrl.u32 %v5077_v21, 16  ;;  %v400_v34 = vor.u32 %v399_v19, %v5962_v18  ;;  %v432_v35 = vshrl.u32 %v5083_v24, 16  ;;  %v435_v36 = vshll.u32 %v5083_v24, 16  ;;  %v5092_v20 = vld [vmem:[%s5920_s28 + $0x78] sm:$0xf] }
  0x2d   : > { %v387_v37 = vshll.u32 %v5077_v21, 16  ;;  %v421_v38 = vshrl.u32 %v5081_v15, 16  ;;  %v358_v39 = vsel %vm5931_vm2, %v353_v22, %v357_v23  ;;  %v419_v41 = vrot.slane %v417_v28, 5  ;;  %v5088_v15 = vld [vmem:[%s5920_s28 + $0x68] sm:$0x1] }
  0x2e   : > { %v386_v40 = vrot.slane %v384_v33, 4  ;;  %v415_v43 = vrot.slane %v414_v27, 4  ;;  %v405_v44 = vrot.slane %v403_v29, 5  ;;  %v5977_v45 = vrot.slane %v441_v31, 5 }
  0x2f   : > { %v389_v42 = vrot.slane %v387_v37, 5  ;;  %v447_v46 = vrot.slane %v445_v32, 4  ;;  %v401_v48 = vrot.slane %v400_v34, 4  ;;  %v434_v50 = vrot.slane %v432_v35, 4 }
  0x30   : > { %v437_v51 = vrot.slane %v435_v36, 5  ;;  %v423_v54 = vrot.slane %v421_v38, 4  ;;  %v480_v56 = vshrl.u32 %v5089_v47, 16  ;;  %v483_v57 = vshll.u32 %v5089_v47, 16  ;;  %v5096_v47 = vld [vmem:[%s5920_s28 + $0x88] sm:$0xf] }
  0x31   : > { %v390_v52 = vor.u32 %v389_v42, %v386_v40  ;;  %v420_v59 = vsel %vm5931_vm2, %v415_v43, %v419_v41  ;;  %v448_v60 = vor.u32 %v447_v46, %v5977_v45  ;;  %v451_v61 = vshll.u32 %v5085_v49, 16  ;;  %v5098_v42 = vld [vmem:[%s5920_s28 + $0x90] sm:$0xf]  ;;  %v5091_v49 = vld [vmem:[%s5920_s28 + $0x74] sm:$0x1] }
  0x32   : > { %685 = vrot.lane.b32.xlu1 %v382_v26, %s5841_s29  ;;  %v406_v62 = vsel %vm5931_vm2, %v401_v48, %v405_v44  ;;  %v438_v63 = vor.u32 %v437_v51, %v434_v50  ;;  %v465_v0 = vshll.u32 %v5087_v53, 16  ;;  %v469_v1 = vshrl.u32 %v5087_v53, 16 }
  0x33   : > { %683 = vrot.lane.b32.xlu0 %v372_v30, %s5841_s29  ;;  %681 = vrot.lane.b32.xlu2 %v358_v39, %s5841_s29  ;;  %v391_v55 = vrot.slane %v390_v52, 4  ;;  %v424_v4 = vor.u32 %v423_v54, %v419_v41  ;;  %v427_v5 = vshll.u32 %v5082_v58, 16  ;;  %v482_v7 = vrot.slane %v480_v56, 4  ;;  %v5094_v41 = vld [vmem:[%s5920_s28 + $0x80] sm:$0x1] }
  0x34   : > { %v485_v8 = vrot.slane %v483_v57, 5  ;;  %v449_v9 = vrot.slane %v448_v60, 4  ;;  %v453_v10 = vrot.slane %v451_v61, 5  ;;  %v456_v12 = vshrl.u32 %v5086_v2, 16  ;;  %v5095_v54 = vld [vmem:[%s5920_s28 + $0x84] sm:$0xf] }
  0x35   : > { %v396_v3 = vsel %vm5931_vm2, %v391_v55, %v5962_v18  ;;  %v459_v13 = vshll.u32 %v5086_v2, 16  ;;  %v439_v14 = vrot.slane %v438_v63, 4  ;;  %v5999_v16 = vrot.slane %v465_v0, 5 }
  0x36   : > { %v471_v17 = vrot.slane %v469_v1, 4  ;;  %v425_v18 = vrot.slane %v424_v4, 4  ;;  %v429_v19 = vrot.slane %v427_v5, 5  ;;  %v458_v21 = vrot.slane %v456_v12, 4  ;;  %v5099_v4 = vld [vmem:[%s5920_s28 + $0x94] sm:$0xf] }
  0x37   : > { %v461_v22 = vrot.slane %v459_v13, 5  ;;  %v486_v23 = vor.u32 %v485_v8, %v482_v7  ;;  %v489_v24 = vshll.u32 %v5090_v6, 16  ;;  %v513_v26 = vshll.u32 %v5093_v11, 16 }
  0x38   : > { %v517_v27 = vshrl.u32 %v5093_v11, 16  ;;  %v454_v28 = vsel %vm5931_vm2, %v449_v9, %v453_v10  ;;  %v475_v29 = vshll.u32 %v5088_v15, 16  ;;  %v444_v30 = vsel %vm5931_vm2, %v439_v14, %v5977_v45  ;;  %v5102_v9 = vld [vmem:[%s5920_s28 + $0xa0] sm:$0xf]  ;;  %v5097_v11 = vld [vmem:[%s5920_s28 + $0x8c] sm:$0x1] }
  0x39   : > { %v472_v31 = vor.u32 %v471_v17, %v5999_v16  ;;  %v504_v32 = vshrl.u32 %v5092_v20, 16  ;;  %v507_v33 = vshll.u32 %v5092_v20, 16  ;;  %v493_v34 = vshrl.u32 %v5090_v6, 16  ;;  %v5101_v14 = vld [vmem:[%s5920_s28 + $0x9c] sm:$0xf] }
  0x3a   : > { %691 = vrot.lane.b32.xlu1 %v420_v59, %s5841_s29  ;;  %v430_v35 = vsel %vm5931_vm2, %v425_v18, %v429_v19  ;;  %v462_v36 = vor.u32 %v461_v22, %v458_v21  ;;  %v487_v37 = vrot.slane %v486_v23, 4  ;;  %v491_v38 = vrot.slane %v489_v24, 5 }
  0x3b   : > { %689 = vrot.lane.b32.xlu0 %v406_v62, %s5841_s29  ;;  %687 = vrot.lane.b32.xlu2 %v396_v3, %s5841_s29  ;;  %v6011_v39 = vrot.slane %v513_v26, 5  ;;  %v519_v40 = vrot.slane %v517_v27, 4  ;;  %v473_v43 = vrot.slane %v472_v31, 4  ;;  %v477_v44 = vrot.slane %v475_v29, 5 }
  0x3c   : > { %v506_v45 = vrot.slane %v504_v32, 4  ;;  %v509_v46 = vrot.slane %v507_v33, 5  ;;  %v463_v48 = vrot.slane %v462_v36, 4  ;;  %v495_v50 = vrot.slane %v493_v34, 4 }
  0x3d   : > { %v492_v51 = vsel %vm5931_vm2, %v487_v37, %v491_v38  ;;  %v520_v52 = vor.u32 %v519_v40, %v6011_v39  ;;  %v523_v53 = vshll.u32 %v5094_v41, 16  ;;  %v552_v55 = vshrl.u32 %v5098_v42, 16  ;;  %v5103_v37 = vld [vmem:[%s5920_s28 + $0xa4] sm:$0x1]  ;;  %v5107_v40 = vld [vmem:[%s5920_s28 + $0xb4] sm:$0xf] }
  0x3e   : > { %v555_v56 = vshll.u32 %v5098_v42, 16  ;;  %v537_v57 = vshll.u32 %v5096_v47, 16  ;;  %v541_v58 = vshrl.u32 %v5096_v47, 16  ;;  %v478_v59 = vsel %vm5931_vm2, %v473_v43, %v477_v44  ;;  %v5105_v42 = vld [vmem:[%s5920_s28 + $0xac] sm:$0xf] }
  0x3f   : > { %v510_v60 = vor.u32 %v509_v46, %v506_v45  ;;  %v499_v61 = vshll.u32 %v5091_v49, 16  ;;  %v468_v62 = vsel %vm5931_vm2, %v463_v48, %v5999_v16  ;;  %v496_v63 = vor.u32 %v495_v50, %v491_v38  ;;  %v5100_v43 = vld [vmem:[%s5920_s28 + $0x98] sm:$0x1]  ;;  %v5104_v47 = vld [vmem:[%s5920_s28 + $0xa8] sm:$0xf] }
  0x40   : > { %v528_v0 = vshrl.u32 %v5095_v54, 16  ;;  %v531_v1 = vshll.u32 %v5095_v54, 16  ;;  %v521_v2 = vrot.slane %v520_v52, 4  ;;  %v525_v3 = vrot.slane %v523_v53, 5 }
  0x41   : > { %v554_v5 = vrot.slane %v552_v55, 4  ;;  %v557_v6 = vrot.slane %v555_v56, 5  ;;  %v6031_v7 = vrot.slane %v537_v57, 5  ;;  %v543_v8 = vrot.slane %v541_v58, 4 }
  0x42   : > { %697 = vrot.lane.b32.xlu1 %v454_v28, %s5841_s29  ;;  %v511_v10 = vrot.slane %v510_v60, 4  ;;  %v497_v12 = vrot.slane %v496_v63, 4  ;;  %v501_v13 = vrot.slane %v499_v61, 5  ;;  %v530_v15 = vrot.slane %v528_v0, 4 }
  0x43   : > { %695 = vrot.lane.b32.xlu0 %v444_v30, %s5841_s29  ;;  %693 = vrot.lane.b32.xlu2 %v430_v35, %s5841_s29  ;;  %v533_v16 = vrot.slane %v531_v1, 5  ;;  %v561_v17 = vshll.u32 %v5099_v4, 16  ;;  %v585_v18 = vshll.u32 %v5102_v9, 16  ;;  %v589_v19 = vshrl.u32 %v5102_v9, 16  ;;  %v5106_v1 = vld [vmem:[%s5920_s28 + $0xb0] sm:$0x1] }
  0x44   : > { %v526_v20 = vsel %vm5931_vm2, %v521_v2, %v525_v3  ;;  %v558_v21 = vor.u32 %v557_v6, %v554_v5  ;;  %v544_v22 = vor.u32 %v543_v8, %v6031_v7  ;;  %v547_v23 = vshll.u32 %v5097_v11, 16  ;;  %v5111_v5 = vld [vmem:[%s5920_s28 + $0xc4] sm:$0xf]  ;;  %v5110_v8 = vld [vmem:[%s5920_s28 + $0xc0] sm:$0xf] }
  0x45   : > { %v516_v24 = vsel %vm5931_vm2, %v511_v10, %v6011_v39  ;;  %v576_v26 = vshrl.u32 %v5101_v14, 16  ;;  %v579_v27 = vshll.u32 %v5101_v14, 16  ;;  %v565_v28 = vshrl.u32 %v5099_v4, 16 }
  0x46   : > { %v502_v29 = vsel %vm5931_vm2, %v497_v12, %v501_v13  ;;  %v534_v30 = vor.u32 %v533_v16, %v530_v15  ;;  %v6046_v31 = vrot.slane %v585_v18, 5  ;;  %v591_v32 = vrot.slane %v589_v19, 4 }
  0x47   : > { %v559_v33 = vrot.slane %v558_v21, 4  ;;  %v563_v34 = vrot.slane %v561_v17, 5  ;;  %v545_v35 = vrot.slane %v544_v22, 4  ;;  %v549_v36 = vrot.slane %v547_v23, 5 }
  0x48   : > { %v578_v38 = vrot.slane %v576_v26, 4  ;;  %v581_v39 = vrot.slane %v579_v27, 5  ;;  %v535_v41 = vrot.slane %v534_v30, 4  ;;  %v567_v44 = vrot.slane %v565_v28, 4 }
  0x49   : > { %v592_v45 = vor.u32 %v591_v32, %v6046_v31  ;;  %v595_v46 = vshll.u32 %v5103_v37, 16  ;;  %v564_v48 = vsel %vm5931_vm2, %v559_v33, %v563_v34  ;;  %v550_v49 = vsel %vm5931_vm2, %v545_v35, %v549_v36  ;;  %v5109_v36 = vld [vmem:[%s5920_s28 + $0xbc] sm:$0x1] }
  0x4a   : > { %703 = vrot.lane.b32.xlu1 %v492_v51, %s5841_s29  ;;  %v624_v50 = vshrl.u32 %v5107_v40, 16  ;;  %v627_v51 = vshll.u32 %v5107_v40, 16  ;;  %v582_v52 = vor.u32 %v581_v39, %v578_v38  ;;  %v609_v53 = vshll.u32 %v5105_v42, 16 }
  0x4b   : > { %701 = vrot.lane.b32.xlu0 %v478_v59, %s5841_s29  ;;  %699 = vrot.lane.b32.xlu2 %v468_v62, %s5841_s29  ;;  %v613_v54 = vshrl.u32 %v5105_v42, 16  ;;  %v571_v55 = vshll.u32 %v5100_v43, 16  ;;  %v540_v56 = vsel %vm5931_vm2, %v535_v41, %v6031_v7  ;;  %v568_v57 = vor.u32 %v567_v44, %v563_v34  ;;  %v5108_v62 = vld [vmem:[%s5920_s28 + $0xb8] sm:$0xf] }
  0x4c   : > { %v600_v58 = vshrl.u32 %v5104_v47, 16  ;;  %v603_v59 = vshll.u32 %v5104_v47, 16  ;;  %v593_v60 = vrot.slane %v592_v45, 4  ;;  %v597_v61 = vrot.slane %v595_v46, 5 }
  0x4d   : > { %v626_v63 = vrot.slane %v624_v50, 4  ;;  %v629_v0 = vrot.slane %v627_v51, 5  ;;  %v583_v2 = vrot.slane %v582_v52, 4  ;;  %v611_v3 = vrot.slane %v609_v53, 5  ;;  %v5116_v51 = vld [vmem:[%s5920_s28 + $0x18] sm:$0xe] }
  0x4e   : > { %v615_v4 = vrot.slane %v613_v54, 4  ;;  %v569_v6 = vrot.slane %v568_v57, 4  ;;  %v573_v7 = vrot.slane %v571_v55, 5  ;;  %v602_v9 = vrot.slane %v600_v58, 4  ;;  %v5117_v53 = vld [vmem:[%s5920_s28 + $0x1c] sm:$0xf] }
  0x4f   : > { %v605_v10 = vrot.slane %v603_v59, 5  ;;  %v598_v11 = vsel %vm5931_vm2, %v593_v60, %v597_v61  ;;  %v633_v12 = vshll.u32 %v5108_v62, 16  ;;  %v630_v13 = vor.u32 %v629_v0, %v626_v63  ;;  %v5115_v54 = vld [vmem:[%s5920_s28 + $0x14] sm:$0x1]  ;;  %v5113_v61 = vld [vmem:[%s5920_s28 + $0xc] sm:$0xe] }
  0x50   : > { %v619_v14 = vshll.u32 %v5106_v1, 16  ;;  %v657_v15 = vshll.u32 %v5111_v5, 16  ;;  %v661_v16 = vshrl.u32 %v5111_v5, 16  ;;  %v588_v17 = vsel %vm5931_vm2, %v583_v2, %v6046_v31  ;;  %v5112_v31 = vld [vmem:[%s5920_s28 + $0xc8] sm:$0x1] }
  0x51   : > { %v616_v18 = vor.u32 %v615_v4, %v611_v3  ;;  %v648_v19 = vshrl.u32 %v5110_v8, 16  ;;  %v637_v21 = vshrl.u32 %v5108_v62, 16  ;;  %v574_v22 = vsel %vm5931_vm2, %v569_v6, %v573_v7  ;;  %v5120_v63 = vld [vmem:[%s5920_s28 + $0x28] sm:$0xf]  ;;  %v5037_v0 = vld [vmem:[%s5920_s28 + $0x24] sm:$0xf] }
  0x52   : > { %709 = vrot.lane.b32.xlu1 %v526_v20, %s5841_s29  ;;  %v651_v20 = vshll.u32 %v5110_v8, 16  ;;  %v606_v23 = vor.u32 %v605_v10, %v602_v9  ;;  %v635_v26 = vrot.slane %v633_v12, 5  ;;  %v659_v27 = vrot.slane %v657_v15, 5  ;;  %208 = vst.msk [vmem:[#allocation2 + $0x10] sm:$0xf] %vm203_vm5, %v5037_v0 }
  0x53   : > { %707 = vrot.lane.b32.xlu0 %v516_v24, %s5841_s29  ;;  %705 = vrot.lane.b32.xlu2 %v502_v29, %s5841_s29  ;;  %v631_v24 = vrot.slane %v630_v13, 4  ;;  %v663_v28 = vrot.slane %v661_v16, 4  ;;  %v617_v29 = vrot.slane %v616_v18, 4  ;;  %v621_v30 = vrot.slane %v619_v14, 5  ;;  %v5035_v2 = vld [vmem:[%s5920_s28 + $0x18] sm:$0xf] }
  0x54   : > { %v650_v32 = vrot.slane %v648_v19, 4  ;;  %v653_v33 = vrot.slane %v651_v20, 5  ;;  %v607_v34 = vrot.slane %v606_v23, 4  ;;  %v639_v35 = vrot.slane %v637_v21, 4  ;;  %206 = vst.msk [vmem:[#allocation2 + $0x8] sm:$0xf] %vm203_vm5, %v5035_v2 }
  0x55   : > { %v636_v37 = vsel %vm5931_vm2, %v631_v24, %v635_v26  ;;  %v664_v38 = vor.u32 %v663_v28, %v659_v27  ;;  %v667_v39 = vshll.u32 %v5112_v31, 16  ;;  %v622_v40 = vsel %vm5931_vm2, %v617_v29, %v621_v30  ;;  %v5121_v6 = vld [vmem:[%s5920_s28 + $0x2c] sm:$0x1]  ;;  %v5119_v9 = vld [vmem:[%s5920_s28 + $0x24] sm:$0xe] }
  0x56   : > { %v654_v41 = vor.u32 %v653_v33, %v650_v32  ;;  %v612_v42 = vsel %vm5931_vm2, %v607_v34, %v611_v3  ;;  %v640_v43 = vor.u32 %v639_v35, %v635_v26  ;;  %v643_v44 = vshll.u32 %v5109_v36, 16  ;;  %v5033_v3 = vld [vmem:[%s5920_s28 + $0xc] sm:$0xf]  ;;  %v5118_v12 = vld [vmem:[%s5920_s28 + $0x20] sm:$0x1] }
  0x57   : > { %v665_v45 = vrot.slane %v664_v38, 4  ;;  %v669_v46 = vrot.slane %v667_v39, 5  ;;  %v5162_v58 = vrot.slane %v5116_v51, 9  ;;  %v908_v59 = vrot.slane %v5117_v53, 5  ;;  %204 = vst.msk [vmem:[#allocation2] sm:$0xf] %vm203_vm5, %v5033_v3 }
  0x58   : > { %v655_v47 = vrot.slane %v654_v41, 4  ;;  %v645_v50 = vrot.slane %v643_v44, 5  ;;  %v904_v60 = vrot.slane %v5115_v54, 5  ;;  %v5161_v4 = vrot.slane %v5113_v61, 9  ;;  %v5123_v15 = vld [vmem:[%s5920_s28 + $0x34] sm:$0xf] }
  0x59   : > { %v670_v52 = vsel %vm5931_vm2, %v665_v45, %v669_v46  ;;  %v909_v5 = vsel %vm6106_vm6, %v5162_v58, %v908_v59  ;;  %v915_v7 = vrot.slane %v5120_v63, 5  ;;  %v5163_v14 = vrot.slane %v5119_v9, 9  ;;  %v5038_v16 = vld [vmem:[%s5920_s28 + $0x28] sm:$0xf]  ;;  %v5034_v18 = vld [vmem:[%s5920_s28 + $0x10] sm:$0xf] }
  0x5a   : > { %715 = vrot.lane.b32.xlu1 %v564_v48, %s5841_s29  ;;  %v5114_v48 = vld [vmem:[%s5920_s28 + $0x10] sm:$0xf]  ;;  %209 = vst.msk [vmem:[#allocation2 + $0x14] sm:$0xf] %vm203_vm5, %v5038_v16  ;;  %v910_v19 = vrot.slane %v908_v59, 4  ;;  %v911_v20 = vrot.slane %v5118_v12, 5 }
  0x5b   : > { %713 = vrot.lane.b32.xlu0 %v550_v49, %s5841_s29  ;;  %711 = vrot.lane.b32.xlu2 %v540_v56, %s5841_s29  ;;  %v641_v49 = vrot.slane %v640_v43, 4  ;;  %v901_v55 = vrot.slane %v5114_v48, 5  ;;  %v660_v56 = vsel %vm5931_vm2, %v655_v47, %v659_v27  ;;  %v917_v13 = vrot.slane %v915_v7, 4  ;;  %205 = vst.msk [vmem:[#allocation2 + $0x4] sm:$0xf] %vm203_vm5, %v5034_v18 }
  0x5c   : > { %v5126_v23 = vld [vmem:[%s5920_s28 + $0x40] sm:$0xf]  ;;  %v922_v24 = vrot.slane %v5123_v15, 5  ;;  %v916_v26 = vsel %vm6106_vm6, %v5163_v14, %v915_v7  ;;  %v5124_v27 = vld [vmem:[%s5920_s28 + $0x38] sm:$0x1]  ;;  %v912_v28 = vsel %vm6106_vm6, %v910_v19, %v911_v20 }
  0x5d   : > { %v646_v57 = vsel %vm5931_vm2, %v641_v49, %v645_v50  ;;  %v903_v62 = vrot.slane %v901_v55, 4  ;;  %v902_v10 = vsel %vm6106_vm6, %v5161_v4, %v901_v55  ;;  %v929_v30 = vrot.slane %v5126_v23, 5  ;;  %v5122_v31 = vld [vmem:[%s5920_s28 + $0x30] sm:$0xe]  ;;  %v5129_v34 = vld [vmem:[%s5920_s28 + $0x4c] sm:$0xf] }
  0x5e   : > { %v924_v32 = vrot.slane %v922_v24, 4  ;;  %v925_v33 = vrot.slane %v5124_v27, 5  ;;  %v5041_v35 = vld [vmem:[%s5920_s28 + $0x3c] sm:$0xf]  ;;  %v5040_v36 = vld [vmem:[%s5920_s28 + $0x34] sm:$0xf] }
  0x5f   : > { %v905_v8 = vsel %vm6106_vm6, %v903_v62, %v904_v60  ;;  %212 = vst.msk [vmem:[#allocation2 + $0x20] sm:$0xf] %vm203_vm5, %v5041_v35  ;;  %v5164_v38 = vrot.slane %v5122_v31, 9  ;;  %v936_v41 = vrot.slane %v5129_v34, 5  ;;  %v5130_v43 = vld [vmem:[%s5920_s28 + $0x50] sm:$0x1] }
  0x60   : > { %211 = vst.msk [vmem:[#allocation2 + $0x1c] sm:$0xf] %vm203_vm5, %v5040_v36  ;;  %v5128_v44 = vld [vmem:[%s5920_s28 + $0x48] sm:$0xe]  ;;  %v5127_v46 = vld [vmem:[%s5920_s28 + $0x44] sm:$0x1] }
  0x61   : > { %v923_v45 = vsel %vm6106_vm6, %v5164_v38, %v922_v24  ;;  %v938_v47 = vrot.slane %v936_v41, 4  ;;  %v939_v48 = vrot.slane %v5130_v43, 5  ;;  %v5166_v49 = vrot.slane %v5128_v44, 9  ;;  %v5044_v50 = vld [vmem:[%s5920_s28 + $0x4c] sm:$0xf] }
  0x62   : > { %721 = vrot.lane.b32.xlu1 %v598_v11, %s5841_s29  ;;  %v918_v11 = vrot.slane %v5121_v6, 5  ;;  %215 = vst.msk [vmem:[#allocation2 + $0x2c] sm:$0xf] %vm203_vm5, %v5044_v50  ;;  %v5043_v51 = vld [vmem:[%s5920_s28 + $0x48] sm:$0xf]  ;;  %v931_v54 = vrot.slane %v929_v30, 4 }
  0x63   : > { %719 = vrot.lane.b32.xlu0 %v588_v17, %s5841_s29  ;;  %717 = vrot.lane.b32.xlu2 %v574_v22, %s5841_s29  ;;  %v5036_v17 = vld [vmem:[%s5920_s28 + $0x1c] sm:$0xf]  ;;  %v5132_v53 = vld [vmem:[%s5920_s28 + $0x58] sm:$0xf]  ;;  %v932_v55 = vrot.slane %v5127_v46, 5  ;;  %v937_v58 = vsel %vm6106_vm6, %v5166_v49, %v936_v41 }
  0x64   : > { %207 = vst.msk [vmem:[#allocation2 + $0xc] sm:$0xf] %vm203_vm5, %v5036_v17  ;;  %v919_v21 = vsel %vm6106_vm6, %v917_v13, %v918_v11  ;;  %v5125_v22 = vld [vmem:[%s5920_s28 + $0x3c] sm:$0xe]  ;;  %v5134_v59 = vld [vmem:[%s5920_s28 + $0x60] sm:$0xe] }
  0x65   : > { %v5165_v29 = vrot.slane %v5125_v22, 9  ;;  %214 = vst.msk [vmem:[#allocation2 + $0x28] sm:$0xf] %vm203_vm5, %v5043_v51  ;;  %v5135_v60 = vld [vmem:[%s5920_s28 + $0x64] sm:$0xf]  ;;  %v943_v61 = vrot.slane %v5132_v53, 5  ;;  %v933_v63 = vsel %vm6106_vm6, %v931_v54, %v932_v55 }
  0x66   : > { %v5133_v62 = vld [vmem:[%s5920_s28 + $0x5c] sm:$0x1]  ;;  %v5131_v0 = vld [vmem:[%s5920_s28 + $0x54] sm:$0xe]  ;;  %v5168_v2 = vrot.slane %v5134_v59, 9  ;;  %v950_v3 = vrot.slane %v5135_v60, 5 }
  0x67   : > { %v5047_v4 = vld [vmem:[%s5920_s28 + $0x60] sm:$0xf]  ;;  %v945_v6 = vrot.slane %v943_v61, 4  ;;  %v946_v7 = vrot.slane %v5133_v62, 5  ;;  %v5046_v11 = vld [vmem:[%s5920_s28 + $0x58] sm:$0xf] }
  0x68   : > { %218 = vst.msk [vmem:[#allocation2 + $0x38] sm:$0xf] %vm203_vm5, %v5047_v4  ;;  %v5045_v13 = vld [vmem:[%s5920_s28 + $0x54] sm:$0xf]  ;;  %v951_v14 = vsel %vm6106_vm6, %v5168_v2, %v950_v3  ;;  %v5137_v18 = vld [vmem:[%s5920_s28 + $0x6c] sm:$0xe] }
  0x69   : > { %v947_v16 = vsel %vm6106_vm6, %v945_v6, %v946_v7  ;;  %v5139_v17 = vld [vmem:[%s5920_s28 + $0x74] sm:$0x1]  ;;  %217 = vst.msk [vmem:[#allocation2 + $0x34] sm:$0xf] %vm203_vm5, %v5046_v11  ;;  %v5136_v20 = vld [vmem:[%s5920_s28 + $0x68] sm:$0x1] }
  0x6a   : > { %727 = vrot.lane.b32.xlu1 %v636_v37, %s5841_s29  ;;  %v5039_v37 = vld [vmem:[%s5920_s28 + $0x30] sm:$0xf]  ;;  %216 = vst.msk [vmem:[#allocation2 + $0x30] sm:$0xf] %vm203_vm5, %v5045_v13  ;;  %v960_v22 = vrot.slane %v5139_v17, 5 }
  0x6b   : > { %725 = vrot.lane.b32.xlu0 %v622_v40, %s5841_s29  ;;  %723 = vrot.lane.b32.xlu2 %v612_v42, %s5841_s29  ;;  %210 = vst.msk [vmem:[#allocation2 + $0x18] sm:$0xf] %vm203_vm5, %v5039_v37  ;;  %v930_v40 = vsel %vm6106_vm6, %v5165_v29, %v929_v30  ;;  %v926_v42 = vsel %vm6106_vm6, %v924_v32, %v925_v33  ;;  %v5050_v23 = vld [vmem:[%s5920_s28 + $0x70] sm:$0xf]  ;;  %v5141_v27 = vld [vmem:[%s5920_s28 + $0x7c] sm:$0xf] }
  0x6c   : > { %221 = vst.msk [vmem:[#allocation2 + $0x44] sm:$0xf] %vm203_vm5, %v5050_v23  ;;  %v952_v29 = vrot.slane %v950_v3, 4  ;;  %v953_v30 = vrot.slane %v5136_v20, 5  ;;  %v5049_v31 = vld [vmem:[%s5920_s28 + $0x6c] sm:$0xf] }
  0x6d   : > { %v5048_v33 = vld [vmem:[%s5920_s28 + $0x64] sm:$0xf]  ;;  %v5144_v37 = vld [vmem:[%s5920_s28 + $0x88] sm:$0xf]  ;;  %v964_v38 = vrot.slane %v5141_v27, 5 }
  0x6e   : > { %v5143_v35 = vld [vmem:[%s5920_s28 + $0x84] sm:$0xe]  ;;  %220 = vst.msk [vmem:[#allocation2 + $0x40] sm:$0xf] %vm203_vm5, %v5049_v31  ;;  %v5140_v41 = vld [vmem:[%s5920_s28 + $0x78] sm:$0xe] }
  0x6f   : > { %219 = vst.msk [vmem:[#allocation2 + $0x3c] sm:$0xf] %vm203_vm5, %v5048_v33  ;;  %v971_v43 = vrot.slane %v5144_v37, 5  ;;  %v5053_v44 = vld [vmem:[%s5920_s28 + $0x84] sm:$0xf]  ;;  %v966_v46 = vrot.slane %v964_v38, 4 }
  0x70   : > { %224 = vst.msk [vmem:[#allocation2 + $0x50] sm:$0xf] %vm203_vm5, %v5053_v44  ;;  %v5170_v50 = vrot.slane %v5140_v41, 9  ;;  %v5052_v51 = vld [vmem:[%s5920_s28 + $0x7c] sm:$0xf] }
  0x71   : > { %v5051_v53 = vld [vmem:[%s5920_s28 + $0x78] sm:$0xf]  ;;  %223 = vst.msk [vmem:[#allocation2 + $0x4c] sm:$0xf] %vm203_vm5, %v5052_v51  ;;  %v5145_v60 = vld [vmem:[%s5920_s28 + $0x8c] sm:$0x1] }
  0x72   : > { %733 = vrot.lane.b32.xlu1 %v670_v52, %s5841_s29  ;;  %v5042_v52 = vld [vmem:[%s5920_s28 + $0x40] sm:$0xf]  ;;  %v965_v59 = vsel %vm6106_vm6, %v5170_v50, %v964_v38  ;;  %222 = vst.msk [vmem:[#allocation2 + $0x48] sm:$0xf] %vm203_vm5, %v5051_v53  ;;  %v974_v6 = vrot.slane %v5145_v60, 5 }
  0x73   : > { %731 = vrot.lane.b32.xlu0 %v660_v56, %s5841_s29  ;;  %729 = vrot.lane.b32.xlu2 %v646_v57, %s5841_s29  ;;  %213 = vst.msk [vmem:[#allocation2 + $0x24] sm:$0xf] %vm203_vm5, %v5042_v52  ;;  %v940_v57 = vsel %vm6106_vm6, %v938_v47, %v939_v48  ;;  %v5147_v48 = vld [vmem:[%s5920_s28 + $0x94] sm:$0xf]  ;;  %v5150_v3 = vld [vmem:[%s5920_s28 + $0xa0] sm:$0xf] }
  0x74   : > { %v978_v55 = vrot.slane %v5147_v48, 5  ;;  %v5055_v7 = vld [vmem:[%s5920_s28 + $0x90] sm:$0xf]  ;;  %v5152_v11 = vld [vmem:[%s5920_s28 + $0xa8] sm:$0xe] }
  0x75   : > { %v5153_v13 = vld [vmem:[%s5920_s28 + $0xac] sm:$0xf]  ;;  %226 = vst.msk [vmem:[#allocation2 + $0x58] sm:$0xf] %vm203_vm5, %v5055_v7  ;;  %v5149_v17 = vld [vmem:[%s5920_s28 + $0x9c] sm:$0xe] }
  0x76   : > { %v5059_v20 = vld [vmem:[%s5920_s28 + $0xa8] sm:$0xf]  ;;  %v5173_v27 = vrot.slane %v5149_v17, 9  ;;  %v5154_v37 = vld [vmem:[%s5920_s28 + $0xb0] sm:$0x1] }
  0x77   : > { %230 = vst.msk [vmem:[#allocation2 + $0x68] sm:$0xf] %vm203_vm5, %v5059_v20  ;;  %v5160_v53 = vld [vmem:[%s5920_s28 + $0xc8] sm:$0x1]  ;;  %v1143_v7 = vld [vmem:[%s5920_s28 + $0x10] sm:$0xf] }
  0x78   : > { %v1148_v20 = vld [vmem:[%s5920_s28 + $0x30] sm:$0xf] }
  0x7a   : > { %1015 = vrot.lane.b32.xlu1 %v909_v5, %s5842_s30 }
  0x7b   : > { %1013 = vrot.lane.b32.xlu0 %v905_v8, %s5842_s30  ;;  %1011 = vrot.lane.b32.xlu2 %v902_v10, %s5842_s30  ;;  %v5138_v8 = vld [vmem:[%s5920_s28 + $0x70] sm:$0xf]  ;;  %v5167_v10 = vrot.slane %v5131_v0, 9 }
  0x7c   : > { %v957_v15 = vrot.slane %v5138_v8, 5 }
  0x7d   : > { %v944_v19 = vsel %vm6106_vm6, %v5167_v10, %v943_v61  ;;  %v980_v61 = vrot.slane %v978_v55, 4 }
  0x82   : > { %1021 = vrot.lane.b32.xlu1 %v919_v21, %s5842_s30  ;;  %v959_v21 = vrot.slane %v957_v15, 4 }
  0x83   : > { %1019 = vrot.lane.b32.xlu0 %v916_v26, %s5842_s30  ;;  %1017 = vrot.lane.b32.xlu2 %v912_v28, %s5842_s30  ;;  %v5169_v26 = vrot.slane %v5137_v18, 9  ;;  %v5174_v18 = vrot.slane %v5152_v11, 9 }
  0x84   : > { %v961_v34 = vsel %vm6106_vm6, %v959_v21, %v960_v22 }
  0x85   : > { %v680_v39 = vpop.permute.xlu2 %679  ;;  %v958_v36 = vsel %vm6106_vm6, %v5169_v26, %v957_v15  ;;  %v5151_v15 = vld [vmem:[%s5920_s28 + $0xa4] sm:$0x1] }
  0x86   : > { %772 = vst.msk [vmem:[#allocation2 + $0x10] sm:$0xf] %vm767_vm7, %v680_v39  ;;  %v5142_v39 = vld [vmem:[%s5920_s28 + $0x80] sm:$0x1]  ;;  %v988_v23 = vrot.slane %v5151_v15, 5 }
  0x87   : > { %v967_v47 = vrot.slane %v5142_v39, 5  ;;  %v1144_v15 = vld [vmem:[%s5920_s28 + $0x18] sm:$0xf] }
  0x8a   : > { %1027 = vrot.lane.b32.xlu1 %v930_v40, %s5842_s30  ;;  %v954_v40 = vsel %vm6106_vm6, %v952_v29, %v953_v30  ;;  %v5057_v30 = vld [vmem:[%s5920_s28 + $0x9c] sm:$0xf] }
  0x8b   : > { %1025 = vrot.lane.b32.xlu0 %v926_v42, %s5842_s30  ;;  %1023 = vrot.lane.b32.xlu2 %v923_v45, %s5842_s30  ;;  %v5171_v42 = vrot.slane %v5143_v35, 9  ;;  %v5155_v35 = vld [vmem:[%s5920_s28 + $0xb4] sm:$0xe]  ;;  %228 = vst.msk [vmem:[#allocation2 + $0x60] sm:$0xf] %vm203_vm5, %v5057_v30 }
  0x8d   : > { %v682_v56 = vpop.permute.xlu2 %681  ;;  %v972_v54 = vsel %vm6106_vm6, %v5171_v42, %v971_v43  ;;  %v5175_v42 = vrot.slane %v5155_v35, 9 }
  0x8e   : > { %773 = vst.msk [vmem:[#allocation2 + $0x14] sm:$0xf] %vm767_vm7, %v682_v56  ;;  %v968_v56 = vsel %vm6106_vm6, %v966_v46, %v967_v47  ;;  %v995_v46 = vrot.slane %v5154_v37, 5  ;;  %v5061_v47 = vld [vmem:[%s5920_s28 + $0xb4] sm:$0xf] }
  0x8f   : > { %232 = vst.msk [vmem:[#allocation2 + $0x70] sm:$0xf] %vm203_vm5, %v5061_v47 }
  0x92   : > { %1033 = vrot.lane.b32.xlu1 %v940_v57, %s5842_s30  ;;  %v5148_v57 = vld [vmem:[%s5920_s28 + $0x98] sm:$0x1] }
  0x93   : > { %1031 = vrot.lane.b32.xlu0 %v937_v58, %s5842_s30  ;;  %1029 = vrot.lane.b32.xlu2 %v933_v63, %s5842_s30  ;;  %v5146_v58 = vld [vmem:[%s5920_s28 + $0x90] sm:$0xe]  ;;  %v981_v62 = vrot.slane %v5148_v57, 5  ;;  %v5056_v63 = vld [vmem:[%s5920_s28 + $0x94] sm:$0xf] }
  0x94   : > { %v676_v5 = vpop.permute.xlu1 %675  ;;  %v5172_v2 = vrot.slane %v5146_v58, 9  ;;  %227 = vst.msk [vmem:[#allocation2 + $0x5c] sm:$0xf] %vm203_vm5, %v5056_v63  ;;  %v1009_v58 = vrot.slane %v5160_v53, 5  ;;  %v5063_v63 = vld [vmem:[%s5920_s28 + $0xc0] sm:$0xf] }
  0x95   : > { %770 = vst.msk [vmem:[#allocation2 + $0x8] sm:$0xf] %vm767_vm7, %v676_v5  ;;  %v672_v9 = vpop.permute.xlu0 %671  ;;  %v688_v12 = vpop.permute.xlu2 %687  ;;  %v973_v5 = vrot.slane %v971_v43, 4  ;;  %v982_v10 = vsel %vm6106_vm6, %v980_v61, %v981_v62  ;;  %v5159_v43 = vld [vmem:[%s5920_s28 + $0xc4] sm:$0xf] }
  0x96   : > { %768 = vst.msk [vmem:[#allocation2] sm:$0xf] %vm767_vm7, %v672_v9  ;;  %v5054_v9 = vld [vmem:[%s5920_s28 + $0x88] sm:$0xf]  ;;  %v5064_v61 = vld [vmem:[%s5920_s28 + $0xc4] sm:$0xf] }
  0x97   : > { %776 = vst.msk [vmem:[#allocation2 + $0x20] sm:$0xf] %vm767_vm7, %v688_v12  ;;  %v979_v12 = vsel %vm6106_vm6, %v5172_v2, %v978_v55  ;;  %v5158_v55 = vld [vmem:[%s5920_s28 + $0xc0] sm:$0xe] }
  0x98   : > { %225 = vst.msk [vmem:[#allocation2 + $0x54] sm:$0xf] %vm203_vm5, %v5054_v9  ;;  %v5176_v60 = vrot.slane %v5158_v55, 9  ;;  %v1141_v9 = vld [vmem:[%s5920_s28 + $0x4] sm:$0xf] }
  0x99   : > { %235 = vst.msk [vmem:[#allocation2 + $0x7c] sm:$0xf] %vm203_vm5, %v5064_v61  ;;  %v1166_v61 = vld [vmem:[%s5920_s28 + $0x9c] sm:$0xf] }
  0x9a   : > { %1039 = vrot.lane.b32.xlu1 %v951_v14, %s5842_s30  ;;  %v985_v14 = vrot.slane %v5150_v3, 5  ;;  %234 = vst.msk [vmem:[#allocation2 + $0x78] sm:$0xf] %vm203_vm5, %v5063_v63 }
  0x9b   : > { %1037 = vrot.lane.b32.xlu0 %v947_v16, %s5842_s30  ;;  %1035 = vrot.lane.b32.xlu2 %v944_v19, %s5842_s30  ;;  %v975_v16 = vsel %vm6106_vm6, %v973_v5, %v974_v6  ;;  %v992_v19 = vrot.slane %v5153_v13, 5  ;;  %v1146_v13 = vld [vmem:[%s5920_s28 + $0x24] sm:$0xf] }
  0x9c   : > { %v678_v24 = vpop.permute.xlu1 %677  ;;  %v987_v22 = vrot.slane %v985_v14, 4 }
  0x9d   : > { %771 = vst.msk [vmem:[#allocation2 + $0xc] sm:$0xf] %vm767_vm7, %v678_v24  ;;  %v674_v28 = vpop.permute.xlu0 %673  ;;  %v694_v32 = vpop.permute.xlu2 %693  ;;  %v5156_v24 = vld [vmem:[%s5920_s28 + $0xb8] sm:$0xf]  ;;  %v993_v31 = vsel %vm6106_vm6, %v5174_v18, %v992_v19 }
  0x9e   : > { %769 = vst.msk [vmem:[#allocation2 + $0x4] sm:$0xf] %vm767_vm7, %v674_v28  ;;  %v5058_v28 = vld [vmem:[%s5920_s28 + $0xa0] sm:$0xf]  ;;  %v989_v33 = vsel %vm6106_vm6, %v987_v22, %v988_v23 }
  0x9f   : > { %779 = vst.msk [vmem:[#allocation2 + $0x2c] sm:$0xf] %vm767_vm7, %v694_v32  ;;  %v999_v32 = vrot.slane %v5156_v24, 5 }
  0xa0   : > { %229 = vst.msk [vmem:[#allocation2 + $0x64] sm:$0xf] %vm203_vm5, %v5058_v28  ;;  %v1150_v28 = vld [vmem:[%s5920_s28 + $0x3c] sm:$0xf] }
  0xa1   : > { %v1001_v38 = vrot.slane %v999_v32, 4  ;;  %v1000_v51 = vsel %vm6106_vm6, %v5175_v42, %v999_v32  ;;  %v1155_v32 = vld [vmem:[%s5920_s28 + $0x58] sm:$0xf] }
  0xa2   : > { %1045 = vrot.lane.b32.xlu1 %v961_v34, %s5842_s30  ;;  %v5157_v34 = vld [vmem:[%s5920_s28 + $0xbc] sm:$0x1] }
  0xa3   : > { %1043 = vrot.lane.b32.xlu0 %v958_v36, %s5842_s30  ;;  %1041 = vrot.lane.b32.xlu2 %v954_v40, %s5842_s30  ;;  %v986_v36 = vsel %vm6106_vm6, %v5173_v27, %v985_v14  ;;  %v1002_v39 = vrot.slane %v5157_v34, 5  ;;  %v5062_v40 = vld [vmem:[%s5920_s28 + $0xb8] sm:$0xf]  ;;  %v1145_v14 = vld [vmem:[%s5920_s28 + $0x1c] sm:$0xf] }
  0xa4   : > { %v686_v45 = vpop.permute.xlu1 %685  ;;  %233 = vst.msk [vmem:[#allocation2 + $0x74] sm:$0xf] %vm203_vm5, %v5062_v40  ;;  %v1151_v27 = vld [vmem:[%s5920_s28 + $0x40] sm:$0xf]  ;;  %v1153_v34 = vld [vmem:[%s5920_s28 + $0x4c] sm:$0xf] }
  0xa5   : > { %775 = vst.msk [vmem:[#allocation2 + $0x1c] sm:$0xf] %vm767_vm7, %v686_v45  ;;  %v684_v49 = vpop.permute.xlu0 %683  ;;  %v700_v52 = vpop.permute.xlu2 %699  ;;  %v994_v45 = vrot.slane %v992_v19, 4  ;;  %v1003_v50 = vsel %vm6106_vm6, %v1001_v38, %v1002_v39  ;;  %v1149_v19 = vld [vmem:[%s5920_s28 + $0x34] sm:$0xf] }
  0xa6   : > { %774 = vst.msk [vmem:[#allocation2 + $0x18] sm:$0xf] %vm767_vm7, %v684_v49  ;;  %v5060_v49 = vld [vmem:[%s5920_s28 + $0xac] sm:$0xf]  ;;  %v1157_v39 = vld [vmem:[%s5920_s28 + $0x64] sm:$0xf] }
  0xa7   : > { %782 = vst.msk [vmem:[#allocation2 + $0x38] sm:$0xf] %vm767_vm7, %v700_v52  ;;  %v1006_v52 = vrot.slane %v5159_v43, 5  ;;  %v1158_v38 = vld [vmem:[%s5920_s28 + $0x6c] sm:$0xf] }
  0xa8   : > { %231 = vst.msk [vmem:[#allocation2 + $0x6c] sm:$0xf] %vm203_vm5, %v5060_v49  ;;  %v1156_v40 = vld [vmem:[%s5920_s28 + $0x60] sm:$0xf] }
  0xa9   : > { %v1008_v57 = vrot.slane %v1006_v52, 4  ;;  %v1007_v3 = vsel %vm6106_vm6, %v5176_v60, %v1006_v52  ;;  %v1162_v52 = vld [vmem:[%s5920_s28 + $0x84] sm:$0xf] }
  0xaa   : > { %1051 = vrot.lane.b32.xlu1 %v972_v54, %s5842_s30  ;;  %v996_v54 = vsel %vm6106_vm6, %v994_v45, %v995_v46  ;;  %v1160_v45 = vld [vmem:[%s5920_s28 + $0x78] sm:$0xf]  ;;  %v1159_v46 = vld [vmem:[%s5920_s28 + $0x70] sm:$0xf] }
  0xab   : > { %1049 = vrot.lane.b32.xlu0 %v968_v56, %s5842_s30  ;;  %1047 = vrot.lane.b32.xlu2 %v965_v59, %s5842_s30  ;;  %v1010_v2 = vsel %vm6106_vm6, %v1008_v57, %v1009_v58  ;;  %v1167_v58 = vld [vmem:[%s5920_s28 + $0xa0] sm:$0xf] }
  0xac   : > { %v692_v0 = vpop.permute.xlu1 %691 }
  0xad   : > { %778 = vst.msk [vmem:[#allocation2 + $0x28] sm:$0xf] %vm767_vm7, %v692_v0  ;;  %v690_v4 = vpop.permute.xlu0 %689  ;;  %v706_v8 = vpop.permute.xlu2 %705  ;;  %v1140_v0 = vld [vmem:[%s5920_s28] sm:$0xf] }
  0xae   : > { %777 = vst.msk [vmem:[#allocation2 + $0x24] sm:$0xf] %vm767_vm7, %v690_v4 }
  0xaf   : > { %785 = vst.msk [vmem:[#allocation2 + $0x44] sm:$0xf] %vm767_vm7, %v706_v8  ;;  %v1142_v8 = vld [vmem:[%s5920_s28 + $0xc] sm:$0xf] }
  0xb2   : > { %1057 = vrot.lane.b32.xlu1 %v982_v10, %s5842_s30 }
  0xb3   : > { %1055 = vrot.lane.b32.xlu0 %v979_v12, %s5842_s30  ;;  %1053 = vrot.lane.b32.xlu2 %v975_v16, %s5842_s30 }
  0xb4   : > { %v698_v21 = vpop.permute.xlu1 %697 }
  0xb5   : > { %781 = vst.msk [vmem:[#allocation2 + $0x34] sm:$0xf] %vm767_vm7, %v698_v21  ;;  %v696_v26 = vpop.permute.xlu0 %695  ;;  %v712_v29 = vpop.permute.xlu2 %711  ;;  %v1147_v21 = vld [vmem:[%s5920_s28 + $0x28] sm:$0xf] }
  0xb6   : > { %780 = vst.msk [vmem:[#allocation2 + $0x30] sm:$0xf] %vm767_vm7, %v696_v26  ;;  %v1152_v26 = vld [vmem:[%s5920_s28 + $0x48] sm:$0xf] }
  0xb7   : > { %788 = vst.msk [vmem:[#allocation2 + $0x50] sm:$0xf] %vm767_vm7, %v712_v29 }
  0xba   : > { %1063 = vrot.lane.b32.xlu1 %v993_v31, %s5842_s30 }
  0xbb   : > { %1061 = vrot.lane.b32.xlu0 %v989_v33, %s5842_s30  ;;  %1059 = vrot.lane.b32.xlu2 %v986_v36, %s5842_s30  ;;  %v1154_v33 = vld [vmem:[%s5920_s28 + $0x54] sm:$0xf] }
  0xbc   : > { %v704_v41 = vpop.permute.xlu1 %703 }
  0xbd   : > { %784 = vst.msk [vmem:[#allocation2 + $0x40] sm:$0xf] %vm767_vm7, %v704_v41  ;;  %v702_v44 = vpop.permute.xlu0 %701  ;;  %v718_v48 = vpop.permute.xlu2 %717 }
  0xbe   : > { %783 = vst.msk [vmem:[#allocation2 + $0x3c] sm:$0xf] %vm767_vm7, %v702_v44  ;;  %v1161_v44 = vld [vmem:[%s5920_s28 + $0x7c] sm:$0xf] }
  0xbf   : > { %791 = vst.msk [vmem:[#allocation2 + $0x5c] sm:$0xf] %vm767_vm7, %v718_v48 }
  0xc2   : > { %1069 = vrot.lane.b32.xlu1 %v1003_v50, %s5842_s30  ;;  %v1164_v50 = vld [vmem:[%s5920_s28 + $0x90] sm:$0xf] }
  0xc3   : > { %1067 = vrot.lane.b32.xlu0 %v1000_v51, %s5842_s30  ;;  %1065 = vrot.lane.b32.xlu2 %v996_v54, %s5842_s30  ;;  %v1163_v51 = vld [vmem:[%s5920_s28 + $0x88] sm:$0xf]  ;;  %v1334_v54 = vld [vmem:[%s5920_s28 + $0x4] sm:$0xf] }
  0xc4   : > { %v710_v56 = vpop.permute.xlu1 %709  ;;  %v1395_v60 = vshrl.u32 %v1334_v54, 16 }
  0xc5   : > { %787 = vst.msk [vmem:[#allocation2 + $0x4c] sm:$0xf] %vm767_vm7, %v710_v56  ;;  %v708_v59 = vpop.permute.xlu0 %707  ;;  %v724_v62 = vpop.permute.xlu2 %723  ;;  %v1333_v56 = vld [vmem:[%s5920_s28] sm:$0xf] }
  0xc6   : > { %786 = vst.msk [vmem:[#allocation2 + $0x48] sm:$0xf] %vm767_vm7, %v708_v59  ;;  %v1391_v59 = vshll.u32 %v1334_v54, 16  ;;  %v1385_v63 = vshll.u32 %v1333_v56, 16 }
  0xc7   : > { %794 = vst.msk [vmem:[#allocation2 + $0x68] sm:$0xf] %vm767_vm7, %v724_v62  ;;  %v1382_v62 = vshrl.u32 %v1333_v56, 16 }
  0xca   : > { %1204 = vrot.lane.b32.xlu1 %v1140_v0, %s5843_s4  ;;  %v1165_v0 = vld [vmem:[%s5920_s28 + $0x94] sm:$0xf] }
  0xcb   : > { %1073 = vrot.lane.b32.xlu0 %v1010_v2, %s5842_s30  ;;  %1071 = vrot.lane.b32.xlu2 %v1007_v3, %s5842_s30  ;;  %v1339_v2 = vld [vmem:[%s5920_s28 + $0x18] sm:$0xf]  ;;  %v6420_v3 = vrot.slane %v1391_v59, 5 }
  0xcc   : > { %v716_v4 = vpop.permute.xlu1 %715 }
  0xcd   : > { %790 = vst.msk [vmem:[#allocation2 + $0x58] sm:$0xf] %vm767_vm7, %v716_v4  ;;  %v714_v5 = vpop.permute.xlu0 %713  ;;  %v730_v6 = vpop.permute.xlu2 %729  ;;  %v1397_v4 = vrot.slane %v1395_v60, 4 }
  0xce   : > { %789 = vst.msk [vmem:[#allocation2 + $0x54] sm:$0xf] %vm767_vm7, %v714_v5 }
  0xcf   : > { %797 = vst.msk [vmem:[#allocation2 + $0x74] sm:$0xf] %vm767_vm7, %v730_v6  ;;  %v1335_v6 = vld [vmem:[%s5920_s28 + $0x8] sm:$0x1] }
  0xd2   : > { %1210 = vrot.lane.b32.xlu1 %v1143_v7, %s5843_s4  ;;  %v1384_v7 = vrot.slane %v1382_v62, 4 }
  0xd3   : > { %1208 = vrot.lane.b32.xlu0 %v1142_v8, %s5843_s4  ;;  %1206 = vrot.lane.b32.xlu2 %v1141_v9, %s5843_s4  ;;  %v1387_v8 = vrot.slane %v1385_v63, 5 }
  0xd4   : > { %v722_v10 = vpop.permute.xlu1 %721 }
  0xd5   : > { %793 = vst.msk [vmem:[#allocation2 + $0x64] sm:$0xf] %vm767_vm7, %v722_v10  ;;  %v720_v11 = vpop.permute.xlu0 %719  ;;  %v1012_v12 = vpop.permute.xlu2 %1011  ;;  %v1430_v10 = vshrl.u32 %v1339_v2, 16 }
  0xd6   : > { %792 = vst.msk [vmem:[#allocation2 + $0x60] sm:$0xf] %vm767_vm7, %v720_v11  ;;  %v1433_v11 = vshll.u32 %v1339_v2, 16  ;;  %v1348_v2 = vld [vmem:[%s5920_s28 + $0x3c] sm:$0xf] }
  0xd7   : > { %1108 = vst.msk [vmem:[#allocation2] sm:$0xf] %vm1107_vm8, %v1012_v12  ;;  %v1337_v12 = vld [vmem:[%s5920_s28 + $0x10] sm:$0xf] }
  0xda   : > { %1216 = vrot.lane.b32.xlu1 %v1146_v13, %s5843_s4 }
  0xdb   : > { %1214 = vrot.lane.b32.xlu0 %v1145_v14, %s5843_s4  ;;  %1212 = vrot.lane.b32.xlu2 %v1144_v15, %s5843_s4  ;;  %v1336_v14 = vld [vmem:[%s5920_s28 + $0xc] sm:$0xf]  ;;  %v1170_v15 = vld [vmem:[%s5920_s28 + $0xb4] sm:$0xf] }
  0xdc   : > { %v728_v16 = vpop.permute.xlu1 %727 }
  0xdd   : > { %796 = vst.msk [vmem:[#allocation2 + $0x70] sm:$0xf] %vm767_vm7, %v728_v16  ;;  %v726_v17 = vpop.permute.xlu0 %725  ;;  %v1018_v18 = vpop.permute.xlu2 %1017  ;;  %v1398_v16 = vor.u32 %v1397_v4, %v6420_v3 }
  0xde   : > { %795 = vst.msk [vmem:[#allocation2 + $0x6c] sm:$0xf] %vm767_vm7, %v726_v17  ;;  %v1401_v17 = vshll.u32 %v1335_v6, 16 }
  0xdf   : > { %1111 = vst.msk [vmem:[#allocation2 + $0xc] sm:$0xf] %vm1107_vm8, %v1018_v18  ;;  %v1169_v18 = vld [vmem:[%s5920_s28 + $0xac] sm:$0xf] }
  0xe2   : > { %1222 = vrot.lane.b32.xlu1 %v1149_v19, %s5843_s4  ;;  %v1388_v19 = vor.u32 %v1387_v8, %v1384_v7  ;;  %v1345_v7 = vld [vmem:[%s5920_s28 + $0x30] sm:$0xf] }
  0xe3   : > { %1220 = vrot.lane.b32.xlu0 %v1148_v20, %s5843_s4  ;;  %1218 = vrot.lane.b32.xlu2 %v1147_v21, %s5843_s4  ;;  %v1415_v20 = vshll.u32 %v1337_v12, 16  ;;  %v1419_v21 = vshrl.u32 %v1337_v12, 16 }
  0xe4   : > { %v734_v22 = vpop.permute.xlu1 %733 }
  0xe5   : > { %799 = vst.msk [vmem:[#allocation2 + $0x7c] sm:$0xf] %vm767_vm7, %v734_v22  ;;  %v732_v23 = vpop.permute.xlu0 %731  ;;  %v1024_v24 = vpop.permute.xlu2 %1023  ;;  %v1168_v22 = vld [vmem:[%s5920_s28 + $0xa8] sm:$0xf] }
  0xe6   : > { %798 = vst.msk [vmem:[#allocation2 + $0x78] sm:$0xf] %vm767_vm7, %v732_v23  ;;  %v1432_v23 = vrot.slane %v1430_v10, 4 }
  0xe7   : > { %1114 = vst.msk [vmem:[#allocation2 + $0x18] sm:$0xf] %vm1107_vm8, %v1024_v24  ;;  %v1435_v24 = vrot.slane %v1433_v11, 5 }
  0xea   : > { %1228 = vrot.lane.b32.xlu1 %v1152_v26, %s5843_s4  ;;  %v1406_v26 = vshrl.u32 %v1336_v14, 16 }
  0xeb   : > { %1226 = vrot.lane.b32.xlu0 %v1151_v27, %s5843_s4  ;;  %1224 = vrot.lane.b32.xlu2 %v1150_v28, %s5843_s4  ;;  %v1409_v27 = vshll.u32 %v1336_v14, 16  ;;  %v1340_v28 = vld [vmem:[%s5920_s28 + $0x1c] sm:$0xf]  ;;  %v1502_v14 = vshrl.u32 %v1348_v2, 16 }
  0xec   : > { %v1016_v29 = vpop.permute.xlu1 %1015  ;;  %v1443_v54 = vshrl.u32 %v1340_v28, 16 }
  0xed   : > { %1110 = vst.msk [vmem:[#allocation2 + $0x8] sm:$0xf] %vm1107_vm8, %v1016_v29  ;;  %v1014_v30 = vpop.permute.xlu0 %1013  ;;  %v1030_v31 = vpop.permute.xlu2 %1029  ;;  %v1399_v29 = vrot.slane %v1398_v16, 4 }
  0xee   : > { %1109 = vst.msk [vmem:[#allocation2 + $0x4] sm:$0xf] %vm1107_vm8, %v1014_v30  ;;  %v1403_v30 = vrot.slane %v1401_v17, 5  ;;  %v1445_v6 = vrot.slane %v1443_v54, 4 }
  0xef   : > { %1117 = vst.msk [vmem:[#allocation2 + $0x24] sm:$0xf] %vm1107_vm8, %v1030_v31  ;;  %v1343_v31 = vld [vmem:[%s5920_s28 + $0x28] sm:$0xf] }
  0xf2   : > { %1234 = vrot.lane.b32.xlu1 %v1155_v32, %s5843_s4  ;;  %v1342_v32 = vld [vmem:[%s5920_s28 + $0x24] sm:$0xf] }
  0xf3   : > { %1232 = vrot.lane.b32.xlu0 %v1154_v33, %s5843_s4  ;;  %1230 = vrot.lane.b32.xlu2 %v1153_v34, %s5843_s4  ;;  %v1389_v34 = vrot.slane %v1388_v19, 4  ;;  %v1478_v19 = vshrl.u32 %v1345_v7, 16 }
  0xf4   : > { %v1022_v35 = vpop.permute.xlu1 %1021 }
  0xf5   : > { %1113 = vst.msk [vmem:[#allocation2 + $0x14] sm:$0xf] %vm1107_vm8, %v1022_v35  ;;  %v1020_v36 = vpop.permute.xlu0 %1019  ;;  %v1036_v37 = vpop.permute.xlu2 %1035  ;;  %v1338_v35 = vld [vmem:[%s5920_s28 + $0x14] sm:$0x1] }
  0xf6   : > { %1112 = vst.msk [vmem:[#allocation2 + $0x10] sm:$0xf] %vm1107_vm8, %v1020_v36  ;;  %v6440_v36 = vrot.slane %v1415_v20, 5  ;;  %v1481_v20 = vshll.u32 %v1345_v7, 16  ;;  %v1355_v7 = vld [vmem:[%s5920_s28 + $0x58] sm:$0xf] }
  0xf7   : > { %1120 = vst.msk [vmem:[#allocation2 + $0x30] sm:$0xf] %vm1107_vm8, %v1036_v37  ;;  %v1421_v37 = vrot.slane %v1419_v21, 4 }
  0xfa   : > { %1240 = vrot.lane.b32.xlu1 %v1158_v38, %s5843_s4 }
  0xfb   : > { %1238 = vrot.lane.b32.xlu0 %v1157_v39, %s5843_s4  ;;  %1236 = vrot.lane.b32.xlu2 %v1156_v40, %s5843_s4  ;;  %v1436_v39 = vor.u32 %v1435_v24, %v1432_v23  ;;  %v1439_v40 = vshll.u32 %v1340_v28, 16  ;;  %v1352_v24 = vld [vmem:[%s5920_s28 + $0x4c] sm:$0xf] }
  0xfc   : > { %v1028_v41 = vpop.permute.xlu1 %1027 }
  0xfd   : > { %1116 = vst.msk [vmem:[#allocation2 + $0x20] sm:$0xf] %vm1107_vm8, %v1028_v41  ;;  %v1026_v42 = vpop.permute.xlu0 %1025  ;;  %v1042_v43 = vpop.permute.xlu2 %1041  ;;  %v1408_v41 = vrot.slane %v1406_v26, 4 }
  0xfe   : > { %1115 = vst.msk [vmem:[#allocation2 + $0x1c] sm:$0xf] %vm1107_vm8, %v1026_v42  ;;  %v1411_v42 = vrot.slane %v1409_v27, 5 }
  0xff   : > { %1123 = vst.msk [vmem:[#allocation2 + $0x3c] sm:$0xf] %vm1107_vm8, %v1042_v43 }
 0x100   : > { %v1412_v56 = vor.u32 %v1411_v42, %v1408_v41 }
 0x102   : > { %1246 = vrot.lane.b32.xlu1 %v1161_v44, %s5843_s4  ;;  %v1463_v44 = vshll.u32 %v1343_v31, 16 }
 0x103   : > { %1244 = vrot.lane.b32.xlu0 %v1160_v45, %s5843_s4  ;;  %1242 = vrot.lane.b32.xlu2 %v1159_v46, %s5843_s4  ;;  %v1467_v45 = vshrl.u32 %v1343_v31, 16  ;;  %v1454_v46 = vshrl.u32 %v1342_v32, 16 }
 0x104   : > { %v1034_v47 = vpop.permute.xlu1 %1033 }
 0x105   : > { %1119 = vst.msk [vmem:[#allocation2 + $0x2c] sm:$0xf] %vm1107_vm8, %v1034_v47  ;;  %v1032_v48 = vpop.permute.xlu0 %1031  ;;  %v1048_v49 = vpop.permute.xlu2 %1047  ;;  %v1457_v47 = vshll.u32 %v1342_v32, 16  ;;  %v1456_v59 = vrot.slane %v1454_v46, 4  ;;  %v1347_v32 = vld [vmem:[%s5920_s28 + $0x38] sm:$0x1] }
 0x106   : > { %1118 = vst.msk [vmem:[#allocation2 + $0x28] sm:$0xf] %vm1107_vm8, %v1032_v48  ;;  %v1404_v48 = vsel %vm5931_vm2, %v1399_v29, %v1403_v30  ;;  %v1349_v29 = vld [vmem:[%s5920_s28 + $0x40] sm:$0xf]  ;;  %v1504_v30 = vrot.slane %v1502_v14, 4 }
 0x107   : > { %1126 = vst.msk [vmem:[#allocation2 + $0x48] sm:$0xf] %vm1107_vm8, %v1048_v49  ;;  %v1394_v49 = vsel %vm5931_vm2, %v1389_v34, %v6420_v3  ;;  %v1459_v60 = vrot.slane %v1457_v47, 5  ;;  %v1346_v3 = vld [vmem:[%s5920_s28 + $0x34] sm:$0xf]  ;;  %v1511_v46 = vshll.u32 %v1349_v29, 16 }
 0x108   : > { %v1487_v16 = vshll.u32 %v1346_v3, 16  ;;  %v1491_v17 = vshrl.u32 %v1346_v3, 16  ;;  %v1354_v14 = vld [vmem:[%s5920_s28 + $0x54] sm:$0xf] }
 0x109   : > { %v1460_v11 = vor.u32 %v1459_v60, %v1456_v59  ;;  %v1513_v59 = vrot.slane %v1511_v46, 5  ;;  %v1357_v60 = vld [vmem:[%s5920_s28 + $0x60] sm:$0xf] }
 0x10a   : > { %1252 = vrot.lane.b32.xlu1 %v1164_v50, %s5843_s4  ;;  %v1422_v50 = vor.u32 %v1421_v37, %v6440_v36  ;;  %v1493_v34 = vrot.slane %v1491_v17, 4  ;;  %v1539_v37 = vshrl.u32 %v1352_v24, 16  ;;  %v1559_v17 = vshll.u32 %v1355_v7, 16 }
 0x10b   : > { %1250 = vrot.lane.b32.xlu0 %v1163_v51, %s5843_s4  ;;  %1248 = vrot.lane.b32.xlu2 %v1162_v52, %s5843_s4  ;;  %v1425_v51 = vshll.u32 %v1338_v35, 16  ;;  %v1437_v52 = vrot.slane %v1436_v39, 4  ;;  %v1461_v28 = vrot.slane %v1460_v11, 4  ;;  %v1480_v39 = vrot.slane %v1478_v19, 4 }
 0x10c   : > { %v1040_v53 = vpop.permute.xlu1 %1039  ;;  %v1423_v63 = vrot.slane %v1422_v50, 4  ;;  %v1497_v50 = vshll.u32 %v1347_v32, 16  ;;  %v1361_v32 = vld [vmem:[%s5920_s28 + $0x70] sm:$0xf] }
 0x10d   : > { %1122 = vst.msk [vmem:[#allocation2 + $0x38] sm:$0xf] %vm1107_vm8, %v1040_v53  ;;  %v1038_v55 = vpop.permute.xlu0 %1037  ;;  %v1054_v57 = vpop.permute.xlu2 %1053  ;;  %v1441_v53 = vrot.slane %v1439_v40, 5  ;;  %v1483_v40 = vrot.slane %v1481_v20, 5  ;;  %v1611_v46 = vshrl.u32 %v1361_v32, 16 }
 0x10e   : > { %1121 = vst.msk [vmem:[#allocation2 + $0x34] sm:$0xf] %vm1107_vm8, %v1038_v55  ;;  %v1171_v55 = vld [vmem:[%s5920_s28 + $0xb8] sm:$0xf] }
 0x10f   : > { %1129 = vst.msk [vmem:[#allocation2 + $0x54] sm:$0xf] %vm1107_vm8, %v1054_v57  ;;  %v6453_v57 = vrot.slane %v1463_v44, 5  ;;  %v1442_v8 = vsel %vm5931_vm2, %v1437_v52, %v1441_v53 }
 0x112   : > { %1258 = vrot.lane.b32.xlu1 %v1167_v58, %s5843_s4  ;;  %v1469_v58 = vrot.slane %v1467_v45, 4  ;;  %v1466_v45 = vsel %vm5931_vm2, %v1461_v28, %v6453_v57 }
 0x113   : > { %1256 = vrot.lane.b32.xlu0 %v1166_v61, %s5843_s4  ;;  %1254 = vrot.lane.b32.xlu2 %v1165_v0, %s5843_s4  ;;  %v1344_v61 = vld [vmem:[%s5920_s28 + $0x2c] sm:$0x1]  ;;  %v1427_v0 = vrot.slane %v1425_v51, 5 }
 0x114   : > { %v1046_v5 = vpop.permute.xlu1 %1045  ;;  %v1473_v10 = vshll.u32 %v1344_v61, 16 }
 0x115   : > { %1125 = vst.msk [vmem:[#allocation2 + $0x44] sm:$0xf] %vm1107_vm8, %v1046_v5  ;;  %v1044_v9 = vpop.permute.xlu0 %1043  ;;  %v1060_v13 = vpop.permute.xlu2 %1059  ;;  %v1413_v5 = vrot.slane %v1412_v56, 4  ;;  %v1515_v56 = vshrl.u32 %v1349_v29, 16 }
 0x116   : > { %1124 = vst.msk [vmem:[#allocation2 + $0x40] sm:$0xf] %vm1107_vm8, %v1044_v9  ;;  %v1470_v9 = vor.u32 %v1469_v58, %v6453_v57  ;;  %v1475_v27 = vrot.slane %v1473_v10, 5  ;;  %v1353_v58 = vld [vmem:[%s5920_s28 + $0x50] sm:$0x1]  ;;  %v1577_v10 = vshll.u32 %v1357_v60, 16 }
 0x117   : > { %1132 = vst.msk [vmem:[#allocation2 + $0x60] sm:$0xf] %vm1107_vm8, %v1060_v13  ;;  %v1341_v13 = vld [vmem:[%s5920_s28 + $0x20] sm:$0x1]  ;;  %v1418_v21 = vsel %vm5931_vm2, %v1413_v5, %v6440_v36  ;;  %v1535_v36 = vshll.u32 %v1352_v24, 16  ;;  %v1517_v11 = vrot.slane %v1515_v56, 4 }
 0x118   : > { %v1449_v23 = vshll.u32 %v1341_v13, 16  ;;  %v1471_v26 = vrot.slane %v1470_v9, 4  ;;  %v1574_v9 = vshrl.u32 %v1357_v60, 16  ;;  %v1350_v13 = vld [vmem:[%s5920_s28 + $0x44] sm:$0x1]  ;;  %v1579_v29 = vrot.slane %v1577_v10, 5 }
 0x119   : > { %v6491_v52 = vrot.slane %v1535_v36, 5  ;;  %v1521_v24 = vshll.u32 %v1350_v13, 16 }
 0x11a   : > { %1264 = vrot.lane.b32.xlu1 %v1170_v15, %s5843_s4  ;;  %v1505_v15 = vshll.u32 %v1348_v2, 16  ;;  %v1476_v44 = vsel %vm5931_vm2, %v1471_v26, %v1475_v27  ;;  %v1550_v26 = vshrl.u32 %v1354_v14, 16  ;;  %v1553_v27 = vshll.u32 %v1354_v14, 16  ;;  %v1359_v14 = vld [vmem:[%s5920_s28 + $0x68] sm:$0x1] }
 0x11b   : > { %1262 = vrot.lane.b32.xlu0 %v1169_v18, %s5843_s4  ;;  %1260 = vrot.lane.b32.xlu2 %v1168_v22, %s5843_s4  ;;  %v1428_v18 = vsel %vm5931_vm2, %v1423_v63, %v1427_v0  ;;  %v1446_v22 = vor.u32 %v1445_v6, %v1441_v53  ;;  %v1541_v53 = vrot.slane %v1539_v37, 4  ;;  %v1499_v63 = vrot.slane %v1497_v50, 5  ;;  %v1358_v37 = vld [vmem:[%s5920_s28 + $0x64] sm:$0xf] }
 0x11c   : > { %v1052_v33 = vpop.permute.xlu1 %1051  ;;  %v1507_v31 = vrot.slane %v1505_v15, 5  ;;  %v1576_v28 = vrot.slane %v1574_v9, 4  ;;  %v1583_v50 = vshll.u32 %v1358_v37, 16  ;;  %v1363_v9 = vld [vmem:[%s5920_s28 + $0x78] sm:$0xf] }
 0x11d   : > { %1128 = vst.msk [vmem:[#allocation2 + $0x50] sm:$0xf] %vm1107_vm8, %v1052_v33  ;;  %v1050_v38 = vpop.permute.xlu0 %1049  ;;  %v1066_v43 = vpop.permute.xlu2 %1065  ;;  %v6478_v33 = vrot.slane %v1487_v16, 5  ;;  %v1447_v42 = vrot.slane %v1446_v22, 4  ;;  %v1542_v3 = vor.u32 %v1541_v53, %v6491_v52 }
 0x11e   : > { %1127 = vst.msk [vmem:[#allocation2 + $0x4c] sm:$0xf] %vm1107_vm8, %v1050_v38  ;;  %v1351_v38 = vld [vmem:[%s5920_s28 + $0x48] sm:$0xf] }
 0x11f   : > { %1135 = vst.msk [vmem:[#allocation2 + $0x6c] sm:$0xf] %vm1107_vm8, %v1066_v43  ;;  %v1451_v43 = vrot.slane %v1449_v23, 5  ;;  %v1526_v51 = vshrl.u32 %v1351_v38, 16  ;;  %v1529_v54 = vshll.u32 %v1351_v38, 16  ;;  %v1543_v19 = vrot.slane %v1542_v3, 4 }
 0x120   : > { %v1518_v23 = vor.u32 %v1517_v11, %v1513_v59  ;;  %v1356_v38 = vld [vmem:[%s5920_s28 + $0x5c] sm:$0x1] }
 0x121   : > { %v1452_v57 = vsel %vm5931_vm2, %v1447_v42, %v1451_v43  ;;  %v1528_v0 = vrot.slane %v1526_v51, 4  ;;  %v1531_v5 = vrot.slane %v1529_v54, 5  ;;  %v1552_v42 = vrot.slane %v1550_v26, 4 }
 0x122   : > { %1767 = vrot.lane.b32.xlu1 %v1404_v48, %s5844_s5  ;;  %v1508_v48 = vor.u32 %v1507_v31, %v1504_v30  ;;  %v6516_v30 = vrot.slane %v1559_v17, 5  ;;  %v1555_v43 = vrot.slane %v1553_v27, 5  ;;  %v1569_v53 = vshll.u32 %v1356_v38, 16 }
 0x123   : > { %1765 = vrot.lane.b32.xlu0 %v1394_v49, %s5844_s5  ;;  %1266 = vrot.lane.b32.xlu2 %v1171_v55, %s5843_s4  ;;  %v1494_v49 = vor.u32 %v1493_v34, %v6478_v33  ;;  %v1484_v55 = vor.u32 %v1483_v40, %v1480_v39  ;;  %v1360_v34 = vld [vmem:[%s5920_s28 + $0x6c] sm:$0xf]  ;;  %v1519_v40 = vrot.slane %v1518_v23, 4  ;;  %v1593_v26 = vshll.u32 %v1359_v14, 16 }
 0x124   : > { %v1058_v62 = vpop.permute.xlu1 %1057  ;;  %v1509_v61 = vrot.slane %v1508_v48, 4  ;;  %v1601_v48 = vshll.u32 %v1360_v34, 16  ;;  %v1368_v14 = vld [vmem:[%s5920_s28 + $0x8c] sm:$0x1] }
 0x125   : > { %1131 = vst.msk [vmem:[#allocation2 + $0x5c] sm:$0xf] %vm1107_vm8, %v1058_v62  ;;  %v1056_v4 = vpop.permute.xlu0 %1055  ;;  %v1072_v12 = vpop.permute.xlu2 %1071  ;;  %v1495_v62 = vrot.slane %v1494_v49, 4  ;;  %v1485_v6 = vrot.slane %v1484_v55, 4  ;;  %v1580_v49 = vor.u32 %v1579_v29, %v1576_v28  ;;  %v1587_v55 = vshrl.u32 %v1358_v37, 16 }
 0x126   : > { %1130 = vst.msk [vmem:[#allocation2 + $0x58] sm:$0xf] %vm1107_vm8, %v1056_v4  ;;  %v1545_v4 = vshll.u32 %v1353_v58, 16  ;;  %v1514_v15 = vsel %vm5931_vm2, %v1509_v61, %v1513_v59  ;;  %v1613_v59 = vrot.slane %v1611_v46, 4  ;;  %v1603_v61 = vrot.slane %v1601_v48, 5 }
 0x127   : > { %1138 = vst.msk [vmem:[#allocation2 + $0x78] sm:$0xf] %vm1107_vm8, %v1072_v12  ;;  %v1500_v16 = vsel %vm5931_vm2, %v1495_v62, %v1499_v63  ;;  %v1490_v22 = vsel %vm5931_vm2, %v1485_v6, %v6478_v33  ;;  %v1581_v62 = vrot.slane %v1580_v49, 4  ;;  %v1585_v63 = vrot.slane %v1583_v50, 5 }
 0x128   : > { %v1547_v20 = vrot.slane %v1545_v4, 5  ;;  %v1366_v4 = vld [vmem:[%s5920_s28 + $0x84] sm:$0xf] }
 0x129   : > { %v1646_v17 = vshrl.u32 %v1366_v4, 16 }
 0x12a   : > { %1773 = vrot.lane.b32.xlu1 %v1442_v8, %s5844_s5  ;;  %v1548_v33 = vsel %vm5931_vm2, %v1543_v19, %v1547_v20 }
 0x12b   : > { %1771 = vrot.lane.b32.xlu0 %v1428_v18, %s5844_s5  ;;  %1769 = vrot.lane.b32.xlu2 %v1418_v21, %s5844_s5  ;;  %v1563_v18 = vshrl.u32 %v1355_v7, 16  ;;  %v1532_v21 = vor.u32 %v1531_v5, %v1528_v0  ;;  %v1571_v0 = vrot.slane %v1569_v53, 5  ;;  %v1364_v5 = vld [vmem:[%s5920_s28 + $0x7c] sm:$0xf] }
 0x12c   : > { %v1064_v35 = vpop.permute.xlu1 %1063  ;;  %v1631_v19 = vshll.u32 %v1364_v5, 16  ;;  %v1635_v20 = vshrl.u32 %v1364_v5, 16 }
 0x12d   : > { %1134 = vst.msk [vmem:[#allocation2 + $0x68] sm:$0xf] %vm1107_vm8, %v1064_v35  ;;  %v1062_v41 = vpop.permute.xlu0 %1061  ;;  %v1207_v47 = vpop.permute.xlu2 %1206  ;;  %v1565_v31 = vrot.slane %v1563_v18, 4  ;;  %v1533_v36 = vrot.slane %v1532_v21, 4  ;;  %v1649_v18 = vshll.u32 %v1366_v4, 16  ;;  %v1622_v21 = vshrl.u32 %v1363_v9, 16 }
 0x12e   : > { %1133 = vst.msk [vmem:[#allocation2 + $0x64] sm:$0xf] %vm1107_vm8, %v1062_v41  ;;  %v1523_v41 = vrot.slane %v1521_v24, 5  ;;  %v6561_v37 = vrot.slane %v1631_v19, 5 }
 0x12f   : > { %1302 = vst.msk [vmem:[#allocation2 + $0x4] sm:$0xf] %vm1300_vm9, %v1207_v47  ;;  %v1598_v47 = vshrl.u32 %v1360_v34, 16  ;;  %v1566_v51 = vor.u32 %v1565_v31, %v6516_v30  ;;  %v1538_v54 = vsel %vm5931_vm2, %v1533_v36, %v6491_v52  ;;  %v1648_v31 = vrot.slane %v1646_v17, 4  ;;  %v1370_v34 = vld [vmem:[%s5920_s28 + $0x94] sm:$0xf] }
 0x130   : > { %v1524_v56 = vsel %vm5931_vm2, %v1519_v40, %v1523_v41  ;;  %v1367_v36 = vld [vmem:[%s5920_s28 + $0x88] sm:$0xf]  ;;  %v1624_v38 = vrot.slane %v1622_v21, 4  ;;  %v1365_v41 = vld [vmem:[%s5920_s28 + $0x80] sm:$0x1]  ;;  %v1683_v46 = vshrl.u32 %v1370_v34, 16 }
 0x131   : > { %v1600_v60 = vrot.slane %v1598_v47, 4  ;;  %v1567_v52 = vrot.slane %v1566_v51, 4  ;;  %v1655_v51 = vshll.u32 %v1367_v36, 16 }
 0x132   : > { %1779 = vrot.lane.b32.xlu1 %v1476_v44, %s5844_s5 }
 0x133   : > { %1777 = vrot.lane.b32.xlu0 %v1466_v45, %s5844_s5  ;;  %1775 = vrot.lane.b32.xlu2 %v1452_v57, %s5844_s5  ;;  %v1607_v45 = vshll.u32 %v1361_v32, 16  ;;  %v1556_v57 = vor.u32 %v1555_v43, %v1552_v42  ;;  %v1651_v32 = vrot.slane %v1649_v18, 5  ;;  %v1595_v43 = vrot.slane %v1593_v26, 5 }
 0x134   : > { %v1070_v2 = vpop.permute.xlu1 %1069 }
 0x135   : > { %1137 = vst.msk [vmem:[#allocation2 + $0x74] sm:$0xf] %vm1107_vm8, %v1070_v2  ;;  %v1068_v8 = vpop.permute.xlu0 %1067  ;;  %v1213_v12 = vpop.permute.xlu2 %1212  ;;  %v6535_v58 = vrot.slane %v1607_v45, 5  ;;  %v1362_v2 = vld [vmem:[%s5920_s28 + $0x74] sm:$0x1]  ;;  %v1557_v7 = vrot.slane %v1556_v57, 4  ;;  %v1652_v50 = vor.u32 %v1651_v32, %v1648_v31 }
 0x136   : > { %1136 = vst.msk [vmem:[#allocation2 + $0x70] sm:$0xf] %vm1107_vm8, %v1068_v8  ;;  %v1589_v8 = vrot.slane %v1587_v55, 4  ;;  %v1617_v11 = vshll.u32 %v1362_v2, 16  ;;  %v1679_v45 = vshll.u32 %v1370_v34, 16  ;;  %v1641_v55 = vshll.u32 %v1365_v41, 16 }
 0x137   : > { %1305 = vst.msk [vmem:[#allocation2 + $0x10] sm:$0xf] %vm1300_vm9, %v1213_v12  ;;  %v1614_v10 = vor.u32 %v1613_v59, %v6535_v58  ;;  %v1604_v12 = vor.u32 %v1603_v61, %v1600_v60  ;;  %v1562_v23 = vsel %vm5931_vm2, %v1557_v7, %v6516_v30  ;;  %v1637_v30 = vrot.slane %v1635_v20, 4  ;;  %v1371_v60 = vld [vmem:[%s5920_s28 + $0x98] sm:$0x1] }
 0x138   : > { %v1590_v24 = vor.u32 %v1589_v8, %v1585_v63  ;;  %v1619_v28 = vrot.slane %v1617_v11, 5  ;;  %v1659_v57 = vshrl.u32 %v1367_v36, 16  ;;  %v6577_v61 = vrot.slane %v1679_v45, 5  ;;  %v1376_v32 = vld [vmem:[%s5920_s28 + $0xac] sm:$0xf] }
 0x139   : > { %v1615_v27 = vrot.slane %v1614_v10, 4  ;;  %v1605_v29 = vrot.slane %v1604_v12, 4  ;;  %v1643_v4 = vrot.slane %v1641_v55, 5  ;;  %v1689_v8 = vshll.u32 %v1371_v60, 16 }
 0x13a   : > { %1785 = vrot.lane.b32.xlu1 %v1514_v15, %s5844_s5  ;;  %v1586_v15 = vsel %vm5931_vm2, %v1581_v62, %v1585_v63  ;;  %v1591_v42 = vrot.slane %v1590_v24, 4  ;;  %v1685_v62 = vrot.slane %v1683_v46, 4  ;;  %v1661_v10 = vrot.slane %v1659_v57, 4 }
 0x13b   : > { %1783 = vrot.lane.b32.xlu0 %v1500_v16, %s5844_s5  ;;  %1781 = vrot.lane.b32.xlu2 %v1490_v22, %s5844_s5  ;;  %v1572_v16 = vsel %vm5931_vm2, %v1567_v52, %v1571_v0  ;;  %v1625_v22 = vshll.u32 %v1363_v9, 16  ;;  %v1620_v49 = vsel %vm5931_vm2, %v1615_v27, %v1619_v28  ;;  %v1610_v53 = vsel %vm5931_vm2, %v1605_v29, %v6535_v58  ;;  %v1373_v9 = vld [vmem:[%s5920_s28 + $0xa0] sm:$0xf] }
 0x13c   : > { %v1205_v35 = vpop.permute.xlu1 %1204  ;;  %v1596_v59 = vsel %vm5931_vm2, %v1591_v42, %v1595_v43  ;;  %v1653_v58 = vrot.slane %v1652_v50, 4  ;;  %v1657_v0 = vrot.slane %v1655_v51, 5  ;;  %v1686_v11 = vor.u32 %v1685_v62, %v6577_v61 }
 0x13d   : > { %1301 = vst.msk [vmem:[#allocation2] sm:$0xf] %vm1300_vm9, %v1205_v35  ;;  %v1074_v39 = vpop.permute.xlu0 %1073  ;;  %v1219_v44 = vpop.permute.xlu2 %1218  ;;  %v1369_v35 = vld [vmem:[%s5920_s28 + $0x90] sm:$0xf]  ;;  %v1703_v21 = vshll.u32 %v1373_v9, 16  ;;  %v1665_v24 = vshll.u32 %v1368_v14, 16 }
 0x13e   : > { %1139 = vst.msk [vmem:[#allocation2 + $0x7c] sm:$0xf] %vm1107_vm8, %v1074_v39  ;;  %v1627_v39 = vrot.slane %v1625_v22, 5  ;;  %v1670_v47 = vshrl.u32 %v1369_v35, 16  ;;  %v1673_v48 = vshll.u32 %v1369_v35, 16  ;;  %v1707_v22 = vshrl.u32 %v1373_v9, 16 }
 0x13f   : > { %1308 = vst.msk [vmem:[#allocation2 + $0x1c] sm:$0xf] %vm1300_vm9, %v1219_v44  ;;  %v1687_v28 = vrot.slane %v1686_v11, 4  ;;  %v1691_v29 = vrot.slane %v1689_v8, 5  ;;  %v1667_v42 = vrot.slane %v1665_v24, 5  ;;  %v1731_v57 = vshrl.u32 %v1376_v32, 16 }
 0x140   : > { %v1672_v63 = vrot.slane %v1670_v47, 4  ;;  %v1675_v52 = vrot.slane %v1673_v48, 5  ;;  %v1895_v24 = vld [vmem:[%s5920_s28 + $0x4] sm:$0xf] }
 0x141   : > { %v1692_v45 = vsel %vm5931_vm2, %v1687_v28, %v1691_v29  ;;  %v1733_v8 = vrot.slane %v1731_v57, 4 }
 0x142   : > { %1791 = vrot.lane.b32.xlu1 %v1548_v33, %s5844_s5  ;;  %v1676_v12 = vor.u32 %v1675_v52, %v1672_v63 }
 0x143   : > { %1789 = vrot.lane.b32.xlu0 %v1538_v54, %s5844_s5  ;;  %1787 = vrot.lane.b32.xlu2 %v1524_v56, %s5844_s5  ;;  %v1638_v54 = vor.u32 %v1637_v30, %v6561_v37  ;;  %v1628_v56 = vor.u32 %v1627_v39, %v1624_v38  ;;  %v1709_v30 = vrot.slane %v1707_v22, 4  ;;  %v1379_v38 = vld [vmem:[%s5920_s28 + $0xb8] sm:$0xf]  ;;  %v1378_v39 = vld [vmem:[%s5920_s28 + $0xb4] sm:$0xf] }
 0x144   : > { %v1211_v3 = vpop.permute.xlu1 %1210  ;;  %v1677_v31 = vrot.slane %v1676_v12, 4  ;;  %v1751_v50 = vshll.u32 %v1379_v38, 16  ;;  %v1755_v51 = vshrl.u32 %v1379_v38, 16  ;;  %v1742_v55 = vshrl.u32 %v1378_v39, 16 }
 0x145   : > { %1304 = vst.msk [vmem:[#allocation2 + $0xc] sm:$0xf] %vm1300_vm9, %v1211_v3  ;;  %v1209_v6 = vpop.permute.xlu0 %1208  ;;  %v1225_v13 = vpop.permute.xlu2 %1224  ;;  %v1639_v3 = vrot.slane %v1638_v54, 4  ;;  %v1629_v5 = vrot.slane %v1628_v56, 4  ;;  %v1745_v56 = vshll.u32 %v1378_v39, 16 }
 0x146   : > { %1303 = vst.msk [vmem:[#allocation2 + $0x8] sm:$0xf] %vm1300_vm9, %v1209_v6  ;;  %v1375_v6 = vld [vmem:[%s5920_s28 + $0xa8] sm:$0xf]  ;;  %v1682_v46 = vsel %vm5931_vm2, %v1677_v31, %v6577_v61  ;;  %v1753_v63 = vrot.slane %v1751_v50, 5  ;;  %v1757_v52 = vrot.slane %v1755_v51, 4 }
 0x147   : > { %1311 = vst.msk [vmem:[#allocation2 + $0x28] sm:$0xf] %vm1300_vm9, %v1225_v13  ;;  %v1718_v17 = vshrl.u32 %v1375_v6, 16  ;;  %v1721_v18 = vshll.u32 %v1375_v6, 16  ;;  %v1644_v19 = vsel %vm5931_vm2, %v1639_v3, %v1643_v4  ;;  %v1634_v20 = vsel %vm5931_vm2, %v1629_v5, %v6561_v37  ;;  %v1380_v3 = vld [vmem:[%s5920_s28 + $0xbc] sm:$0x1] }
 0x148   : > { %v1705_v37 = vrot.slane %v1703_v21, 5  ;;  %v1744_v4 = vrot.slane %v1742_v55, 4  ;;  %v1747_v5 = vrot.slane %v1745_v56, 5  ;;  %v1758_v12 = vor.u32 %v1757_v52, %v1753_v63  ;;  %v1900_v50 = vld [vmem:[%s5920_s28 + $0x18] sm:$0xe] }
 0x149   : > { %v1720_v34 = vrot.slane %v1718_v17, 4  ;;  %v1723_v35 = vrot.slane %v1721_v18, 5  ;;  %v5179_v57 = vrot.slane %v1900_v50, 9 }
 0x14a   : > { %1797 = vrot.lane.b32.xlu1 %v1586_v15, %s5844_s5  ;;  %v1372_v15 = vld [vmem:[%s5920_s28 + $0x9c] sm:$0xf] }
 0x14b   : > { %1795 = vrot.lane.b32.xlu0 %v1572_v16, %s5844_s5  ;;  %1793 = vrot.lane.b32.xlu2 %v1562_v23, %s5844_s5  ;;  %v1658_v16 = vsel %vm5931_vm2, %v1653_v58, %v1657_v0  ;;  %v1662_v23 = vor.u32 %v1661_v10, %v1657_v0  ;;  %v1694_v26 = vshrl.u32 %v1372_v15, 16  ;;  %v1697_v27 = vshll.u32 %v1372_v15, 16  ;;  %v1377_v10 = vld [vmem:[%s5920_s28 + $0xb0] sm:$0x1] }
 0x14c   : > { %v1217_v33 = vpop.permute.xlu1 %1216  ;;  %v1724_v48 = vor.u32 %v1723_v35, %v1720_v34  ;;  %v1748_v15 = vor.u32 %v1747_v5, %v1744_v4  ;;  %v1737_v18 = vshll.u32 %v1377_v10, 16  ;;  %v1898_v34 = vld [vmem:[%s5920_s28 + $0x10] sm:$0xf]  ;;  %v1992_v35 = vrot.slane %v1895_v24, 5  ;;  %v1905_v4 = vld [vmem:[%s5920_s28 + $0x2c] sm:$0x1] }
 0x14d   : > { %1307 = vst.msk [vmem:[#allocation2 + $0x18] sm:$0xf] %vm1300_vm9, %v1217_v33  ;;  %v1215_v40 = vpop.permute.xlu0 %1214  ;;  %v1231_v44 = vpop.permute.xlu2 %1230  ;;  %v1374_v33 = vld [vmem:[%s5920_s28 + $0xa4] sm:$0x1]  ;;  %v1663_v41 = vrot.slane %v1662_v23, 4  ;;  %v1696_v43 = vrot.slane %v1694_v26, 4 }
 0x14e   : > { %1306 = vst.msk [vmem:[#allocation2 + $0x14] sm:$0xf] %vm1300_vm9, %v1215_v40  ;;  %v1713_v54 = vshll.u32 %v1374_v33, 16  ;;  %v1725_v61 = vrot.slane %v1724_v48, 4  ;;  %v1749_v22 = vrot.slane %v1748_v15, 4  ;;  %v1999_v38 = vrot.slane %v1898_v34, 5 }
 0x14f   : > { %1314 = vst.msk [vmem:[#allocation2 + $0x34] sm:$0xf] %vm1300_vm9, %v1231_v44  ;;  %v1699_v44 = vrot.slane %v1697_v27, 5  ;;  %v1739_v27 = vrot.slane %v1737_v18, 5  ;;  %v1896_v33 = vld [vmem:[%s5920_s28 + $0x8] sm:$0x1] }
 0x150   : > { %v1754_v31 = vsel %vm5931_vm2, %v1749_v22, %v1753_v63  ;;  %v1908_v22 = vld [vmem:[%s5920_s28 + $0x38] sm:$0x1] }
 0x151   : > { %v1700_v60 = vor.u32 %v1699_v44, %v1696_v43 }
 0x152   : > { %1803 = vrot.lane.b32.xlu1 %v1620_v49, %s5844_s5  ;;  %v1727_v49 = vshll.u32 %v1376_v32, 16  ;;  %v1897_v32 = vld [vmem:[%s5920_s28 + $0xc] sm:$0xe] }
 0x153   : > { %1801 = vrot.lane.b32.xlu0 %v1610_v53, %s5844_s5  ;;  %1799 = vrot.lane.b32.xlu2 %v1596_v59, %s5844_s5  ;;  %v1710_v53 = vor.u32 %v1709_v30, %v1705_v37  ;;  %v1668_v59 = vsel %vm5931_vm2, %v1663_v41, %v1667_v42  ;;  %v5178_v30 = vrot.slane %v1897_v32, 9  ;;  %v1995_v41 = vrot.slane %v1896_v33, 5  ;;  %v1901_v42 = vld [vmem:[%s5920_s28 + $0x1c] sm:$0xf] }
 0x154   : > { %v1223_v2 = vpop.permute.xlu1 %1222  ;;  %v1729_v62 = vrot.slane %v1727_v49, 5  ;;  %v1902_v49 = vld [vmem:[%s5920_s28 + $0x20] sm:$0x1]  ;;  %v2023_v32 = vrot.slane %v1908_v22, 5 }
 0x155   : > { %1310 = vst.msk [vmem:[#allocation2 + $0x24] sm:$0xf] %vm1300_vm9, %v1223_v2  ;;  %v1221_v7 = vpop.permute.xlu0 %1220  ;;  %v1237_v13 = vpop.permute.xlu2 %1236  ;;  %v1711_v0 = vrot.slane %v1710_v53, 4  ;;  %v1715_v2 = vrot.slane %v1713_v54, 5  ;;  %v1899_v53 = vld [vmem:[%s5920_s28 + $0x14] sm:$0x1] }
 0x156   : > { %1309 = vst.msk [vmem:[#allocation2 + $0x20] sm:$0xf] %vm1300_vm9, %v1221_v7  ;;  %v1701_v7 = vrot.slane %v1700_v60, 4  ;;  %v1730_v11 = vsel %vm5931_vm2, %v1725_v61, %v1729_v62  ;;  %v1734_v17 = vor.u32 %v1733_v8, %v1729_v62  ;;  %v2009_v55 = vrot.slane %v1902_v49, 5  ;;  %v1904_v60 = vld [vmem:[%s5920_s28 + $0x28] sm:$0xf] }
 0x157   : > { %1317 = vst.msk [vmem:[#allocation2 + $0x40] sm:$0xf] %vm1300_vm9, %v1237_v13  ;;  %v1761_v13 = vshll.u32 %v1380_v3, 16  ;;  %v1716_v14 = vsel %vm5931_vm2, %v1711_v0, %v1715_v2  ;;  %v2001_v61 = vrot.slane %v1999_v38, 4  ;;  %v2002_v62 = vrot.slane %v1899_v53, 5 }
 0x158   : > { %v1735_v26 = vrot.slane %v1734_v17, 4  ;;  %v1906_v0 = vld [vmem:[%s5920_s28 + $0x30] sm:$0xe]  ;;  %v1907_v2 = vld [vmem:[%s5920_s28 + $0x34] sm:$0xf]  ;;  %v2013_v3 = vrot.slane %v1904_v60, 5 }
 0x159   : > { %v2003_v5 = vsel %vm6106_vm6, %v2001_v61, %v2002_v62  ;;  %v2020_v8 = vrot.slane %v1907_v2, 5 }
 0x15a   : > { %1809 = vrot.lane.b32.xlu1 %v1658_v16, %s5844_s5  ;;  %v1706_v16 = vsel %vm5931_vm2, %v1701_v7, %v1705_v37  ;;  %v1894_v37 = vld [vmem:[%s5920_s28] sm:$0xe]  ;;  %v5181_v7 = vrot.slane %v1906_v0, 9  ;;  %v2015_v10 = vrot.slane %v2013_v3, 4 }
 0x15b   : > { %1807 = vrot.lane.b32.xlu0 %v1644_v19, %s5844_s5  ;;  %1805 = vrot.lane.b32.xlu2 %v1634_v20, %s5844_s5  ;;  %v1759_v19 = vrot.slane %v1758_v12, 4  ;;  %v1763_v20 = vrot.slane %v1761_v13, 5  ;;  %v5177_v44 = vrot.slane %v1894_v37, 9  ;;  %v1910_v12 = vld [vmem:[%s5920_s28 + $0x40] sm:$0xf] }
 0x15c   : > { %v1229_v36 = vpop.permute.xlu1 %1228  ;;  %v2027_v17 = vrot.slane %v1910_v12, 5  ;;  %v1916_v37 = vld [vmem:[%s5920_s28 + $0x58] sm:$0xf] }
 0x15d   : > { %1313 = vst.msk [vmem:[#allocation2 + $0x30] sm:$0xf] %vm1300_vm9, %v1229_v36  ;;  %v1227_v40 = vpop.permute.xlu0 %1226  ;;  %v1243_v47 = vpop.permute.xlu2 %1242  ;;  %v1764_v29 = vsel %vm5931_vm2, %v1759_v19, %v1763_v20  ;;  %v1740_v36 = vsel %vm5931_vm2, %v1735_v26, %v1739_v27  ;;  %v1993_v51 = vsel %vm6106_vm6, %v5177_v44, %v1992_v35  ;;  %v1911_v19 = vld [vmem:[%s5920_s28 + $0x44] sm:$0x1]  ;;  %v1909_v20 = vld [vmem:[%s5920_s28 + $0x3c] sm:$0xe] }
 0x15e   : > { %1312 = vst.msk [vmem:[#allocation2 + $0x2c] sm:$0xf] %vm1300_vm9, %v1227_v40  ;;  %v1994_v40 = vrot.slane %v1992_v35, 4  ;;  %v2030_v24 = vrot.slane %v1911_v19, 5  ;;  %v5182_v27 = vrot.slane %v1909_v20, 9 }
 0x15f   : > { %1320 = vst.msk [vmem:[#allocation2 + $0x4c] sm:$0xf] %vm1300_vm9, %v1243_v47  ;;  %v2006_v47 = vrot.slane %v1901_v42, 5  ;;  %v2041_v42 = vrot.slane %v1916_v37, 5 }
 0x160   : > { %v1996_v48 = vsel %vm6106_vm6, %v1994_v40, %v1995_v41  ;;  %v2028_v33 = vsel %vm6106_vm6, %v5182_v27, %v2027_v17  ;;  %v1912_v40 = vld [vmem:[%s5920_s28 + $0x48] sm:$0xe]  ;;  %v1926_v27 = vld [vmem:[%s5920_s28 + $0x80] sm:$0x1] }
 0x161   : > { %v2008_v54 = vrot.slane %v2006_v47, 4 }
 0x162   : > { %1815 = vrot.lane.b32.xlu1 %v1692_v45, %s5844_s5 }
 0x163   : > { %1813 = vrot.lane.b32.xlu0 %v1682_v46, %s5844_s5  ;;  %1811 = vrot.lane.b32.xlu2 %v1668_v59, %s5844_s5  ;;  %v2000_v46 = vsel %vm6106_vm6, %v5178_v30, %v1999_v38  ;;  %v2010_v52 = vsel %vm6106_vm6, %v2008_v54, %v2009_v55  ;;  %v1914_v38 = vld [vmem:[%s5920_s28 + $0x50] sm:$0x1]  ;;  %v1920_v54 = vld [vmem:[%s5920_s28 + $0x68] sm:$0x1] }
 0x164   : > { %v1235_v58 = vpop.permute.xlu1 %1234  ;;  %v1918_v55 = vld [vmem:[%s5920_s28 + $0x60] sm:$0xe]  ;;  %v2051_v60 = vrot.slane %v1920_v54, 5 }
 0x165   : > { %1316 = vst.msk [vmem:[#allocation2 + $0x3c] sm:$0xf] %vm1300_vm9, %v1235_v58  ;;  %v1233_v6 = vpop.permute.xlu0 %1232  ;;  %v1249_v9 = vpop.permute.xlu2 %1248  ;;  %v2007_v58 = vsel %vm6106_vm6, %v5179_v57, %v2006_v47  ;;  %v1917_v57 = vld [vmem:[%s5920_s28 + $0x5c] sm:$0x1]  ;;  %v5185_v62 = vrot.slane %v1918_v55, 9 }
 0x166   : > { %1315 = vst.msk [vmem:[#allocation2 + $0x38] sm:$0xf] %vm1300_vm9, %v1233_v6  ;;  %v1903_v6 = vld [vmem:[%s5920_s28 + $0x24] sm:$0xe]  ;;  %v2044_v0 = vrot.slane %v1917_v57, 5 }
 0x167   : > { %1323 = vst.msk [vmem:[#allocation2 + $0x58] sm:$0xf] %vm1300_vm9, %v1249_v9 }
 0x16a   : > { %1821 = vrot.lane.b32.xlu1 %v1730_v11, %s5844_s5  ;;  %v2016_v11 = vrot.slane %v1905_v4, 5 }
 0x16b   : > { %1819 = vrot.lane.b32.xlu0 %v1716_v14, %s5844_s5  ;;  %1817 = vrot.lane.b32.xlu2 %v1706_v16, %s5844_s5  ;;  %v5180_v14 = vrot.slane %v1903_v6, 9  ;;  %v2021_v16 = vsel %vm6106_vm6, %v5181_v7, %v2020_v8  ;;  %v1925_v6 = vld [vmem:[%s5920_s28 + $0x7c] sm:$0xf] }
 0x16c   : > { %v1241_v21 = vpop.permute.xlu1 %1240  ;;  %v2017_v18 = vsel %vm6106_vm6, %v2015_v10, %v2016_v11  ;;  %v1921_v10 = vld [vmem:[%s5920_s28 + $0x6c] sm:$0xe]  ;;  %v2062_v12 = vrot.slane %v1925_v6, 5 }
 0x16d   : > { %1319 = vst.msk [vmem:[#allocation2 + $0x48] sm:$0xf] %vm1300_vm9, %v1241_v21  ;;  %v1239_v23 = vpop.permute.xlu0 %1238  ;;  %v1255_v28 = vpop.permute.xlu2 %1254  ;;  %v2014_v21 = vsel %vm6106_vm6, %v5180_v14, %v2013_v3 }
 0x16e   : > { %1318 = vst.msk [vmem:[#allocation2 + $0x44] sm:$0xf] %vm1300_vm9, %v1239_v23  ;;  %v2029_v23 = vrot.slane %v2027_v17, 4 }
 0x16f   : > { %1326 = vst.msk [vmem:[#allocation2 + $0x64] sm:$0xf] %vm1300_vm9, %v1255_v28 }
 0x170   : > { %v2031_v35 = vsel %vm6106_vm6, %v2029_v23, %v2030_v24  ;;  %v1929_v23 = vld [vmem:[%s5920_s28 + $0x8c] sm:$0x1]  ;;  %v1927_v24 = vld [vmem:[%s5920_s28 + $0x84] sm:$0xe] }
 0x172   : > { %1827 = vrot.lane.b32.xlu1 %v1764_v29, %s5844_s5  ;;  %v1913_v29 = vld [vmem:[%s5920_s28 + $0x4c] sm:$0xf] }
 0x173   : > { %1825 = vrot.lane.b32.xlu0 %v1754_v31, %s5844_s5  ;;  %1823 = vrot.lane.b32.xlu2 %v1740_v36, %s5844_s5  ;;  %v2022_v31 = vrot.slane %v2020_v8, 4  ;;  %v1915_v36 = vld [vmem:[%s5920_s28 + $0x54] sm:$0xe]  ;;  %v2034_v30 = vrot.slane %v1913_v29, 5  ;;  %v1923_v8 = vld [vmem:[%s5920_s28 + $0x74] sm:$0x1] }
 0x174   : > { %v1247_v39 = vpop.permute.xlu1 %1246  ;;  %v5184_v41 = vrot.slane %v1915_v36, 9  ;;  %v2072_v29 = vrot.slane %v1929_v23, 5  ;;  %v2065_v36 = vrot.slane %v1926_v27, 5 }
 0x175   : > { %1322 = vst.msk [vmem:[#allocation2 + $0x54] sm:$0xf] %vm1300_vm9, %v1247_v39  ;;  %v1245_v43 = vpop.permute.xlu0 %1244  ;;  %v1261_v45 = vpop.permute.xlu2 %1260  ;;  %v2024_v39 = vsel %vm6106_vm6, %v2022_v31, %v2023_v32  ;;  %v2036_v44 = vrot.slane %v2034_v30, 4  ;;  %v5188_v32 = vrot.slane %v1927_v24, 9  ;;  %v1941_v24 = vld [vmem:[%s5920_s28 + $0xbc] sm:$0x1] }
 0x176   : > { %1321 = vst.msk [vmem:[#allocation2 + $0x50] sm:$0xf] %vm1300_vm9, %v1245_v43  ;;  %v2042_v50 = vsel %vm6106_vm6, %v5184_v41, %v2041_v42 }
 0x177   : > { %1329 = vst.msk [vmem:[#allocation2 + $0x70] sm:$0xf] %vm1300_vm9, %v1261_v45  ;;  %v2037_v45 = vrot.slane %v1914_v38, 5 }
 0x179   : > { %v2038_v53 = vsel %vm6106_vm6, %v2036_v44, %v2037_v45  ;;  %v1930_v44 = vld [vmem:[%s5920_s28 + $0x90] sm:$0xe] }
 0x17a   : > { %2106 = vrot.lane.b32.xlu1 %v2000_v46, %s5845_s6  ;;  %v1919_v46 = vld [vmem:[%s5920_s28 + $0x64] sm:$0xf]  ;;  %v5189_v54 = vrot.slane %v1930_v44, 9 }
 0x17b   : > { %2104 = vrot.lane.b32.xlu0 %v1996_v48, %s5845_s6  ;;  %2102 = vrot.lane.b32.xlu2 %v1993_v51, %s5845_s6  ;;  %v5183_v48 = vrot.slane %v1912_v40, 9  ;;  %v2048_v51 = vrot.slane %v1919_v46, 5  ;;  %v1934_v40 = vld [vmem:[%s5920_s28 + $0xa0] sm:$0xf] }
 0x17c   : > { %v1253_v56 = vpop.permute.xlu1 %1252  ;;  %v2083_v46 = vrot.slane %v1934_v40, 5 }
 0x17d   : > { %1325 = vst.msk [vmem:[#allocation2 + $0x60] sm:$0xf] %vm1300_vm9, %v1253_v56  ;;  %v1251_v59 = vpop.permute.xlu0 %1250  ;;  %v1267_v63 = vpop.permute.xlu2 %1266  ;;  %v2035_v56 = vsel %vm6106_vm6, %v5183_v48, %v2034_v30  ;;  %v2049_v4 = vsel %vm6106_vm6, %v5185_v62, %v2048_v51  ;;  %v1938_v62 = vld [vmem:[%s5920_s28 + $0xb0] sm:$0x1] }
 0x17e   : > { %1324 = vst.msk [vmem:[#allocation2 + $0x5c] sm:$0xf] %vm1300_vm9, %v1251_v59  ;;  %v2050_v59 = vrot.slane %v2048_v51, 4  ;;  %v5309_v51 = vld [vmem:[%s5920_s28 + $0x18] sm:$0xf] }
 0x17f   : > { %1332 = vst.msk [vmem:[#allocation2 + $0x7c] sm:$0xf] %vm1300_vm9, %v1267_v63 }
 0x180   : > { %v2052_v3 = vsel %vm6106_vm6, %v2050_v59, %v2051_v60  ;;  %v2680_v59 = vshrl.u32 %v5309_v51, 16  ;;  %v2683_v60 = vshll.u32 %v5309_v51, 16 }
 0x182   : > { %2112 = vrot.lane.b32.xlu1 %v2010_v52, %s5845_s6  ;;  %v1922_v52 = vld [vmem:[%s5920_s28 + $0x70] sm:$0xf]  ;;  %v2685_v6 = vrot.slane %v2683_v60, 5 }
 0x183   : > { %2110 = vrot.lane.b32.xlu0 %v2007_v58, %s5845_s6  ;;  %2108 = vrot.lane.b32.xlu2 %v2003_v5, %s5845_s6  ;;  %v2043_v58 = vrot.slane %v2041_v42, 4  ;;  %v1924_v5 = vld [vmem:[%s5920_s28 + $0x78] sm:$0xe]  ;;  %v2055_v7 = vrot.slane %v1922_v52, 5  ;;  %v1932_v42 = vld [vmem:[%s5920_s28 + $0x98] sm:$0x1] }
 0x184   : > { %v1259_v9 = vpop.permute.xlu1 %1258  ;;  %v5187_v11 = vrot.slane %v1924_v5, 9  ;;  %v2682_v5 = vrot.slane %v2680_v59, 4 }
 0x185   : > { %1328 = vst.msk [vmem:[#allocation2 + $0x6c] sm:$0xf] %vm1300_vm9, %v1259_v9  ;;  %v1257_v13 = vpop.permute.xlu0 %1256  ;;  %v1770_v15 = vpop.permute.xlu2 %1769  ;;  %v2045_v9 = vsel %vm6106_vm6, %v2043_v58, %v2044_v0  ;;  %v2057_v14 = vrot.slane %v2055_v7, 4  ;;  %v5313_v58 = vld [vmem:[%s5920_s28 + $0x28] sm:$0xf] }
 0x186   : > { %1327 = vst.msk [vmem:[#allocation2 + $0x68] sm:$0xf] %vm1300_vm9, %v1257_v13  ;;  %v2063_v20 = vsel %vm6106_vm6, %v5187_v11, %v2062_v12  ;;  %v2713_v11 = vshll.u32 %v5313_v58, 16 }
 0x187   : > { %1864 = vst.msk [vmem:[#allocation2 + $0x8] sm:$0xf] %vm1861_vm10, %v1770_v15  ;;  %v2058_v15 = vrot.slane %v1923_v8, 5 }
 0x189   : > { %v2059_v22 = vsel %vm6106_vm6, %v2057_v14, %v2058_v15  ;;  %v2085_v14 = vrot.slane %v2083_v46, 4 }
 0x18a   : > { %2118 = vrot.lane.b32.xlu1 %v2021_v16, %s5845_s6  ;;  %v1928_v16 = vld [vmem:[%s5920_s28 + $0x88] sm:$0xf] }
 0x18b   : > { %2116 = vrot.lane.b32.xlu0 %v2017_v18, %s5845_s6  ;;  %2114 = vrot.lane.b32.xlu2 %v2014_v21, %s5845_s6  ;;  %v5186_v18 = vrot.slane %v1921_v10, 9  ;;  %v2069_v21 = vrot.slane %v1928_v16, 5  ;;  %v1940_v10 = vld [vmem:[%s5920_s28 + $0xb8] sm:$0xf] }
 0x18c   : > { %v1265_v26 = vpop.permute.xlu1 %1264 }
 0x18d   : > { %1331 = vst.msk [vmem:[#allocation2 + $0x78] sm:$0xf] %vm1300_vm9, %v1265_v26  ;;  %v1263_v28 = vpop.permute.xlu0 %1262  ;;  %v1776_v34 = vpop.permute.xlu2 %1775  ;;  %v2056_v26 = vsel %vm6106_vm6, %v5186_v18, %v2055_v7  ;;  %v2070_v38 = vsel %vm6106_vm6, %v5188_v32, %v2069_v21  ;;  %v5312_v7 = vld [vmem:[%s5920_s28 + $0x24] sm:$0xf]  ;;  %v5318_v32 = vld [vmem:[%s5920_s28 + $0x3c] sm:$0xf] }
 0x18e   : > { %1330 = vst.msk [vmem:[#allocation2 + $0x74] sm:$0xf] %vm1300_vm9, %v1263_v28  ;;  %v2071_v28 = vrot.slane %v2069_v21, 4  ;;  %v2707_v18 = vshll.u32 %v5312_v7, 16 }
 0x18f   : > { %1867 = vst.msk [vmem:[#allocation2 + $0x14] sm:$0xf] %vm1861_vm10, %v1776_v34 }
 0x190   : > { %v2073_v30 = vsel %vm6106_vm6, %v2071_v28, %v2072_v29 }
 0x192   : > { %2124 = vrot.lane.b32.xlu1 %v2031_v35, %s5845_s6  ;;  %v1931_v35 = vld [vmem:[%s5920_s28 + $0x94] sm:$0xf] }
 0x193   : > { %2122 = vrot.lane.b32.xlu0 %v2028_v33, %s5845_s6  ;;  %2120 = vrot.lane.b32.xlu2 %v2024_v39, %s5845_s6  ;;  %v2064_v33 = vrot.slane %v2062_v12, 4  ;;  %v1933_v39 = vld [vmem:[%s5920_s28 + $0x9c] sm:$0xe]  ;;  %v2076_v41 = vrot.slane %v1931_v35, 5  ;;  %v2717_v12 = vshrl.u32 %v5313_v58, 16  ;;  %v2709_v35 = vrot.slane %v2707_v18, 5 }
 0x194   : > { %v1768_v43 = vpop.permute.xlu1 %1767  ;;  %v5190_v45 = vrot.slane %v1933_v39, 9  ;;  %v5316_v39 = vld [vmem:[%s5920_s28 + $0x34] sm:$0xf] }
 0x195   : > { %1863 = vst.msk [vmem:[#allocation2 + $0x4] sm:$0xf] %vm1861_vm10, %v1768_v43  ;;  %v1766_v47 = vpop.permute.xlu0 %1765  ;;  %v1782_v49 = vpop.permute.xlu2 %1781  ;;  %v2066_v43 = vsel %vm6106_vm6, %v2064_v33, %v2065_v36  ;;  %v2077_v52 = vsel %vm6106_vm6, %v5189_v54, %v2076_v41  ;;  %v2719_v27 = vrot.slane %v2717_v12, 4  ;;  %v1939_v33 = vld [vmem:[%s5920_s28 + $0xb4] sm:$0xe]  ;;  %v2737_v51 = vshll.u32 %v5316_v39, 16 }
 0x196   : > { %1862 = vst.msk [vmem:[#allocation2] sm:$0xf] %vm1861_vm10, %v1766_v47  ;;  %v1937_v47 = vld [vmem:[%s5920_s28 + $0xac] sm:$0xf]  ;;  %v2084_v57 = vsel %vm6106_vm6, %v5190_v45, %v2083_v46  ;;  %v5192_v45 = vrot.slane %v1939_v33, 9  ;;  %v2741_v59 = vshrl.u32 %v5316_v39, 16 }
 0x197   : > { %1870 = vst.msk [vmem:[#allocation2 + $0x20] sm:$0xf] %vm1861_vm10, %v1782_v49  ;;  %v2078_v49 = vrot.slane %v2076_v41, 4  ;;  %v2090_v55 = vrot.slane %v1937_v47, 5  ;;  %v5311_v46 = vld [vmem:[%s5920_s28 + $0x20] sm:$0x1] }
 0x198   : > { %v2699_v60 = vshll.u32 %v5311_v46, 16  ;;  %v5323_v33 = vld [vmem:[%s5920_s28 + $0x50] sm:$0x1] }
 0x199   : > { %v2092_v0 = vrot.slane %v2090_v55, 4 }
 0x19a   : > { %2130 = vrot.lane.b32.xlu1 %v2042_v50, %s5845_s6  ;;  %v2079_v50 = vrot.slane %v1932_v42, 5  ;;  %v2701_v12 = vrot.slane %v2699_v60, 5 }
 0x19b   : > { %2128 = vrot.lane.b32.xlu0 %v2038_v53, %s5845_s6  ;;  %2126 = vrot.lane.b32.xlu2 %v2035_v56, %s5845_s6 }
 0x19c   : > { %v1774_v61 = vpop.permute.xlu1 %1773 }
 0x19d   : > { %1866 = vst.msk [vmem:[#allocation2 + $0x10] sm:$0xf] %vm1861_vm10, %v1774_v61  ;;  %v1772_v63 = vpop.permute.xlu0 %1771  ;;  %v1788_v2 = vpop.permute.xlu2 %1787  ;;  %v2080_v61 = vsel %vm6106_vm6, %v2078_v49, %v2079_v50  ;;  %v2755_v50 = vshll.u32 %v5318_v32, 16 }
 0x19e   : > { %1865 = vst.msk [vmem:[#allocation2 + $0xc] sm:$0xf] %vm1861_vm10, %v1772_v63  ;;  %v1936_v63 = vld [vmem:[%s5920_s28 + $0xa8] sm:$0xe] }
 0x19f   : > { %1873 = vst.msk [vmem:[#allocation2 + $0x2c] sm:$0xf] %vm1861_vm10, %v1788_v2  ;;  %v1935_v2 = vld [vmem:[%s5920_s28 + $0xa4] sm:$0x1] }
 0x1a0   : > { %v2086_v15 = vrot.slane %v1935_v2, 5 }
 0x1a2   : > { %2136 = vrot.lane.b32.xlu1 %v2052_v3, %s5845_s6  ;;  %v2093_v3 = vrot.slane %v1938_v62, 5  ;;  %v2087_v29 = vsel %vm6106_vm6, %v2085_v14, %v2086_v15  ;;  %v5322_v62 = vld [vmem:[%s5920_s28 + $0x4c] sm:$0xf] }
 0x1a3   : > { %2134 = vrot.lane.b32.xlu0 %v2049_v4, %s5845_s6  ;;  %2132 = vrot.lane.b32.xlu2 %v2045_v9, %s5845_s6  ;;  %v5191_v4 = vrot.slane %v1936_v63, 9  ;;  %v5310_v9 = vld [vmem:[%s5920_s28 + $0x1c] sm:$0xf] }
 0x1a4   : > { %v1780_v13 = vpop.permute.xlu1 %1779  ;;  %v2689_v21 = vshll.u32 %v5310_v9, 16  ;;  %v2693_v28 = vshrl.u32 %v5310_v9, 16  ;;  %v2743_v9 = vrot.slane %v2741_v59, 4  ;;  %v5320_v59 = vld [vmem:[%s5920_s28 + $0x44] sm:$0x1] }
 0x1a5   : > { %1869 = vst.msk [vmem:[#allocation2 + $0x1c] sm:$0xf] %vm1861_vm10, %v1780_v13  ;;  %v1778_v17 = vpop.permute.xlu0 %1777  ;;  %v1794_v19 = vpop.permute.xlu2 %1793  ;;  %v2091_v23 = vsel %vm6106_vm6, %v5191_v4, %v2090_v55  ;;  %v6833_v4 = vrot.slane %v2737_v51, 5 }
 0x1a6   : > { %1868 = vst.msk [vmem:[#allocation2 + $0x18] sm:$0xf] %vm1861_vm10, %v1778_v17  ;;  %v2704_v17 = vshrl.u32 %v5312_v7, 16  ;;  %v2695_v47 = vrot.slane %v2693_v28, 4  ;;  %v5321_v7 = vld [vmem:[%s5920_s28 + $0x48] sm:$0xf] }
 0x1a7   : > { %1876 = vst.msk [vmem:[#allocation2 + $0x38] sm:$0xf] %vm1861_vm10, %v1794_v19  ;;  %v2094_v19 = vsel %vm6106_vm6, %v2092_v0, %v2093_v3  ;;  %v2757_v3 = vrot.slane %v2755_v50, 5 }
 0x1aa   : > { %2142 = vrot.lane.b32.xlu1 %v2063_v20, %s5845_s6  ;;  %v2686_v20 = vor.u32 %v2685_v6, %v2682_v5  ;;  %v5319_v5 = vld [vmem:[%s5920_s28 + $0x40] sm:$0xf]  ;;  %v5317_v6 = vld [vmem:[%s5920_s28 + $0x38] sm:$0x1] }
 0x1ab   : > { %2140 = vrot.lane.b32.xlu0 %v2059_v22, %s5845_s6  ;;  %2138 = vrot.lane.b32.xlu2 %v2056_v26, %s5845_s6  ;;  %v2097_v22 = vrot.slane %v1940_v10, 5  ;;  %v6808_v26 = vrot.slane %v2713_v11, 5  ;;  %v2785_v10 = vshll.u32 %v5322_v62, 16  ;;  %v2789_v11 = vshrl.u32 %v5322_v62, 16 }
 0x1ac   : > { %v1786_v31 = vpop.permute.xlu1 %1785  ;;  %v2687_v36 = vrot.slane %v2686_v20, 4 }
 0x1ad   : > { %1872 = vst.msk [vmem:[#allocation2 + $0x28] sm:$0xf] %vm1861_vm10, %v1786_v31  ;;  %v1784_v34 = vpop.permute.xlu0 %1783  ;;  %v1800_v37 = vpop.permute.xlu2 %1799  ;;  %v5314_v31 = vld [vmem:[%s5920_s28 + $0x2c] sm:$0x1]  ;;  %v2720_v41 = vor.u32 %v2719_v27, %v6808_v26  ;;  %v2747_v27 = vshll.u32 %v5317_v6, 16 }
 0x1ae   : > { %1871 = vst.msk [vmem:[#allocation2 + $0x24] sm:$0xf] %vm1861_vm10, %v1784_v34  ;;  %v2706_v34 = vrot.slane %v2704_v17, 4  ;;  %v2723_v42 = vshll.u32 %v5314_v31, 16  ;;  %v2744_v31 = vor.u32 %v2743_v9, %v6833_v4  ;;  %v5277_v9 = vld [vmem:[%s5920_s28 + $0x18] sm:$0xf] }
 0x1af   : > { %1879 = vst.msk [vmem:[#allocation2 + $0x44] sm:$0xf] %vm1861_vm10, %v1800_v37  ;;  %v2691_v37 = vrot.slane %v2689_v21, 5 }
 0x1b1   : > { %v2692_v54 = vsel %vm5931_vm2, %v2687_v36, %v2691_v37  ;;  %v2696_v63 = vor.u32 %v2695_v47, %v2691_v37  ;;  %v2795_v47 = vshll.u32 %v5323_v33, 16 }
 0x1b2   : > { %2148 = vrot.lane.b32.xlu1 %v2073_v30, %s5845_s6  ;;  %v2099_v30 = vrot.slane %v2097_v22, 4 }
 0x1b3   : > { %2146 = vrot.lane.b32.xlu0 %v2070_v38, %s5845_s6  ;;  %2144 = vrot.lane.b32.xlu2 %v2066_v43, %s5845_s6  ;;  %v2100_v38 = vrot.slane %v1941_v24, 5  ;;  %v2752_v43 = vshrl.u32 %v5318_v32, 16  ;;  %v2697_v15 = vrot.slane %v2696_v63, 4  ;;  %v2761_v24 = vshll.u32 %v5319_v5, 16 }
 0x1b4   : > { %v1792_v48 = vpop.permute.xlu1 %1791  ;;  %v6852_v32 = vrot.slane %v2785_v10, 5 }
 0x1b5   : > { %1875 = vst.msk [vmem:[#allocation2 + $0x34] sm:$0xf] %vm1861_vm10, %v1792_v48  ;;  %v1790_v53 = vpop.permute.xlu0 %1789  ;;  %v1806_v56 = vpop.permute.xlu2 %1805  ;;  %v2710_v48 = vor.u32 %v2709_v35, %v2706_v34  ;;  %v2101_v55 = vsel %vm6106_vm6, %v2099_v30, %v2100_v38  ;;  %v2754_v2 = vrot.slane %v2752_v43, 4  ;;  %v2791_v34 = vrot.slane %v2789_v11, 4  ;;  %v5705_v43 = vld [vmem:[%s8163_s1] sm:$0xff] }
 0x1b6   : > { %1874 = vst.msk [vmem:[#allocation2 + $0x30] sm:$0xf] %vm1861_vm10, %v1790_v53  ;;  %v5315_v53 = vld [vmem:[%s5920_s28 + $0x30] sm:$0xf]  ;;  %v2765_v35 = vshrl.u32 %v5319_v5, 16  ;;  %v2702_v36 = vsel %vm5931_vm2, %v2697_v15, %v2701_v12  ;;  %v2771_v5 = vshll.u32 %v5320_v59, 16 }
 0x1b7   : > { %1882 = vst.msk [vmem:[#allocation2 + $0x50] sm:$0xf] %vm1861_vm10, %v1806_v56  ;;  %v2721_v56 = vrot.slane %v2720_v41, 4  ;;  %v2731_v58 = vshll.u32 %v5315_v53, 16  ;;  %v2711_v0 = vrot.slane %v2710_v48, 4  ;;  %v2758_v20 = vor.u32 %v2757_v3, %v2754_v2 }
 0x1b8   : > { %v2749_v41 = vrot.slane %v2747_v27, 5  ;;  %v2792_v46 = vor.u32 %v2791_v34, %v6852_v32  ;;  %v5325_v48 = vld [vmem:[%s5920_s28 + $0x58] sm:$0xf]  ;;  %v2767_v51 = vrot.slane %v2765_v35, 4  ;;  %v5331_v2 = vld [vmem:[%s5920_s28 + $0x70] sm:$0xf] }
 0x1b9   : > { %v2733_v17 = vrot.slane %v2731_v58, 5  ;;  %v2813_v62 = vshrl.u32 %v5325_v48, 16  ;;  %v5328_v12 = vld [vmem:[%s5920_s28 + $0x64] sm:$0xf]  ;;  %v5330_v15 = vld [vmem:[%s5920_s28 + $0x6c] sm:$0xf] }
 0x1ba   : > { %2154 = vrot.lane.b32.xlu1 %v2084_v57, %s5845_s6  ;;  %v2725_v57 = vrot.slane %v2723_v42, 5  ;;  %v5327_v42 = vld [vmem:[%s5920_s28 + $0x60] sm:$0xf]  ;;  %v2833_v33 = vshll.u32 %v5328_v12, 16 }
 0x1bb   : > { %2152 = vrot.lane.b32.xlu0 %v2080_v61, %s5845_s6  ;;  %2150 = vrot.lane.b32.xlu2 %v2077_v52, %s5845_s6  ;;  %v2098_v61 = vsel %vm6106_vm6, %v5192_v45, %v2097_v22  ;;  %v2728_v52 = vshrl.u32 %v5315_v53, 16  ;;  %v2776_v22 = vshrl.u32 %v5321_v7, 16  ;;  %v2745_v45 = vrot.slane %v2744_v31, 4  ;;  %v5324_v53 = vld [vmem:[%s5920_s28 + $0x54] sm:$0xf] }
 0x1bc   : > { %v1798_v8 = vpop.permute.xlu1 %1797  ;;  %v2800_v58 = vshrl.u32 %v5324_v53, 16  ;;  %v2803_v6 = vshll.u32 %v5324_v53, 16  ;;  %v2851_v31 = vshll.u32 %v5330_v15, 16 }
 0x1bd   : > { %1878 = vst.msk [vmem:[#allocation2 + $0x40] sm:$0xf] %vm1861_vm10, %v1798_v8  ;;  %v1796_v13 = vpop.permute.xlu0 %1795  ;;  %v1812_v16 = vpop.permute.xlu2 %1811  ;;  %v2778_v38 = vrot.slane %v2776_v22, 4  ;;  %v2750_v63 = vsel %vm5931_vm2, %v2745_v45, %v2749_v41  ;;  %v2835_v45 = vrot.slane %v2833_v33, 5 }
 0x1be   : > { %1877 = vst.msk [vmem:[#allocation2 + $0x3c] sm:$0xf] %vm1861_vm10, %v1796_v13  ;;  %v2265_v13 = vld [vmem:[%s8163_s1 + $0x8] sm:$0xf] }
 0x1bf   : > { %1885 = vst.msk [vmem:[#allocation2 + $0x5c] sm:$0xf] %vm1861_vm10, %v1812_v16  ;;  %v2730_v16 = vrot.slane %v2728_v52, 4  ;;  %v2355_v18 = vunpack.c.l.b16 %v2265_v13  ;;  %v2793_v52 = vrot.slane %v2792_v46, 4 }
 0x1c1   : > { %v2357_v28 = vpack.c.b16 %v2355_v18, %v2355_v18  ;;  %v2734_v37 = vor.u32 %v2733_v17, %v2730_v16  ;;  %v5326_v16 = vld [vmem:[%s5920_s28 + $0x5c] sm:$0x1]  ;;  %v2857_v17 = vshll.u32 %v5331_v2, 16  ;;  %v2861_v18 = vshrl.u32 %v5331_v2, 16 }
 0x1c2   : > { %2160 = vrot.lane.b32.xlu1 %v2094_v19, %s5845_s6  ;;  %v2726_v19 = vsel %vm5931_vm2, %v2721_v56, %v2725_v57  ;;  %v2824_v56 = vshrl.u32 %v5327_v42, 16  ;;  %v2827_v57 = vshll.u32 %v5327_v42, 16  ;;  %v2853_v42 = vrot.slane %v2851_v31, 5 }
 0x1c3   : > { %2158 = vrot.lane.b32.xlu0 %v2091_v23, %s5845_s6  ;;  %2156 = vrot.lane.b32.xlu2 %v2087_v29, %s5845_s6  ;;  %v2779_v23 = vshll.u32 %v5321_v7, 16  ;;  %v2716_v29 = vsel %vm5931_vm2, %v2711_v0, %v6808_v26  ;;  %v2410_v30 = vsel %vm2408_vm11, %v2357_v28, 0  ;;  %v2759_v26 = vrot.slane %v2758_v20, 4 }
 0x1c4   : > { %v1804_v40 = vpop.permute.xlu1 %1803  ;;  %2418 = vmatpush.bf16.msra.mxu0 %v2410_v30  ;;  %5724 = vmatpush.bf16.msra.mxu2 %v2410_v30  ;;  %v2735_v50 = vrot.slane %v2734_v37, 4  ;;  %v2797_v7 = vrot.slane %v2795_v47, 5  ;;  %v2826_v10 = vrot.slane %v2824_v56, 4  ;;  %v2829_v11 = vrot.slane %v2827_v57, 5 }
 0x1c5   : > { %1881 = vst.msk [vmem:[#allocation2 + $0x4c] sm:$0xf] %vm1861_vm10, %v1804_v40  ;;  %v1802_v44 = vpop.permute.xlu0 %1801  ;;  %v1818_v49 = vpop.permute.xlu2 %1817  ;;  %v2781_v39 = vrot.slane %v2779_v23, 5  ;;  %v2763_v40 = vrot.slane %v2761_v24, 5  ;;  %v2805_v20 = vrot.slane %v2803_v6, 5  ;;  %v2773_v23 = vrot.slane %v2771_v5, 5 }
 0x1c6   : > { %1880 = vst.msk [vmem:[#allocation2 + $0x48] sm:$0xf] %vm1861_vm10, %v1802_v44  ;;  %v2740_v0 = vsel %vm5931_vm2, %v2735_v50, %v6833_v4  ;;  %v2798_v24 = vsel %vm5931_vm2, %v2793_v52, %v2797_v7  ;;  %v2830_v35 = vor.u32 %v2829_v11, %v2826_v10  ;;  %v6901_v30 = vrot.slane %v2857_v17, 5  ;;  %v5340_v7 = vld [vmem:[%s5920_s28 + $0x94] sm:$0xf] }
 0x1c7   : > { %1888 = vst.msk [vmem:[#allocation2 + $0x68] sm:$0xf] %vm1861_vm10, %v1818_v49  ;;  %v2764_v60 = vsel %vm5931_vm2, %v2759_v26, %v2763_v40  ;;  %v2768_v3 = vor.u32 %v2767_v51, %v2763_v40  ;;  %v2837_v26 = vshrl.u32 %v5328_v12, 16  ;;  %v5332_v40 = vld [vmem:[%s5920_s28 + $0x74] sm:$0x1] }
 0x1c8   : > { %2419 = vmatpush.bf16.msra.mxu0 %v5705_v43  ;;  %5725 = vmatpush.bf16.msra.mxu2 %v5705_v43  ;;  %v5336_v43 = vld [vmem:[%s5920_s28 + $0x84] sm:$0xf]  ;;  %v5334_v51 = vld [vmem:[%s5920_s28 + $0x7c] sm:$0xf]  ;;  %v5337_v17 = vld [vmem:[%s5920_s28 + $0x88] sm:$0xf] }
 0x1c9   : > { %v2769_v22 = vrot.slane %v2768_v3, 4  ;;  %v2896_v56 = vshrl.u32 %v5336_v43, 16  ;;  %v2899_v57 = vshll.u32 %v5336_v43, 16  ;;  %v2839_v59 = vrot.slane %v2837_v26, 4  ;;  %v5279_v43 = vld [vmem:[%s5920_s28 + $0x24] sm:$0xf] }
 0x1ca   : > { %3063 = vrot.lane.b32.xlu1 %v2692_v54, %s5841_s29  ;;  %v2782_v54 = vor.u32 %v2781_v39, %v2778_v38  ;;  %v2863_v38 = vrot.slane %v2861_v18, 4  ;;  %v2885_v2 = vshrl.u32 %v5334_v51, 16 }
 0x1cb   : > { %2164 = vrot.lane.b32.xlu0 %v2101_v55, %s5845_s6  ;;  %2162 = vrot.lane.b32.xlu2 %v2098_v61, %s5845_s6  ;;  %v2809_v61 = vshll.u32 %v5325_v48, 16 }
 0x1cc   : > { %v1810_v8 = vpop.permute.xlu1 %1809  ;;  %v2864_v50 = vor.u32 %v2863_v38, %v6901_v30 }
 0x1cd   : > { %1884 = vst.msk [vmem:[#allocation2 + $0x58] sm:$0xf] %vm1861_vm10, %v1810_v8  ;;  %v1808_v14 = vpop.permute.xlu0 %1807  ;;  %v1824_v21 = vpop.permute.xlu2 %1823  ;;  %v2783_v8 = vrot.slane %v2782_v54, 4  ;;  %v6884_v13 = vrot.slane %v2809_v61, 5 }
 0x1ce   : > { %1883 = vst.msk [vmem:[#allocation2 + $0x54] sm:$0xf] %vm1861_vm10, %v1808_v14  ;;  %v2815_v14 = vrot.slane %v2813_v62, 4  ;;  %v5329_v62 = vld [vmem:[%s5920_s28 + $0x68] sm:$0x1]  ;;  %v2865_v5 = vrot.slane %v2864_v50, 4 }
 0x1cf   : > { %1891 = vst.msk [vmem:[#allocation2 + $0x74] sm:$0xf] %vm1861_vm10, %v1824_v21  ;;  %v2788_v34 = vsel %vm5931_vm2, %v2783_v8, %v6852_v32  ;;  %v2774_v32 = vsel %vm5931_vm2, %v2769_v22, %v2773_v23  ;;  %v2840_v8 = vor.u32 %v2839_v59, %v2835_v45  ;;  %v2933_v22 = vshrl.u32 %v5340_v7, 16  ;;  %v5339_v23 = vld [vmem:[%s5920_s28 + $0x90] sm:$0xf] }
 0x1d0   : > { %v2816_v37 = vor.u32 %v2815_v14, %v6884_v13  ;;  %v5286_v59 = vld [vmem:[%s5920_s28 + $0x4c] sm:$0xf] }
 0x1d2   : > { %3069 = vrot.lane.b32.xlu1 %v2726_v19, %s5841_s29  ;;  %v2802_v19 = vrot.slane %v2800_v58, 4  ;;  %v2817_v48 = vrot.slane %v2816_v37, 4  ;;  %v2905_v37 = vshll.u32 %v5337_v17, 16 }
 0x1d3   : > { %3067 = vrot.lane.b32.xlu0 %v2716_v29, %s5841_s29  ;;  %3065 = vrot.lane.b32.xlu2 %v2702_v36, %s5841_s29  ;;  %v2848_v29 = vshrl.u32 %v5330_v15, 16  ;;  %v2819_v36 = vshll.u32 %v5326_v16, 16  ;;  %v2898_v15 = vrot.slane %v2896_v56, 4  ;;  %v5283_v16 = vld [vmem:[%s5920_s28 + $0x3c] sm:$0xf] }
 0x1d4   : > { %v1816_v44 = vpop.permute.xlu1 %1815  ;;  %v2806_v39 = vor.u32 %v2805_v20, %v2802_v19  ;;  %v5335_v20 = vld [vmem:[%s5920_s28 + $0x80] sm:$0x1] }
 0x1d5   : > { %1887 = vst.msk [vmem:[#allocation2 + $0x64] sm:$0xf] %vm1861_vm10, %v1816_v44  ;;  %v1814_v49 = vpop.permute.xlu0 %1813  ;;  %v2103_v55 = vpop.permute.xlu2 %2102  ;;  %v2850_v41 = vrot.slane %v2848_v29, 4  ;;  %v2831_v44 = vrot.slane %v2830_v35, 4  ;;  %v2821_v46 = vrot.slane %v2819_v36, 5  ;;  %v2891_v26 = vshll.u32 %v5335_v20, 16 }
 0x1d6   : > { %1886 = vst.msk [vmem:[#allocation2 + $0x60] sm:$0xf] %vm1861_vm10, %v1814_v49  ;;  %v5280_v49 = vld [vmem:[%s5920_s28 + $0x28] sm:$0xf]  ;;  %v2807_v53 = vrot.slane %v2806_v39, 4 }
 0x1d7   : > { %2199 = vst.msk [vmem:[#allocation2] sm:$0xf] %vm2198_vm12, %v2103_v55  ;;  %v2867_v55 = vshll.u32 %v5332_v40, 16  ;;  %v2836_v52 = vsel %vm5931_vm2, %v2831_v44, %v2835_v45  ;;  %v2822_v3 = vsel %vm5931_vm2, %v2817_v48, %v2821_v46  ;;  %v2923_v40 = vshll.u32 %v5339_v23, 16  ;;  %v5278_v48 = vld [vmem:[%s5920_s28 + $0x1c] sm:$0xf] }
 0x1d8   : > { %v2812_v6 = vsel %vm5931_vm2, %v2807_v53, %v6884_v13  ;;  %v2887_v13 = vrot.slane %v2885_v2, 4  ;;  %v2909_v44 = vshrl.u32 %v5337_v17, 16  ;;  %v2935_v45 = vrot.slane %v2933_v22, 4  ;;  %v5344_v17 = vld [vmem:[%s5920_s28 + $0xa4] sm:$0x1] }
 0x1d9   : > { %v2869_v12 = vrot.slane %v2867_v55, 5  ;;  %v5345_v55 = vld [vmem:[%s5920_s28 + $0xa8] sm:$0xf] }
 0x1da   : > { %3075 = vrot.lane.b32.xlu1 %v2764_v60, %s5841_s29  ;;  %v2854_v60 = vor.u32 %v2853_v42, %v2850_v41  ;;  %v2911_v2 = vrot.slane %v2909_v44, 4 }
 0x1db   : > { %3073 = vrot.lane.b32.xlu0 %v2750_v63, %s5841_s29  ;;  %3071 = vrot.lane.b32.xlu2 %v2740_v0, %s5841_s29  ;;  %v5333_v63 = vld [vmem:[%s5920_s28 + $0x78] sm:$0xf]  ;;  %v2881_v0 = vshll.u32 %v5334_v51, 16  ;;  %v2870_v35 = vsel %vm5931_vm2, %v2865_v5, %v2869_v12  ;;  %v2893_v51 = vrot.slane %v2891_v26, 5 }
 0x1dc   : > { %v1822_v4 = vpop.permute.xlu1 %1821  ;;  %v2872_v10 = vshrl.u32 %v5333_v63, 16  ;;  %v2875_v11 = vshll.u32 %v5333_v63, 16  ;;  %v2855_v14 = vrot.slane %v2854_v60, 4  ;;  %v5341_v60 = vld [vmem:[%s5920_s28 + $0x98] sm:$0x1] }
 0x1dd   : > { %1890 = vst.msk [vmem:[#allocation2 + $0x70] sm:$0xf] %vm1861_vm10, %v1822_v4  ;;  %v1820_v21 = vpop.permute.xlu0 %1819  ;;  %v2109_v28 = vpop.permute.xlu2 %2108  ;;  %v2901_v4 = vrot.slane %v2899_v57, 5  ;;  %v6933_v18 = vrot.slane %v2881_v0, 5 }
 0x1de   : > { %1889 = vst.msk [vmem:[#allocation2 + $0x6c] sm:$0xf] %vm1861_vm10, %v1820_v21  ;;  %v6893_v27 = vld [vmem:[#allocation2] sm:$0xf]  ;;  %v2929_v21 = vshll.u32 %v5340_v7, 16  ;;  %v2874_v31 = vrot.slane %v2872_v10, 4  ;;  %v2860_v41 = vsel %vm5931_vm2, %v2855_v14, %v6901_v30 }
 0x1df   : > { %2599 = vst.msk [vmem:[#allocation2] sm:$0xf] %vm203_vm5, %v5277_v9  ;;  %v2843_v9 = vshll.u32 %v5329_v62, 16  ;;  %v2902_v36 = vor.u32 %v2901_v4, %v2898_v15  ;;  %v2888_v39 = vor.u32 %v2887_v13, %v6933_v18  ;;  %v2968_v7 = vshrl.u32 %v5345_v55, 16  ;;  %v6983_v4 = vld [vmem:[%s5920_s28 + $0xac] sm:$0xf] }
 0x1e0   : > { %2202 = vst.msk [vmem:[#allocation2 + $0xc] sm:$0xf] %vm2198_vm12, %v2109_v28  ;;  %v2841_v28 = vrot.slane %v2840_v8, 4  ;;  %v6950_v42 = vrot.slane %v2929_v21, 5  ;;  %v2971_v8 = vshll.u32 %v5345_v55, 16  ;;  %v2939_v10 = vshll.u32 %v5341_v60, 16 }
 0x1e1   : > { %v2845_v29 = vrot.slane %v2843_v9, 5  ;;  %v2903_v30 = vrot.slane %v2902_v36, 4  ;;  %v2889_v50 = vrot.slane %v2888_v39, 4  ;;  %v5338_v9 = vld [vmem:[%s5920_s28 + $0x8c] sm:$0x1]  ;;  %v2970_v22 = vrot.slane %v2968_v7, 4 }
 0x1e2   : > { %3081 = vrot.lane.b32.xlu1 %v2798_v24, %s5841_s29  ;;  %v2915_v20 = vshll.u32 %v5338_v9, 16  ;;  %v5282_v21 = vld [vmem:[%s5920_s28 + $0x34] sm:$0xf] }
 0x1e3   : > { %3079 = vrot.lane.b32.xlu0 %v2788_v34, %s5841_s29  ;;  %3077 = vrot.lane.b32.xlu2 %v2774_v32, %s5841_s29  ;;  %v2877_v34 = vrot.slane %v2875_v11, 5  ;;  %v2920_v32 = vshrl.u32 %v5339_v23, 16  ;;  %v2846_v46 = vsel %vm5931_vm2, %v2841_v28, %v2845_v29  ;;  %v2973_v23 = vrot.slane %v2971_v8, 5  ;;  %v5281_v28 = vld [vmem:[%s5920_s28 + $0x30] sm:$0xf] }
 0x1e4   : > { %v1828_v47 = vpop.permute.xlu1 %1827  ;;  %v2941_v29 = vrot.slane %v2939_v10, 5  ;;  %v5348_v39 = vld [vmem:[%s5920_s28 + $0xb4] sm:$0xf]  ;;  %v5350_v8 = vld [vmem:[%s5920_s28 + $0xbc] sm:$0x1] }
 0x1e5   : > { %1893 = vst.msk [vmem:[#allocation2 + $0x7c] sm:$0xf] %vm1861_vm10, %v1828_v47  ;;  %v1826_v54 = vpop.permute.xlu0 %1825  ;;  %v2115_v61 = vpop.permute.xlu2 %2114  ;;  %v2878_v47 = vor.u32 %v2877_v34, %v2874_v31  ;;  %v2922_v53 = vrot.slane %v2920_v32, 4  ;;  %v2992_v55 = vshrl.u32 %v5348_v39, 16 }
 0x1e6   : > { %1892 = vst.msk [vmem:[#allocation2 + $0x78] sm:$0xf] %vm1861_vm10, %v1826_v54  ;;  %v2925_v54 = vrot.slane %v2923_v40, 5 }
 0x1e7   : > { %v6919_v58 = vld [vmem:[#allocation2 + $0x8] sm:$0xf0]  ;;  %2205 = vst.msk [vmem:[#allocation2 + $0x18] sm:$0xf] %vm2198_vm12, %v2115_v61  ;;  %v5343_v61 = vld [vmem:[%s5920_s28 + $0xa0] sm:$0xf] }
 0x1e8   : > { %2602 = vst.msk [vmem:[#allocation2 + $0xc] sm:$0xf] %vm203_vm5, %v5280_v49  ;;  %v6957_v49 = vrot.slane %v2905_v37, 5  ;;  %v2879_v0 = vrot.slane %v2878_v47, 4  ;;  %v2926_v11 = vor.u32 %v2925_v54, %v2922_v53  ;;  %v2953_v12 = vshll.u32 %v5343_v61, 16 }
 0x1e9   : > { %v2957_v14 = vshrl.u32 %v5343_v61, 16  ;;  %v2977_v37 = vshll.u32 %v6983_v4, 16  ;;  %v5284_v61 = vld [vmem:[%s5920_s28 + $0x40] sm:$0xf]  ;;  %v2994_v9 = vrot.slane %v2992_v55, 4 }
 0x1ea   : > { %3087 = vrot.lane.b32.xlu1 %v2836_v52, %s5841_s29  ;;  %v2936_v52 = vor.u32 %v2935_v45, %v6950_v42  ;;  %v2908_v5 = vsel %vm5931_vm2, %v2903_v30, %v6957_v49  ;;  %v2884_v13 = vsel %vm5931_vm2, %v2879_v0, %v6933_v18  ;;  %v2927_v31 = vrot.slane %v2926_v11, 4  ;;  %v5295_v55 = vld [vmem:[%s5920_s28 + $0x84] sm:$0xf] }
 0x1eb   : > { %3085 = vrot.lane.b32.xlu0 %v2822_v3, %s5841_s29  ;;  %3083 = vrot.lane.b32.xlu2 %v2812_v6, %s5841_s29  ;;  %v6997_v34 = vrot.slane %v2953_v12, 5  ;;  %v2959_v18 = vrot.slane %v2957_v14, 4  ;;  %v5354_v14 = vld [vmem:[%s5920_s28 + $0xcc] sm:$0xf] }
 0x1ec   : > { %v2107_v19 = vpop.permute.xlu1 %2106  ;;  %v2932_v60 = vsel %vm5931_vm2, %v2927_v31, %v6950_v42  ;;  %v7028_v42 = vrot.slane %v2977_v37, 5  ;;  %v3040_v31 = vshrl.u32 %v5354_v14, 16 }
 0x1ed   : > { %2201 = vst.msk [vmem:[#allocation2 + $0x8] sm:$0xf] %vm2198_vm12, %v2107_v19  ;;  %v2105_v24 = vpop.permute.xlu0 %2104  ;;  %v2121_v38 = vpop.permute.xlu2 %2120  ;;  %v2912_v19 = vor.u32 %v2911_v2, %v6957_v49  ;;  %v2960_v54 = vor.u32 %v2959_v18, %v6997_v34  ;;  %v3043_v18 = vshll.u32 %v5354_v14, 16 }
 0x1ee   : > { %2200 = vst.msk [vmem:[#allocation2 + $0x4] sm:$0xf] %vm2198_vm12, %v2105_v24  ;;  %v6942_v33 = vld [vmem:[#allocation2 + $0x18] sm:$0xf] }
 0x1ef   : > { %2605 = vst.msk [vmem:[#allocation2 + $0x18] sm:$0xf] %vm203_vm5, %v5283_v16  ;;  %v2937_v16 = vrot.slane %v2936_v52, 4  ;;  %v5349_v24 = vld [vmem:[%s5920_s28 + $0xb8] sm:$0xf]  ;;  %v2913_v45 = vrot.slane %v2912_v19, 4 }
 0x1f0   : > { %2208 = vst.msk [vmem:[#allocation2 + $0x24] sm:$0xf] %vm2198_vm12, %v2121_v38  ;;  %v2963_v38 = vshll.u32 %v5344_v17, 16  ;;  %v3005_v44 = vshrl.u32 %v5349_v24, 16 }
 0x1f1   : > { %v2942_v53 = vsel %vm5931_vm2, %v2937_v16, %v2941_v29 }
 0x1f2   : > { %3093 = vrot.lane.b32.xlu1 %v2870_v35, %s5841_s29  ;;  %v5342_v35 = vld [vmem:[%s5920_s28 + $0x9c] sm:$0xf]  ;;  %v2965_v7 = vrot.slane %v2963_v38, 5 }
 0x1f3   : > { %3091 = vrot.lane.b32.xlu0 %v2860_v41, %s5841_s29  ;;  %3089 = vrot.lane.b32.xlu2 %v2846_v46, %s5841_s29  ;;  %v2944_v26 = vshrl.u32 %v5342_v35, 16  ;;  %v2947_v32 = vshll.u32 %v5342_v35, 16  ;;  %v5289_v41 = vld [vmem:[%s5920_s28 + $0x60] sm:$0xf]  ;;  %v2917_v46 = vrot.slane %v2915_v20, 5 }
 0x1f4   : > { %v6961_v56 = vld [vmem:[#allocation2 + $0x8] sm:$0xf]  ;;  %v2113_v57 = vpop.permute.xlu1 %2112 }
 0x1f5   : > { %2601 = vst.msk [vmem:[#allocation2 + $0x8] sm:$0xf] %vm203_vm5, %v5279_v43  ;;  %v5689_v62 = vld [vmem:[#allocation2] sm:$0xf0]  ;;  %v2111_v63 = vpop.permute.xlu0 %2110  ;;  %v2127_v6 = vpop.permute.xlu2 %2126  ;;  %v3001_v43 = vshll.u32 %v5349_v24, 16  ;;  %v2946_v49 = vrot.slane %v2944_v26, 4  ;;  %v2918_v52 = vsel %vm5931_vm2, %v2913_v45, %v2917_v46  ;;  %v5200_v19 = vor.u32 %v6919_v58, %v6961_v56 }
 0x1f6   : > { %2600 = vst.msk [vmem:[#allocation2 + $0x4] sm:$0xf] %vm203_vm5, %v5278_v48  ;;  %v5196_v3 = vor.u32 %v5689_v62, %v6893_v27  ;;  %v2894_v27 = vsel %vm5931_vm2, %v2889_v50, %v2893_v51  ;;  %v2974_v48 = vor.u32 %v2973_v23, %v2970_v22  ;;  %v2949_v50 = vrot.slane %v2947_v32, 5  ;;  %v5347_v24 = vld [vmem:[%s5920_s28 + $0xb0] sm:$0x1] }
 0x1f7   : > { %2204 = vst.msk [vmem:[#allocation2 + $0x14] sm:$0xf] %vm2198_vm12, %v2113_v57  ;;  %v6980_v15 = vld [vmem:[#allocation2 + $0x20] sm:$0xf0]  ;;  %v2995_v57 = vshll.u32 %v5348_v39, 16  ;;  %v2987_v39 = vshll.u32 %v5347_v24, 16 }
 0x1f8   : > { %2203 = vst.msk [vmem:[#allocation2 + $0x10] sm:$0xf] %vm2198_vm12, %v2111_v63  ;;  %5261 = vmatmul.msk.bf16.vlgmr.msra.gmra.mxu0 %vm2359_vm13, %v5196_v3  ;;  %v2981_v63 = vshrl.u32 %v6983_v4, 16  ;;  %v2950_v0 = vor.u32 %v2949_v50, %v2946_v49  ;;  %v2975_v2 = vrot.slane %v2974_v48, 4  ;;  %v7030_v3 = vrot.slane %v3001_v43, 5 }
 0x1f9   : > { %2608 = vst.msk [vmem:[#allocation2 + $0x24] sm:$0xf] %vm203_vm5, %v5286_v59  ;;  %v5285_v59 = vld [vmem:[%s5920_s28 + $0x48] sm:$0xf]  ;;  %v2997_v10 = vrot.slane %v2995_v57, 5  ;;  %v3045_v45 = vrot.slane %v3043_v18, 5 }
 0x1fa   : > { %3099 = vrot.lane.b32.xlu1 %v2908_v5, %s5841_s29  ;;  %2211 = vst.msk [vmem:[#allocation2 + $0x30] sm:$0xf] %vm2198_vm12, %v2127_v6  ;;  %v3007_v5 = vrot.slane %v3005_v44, 4  ;;  %v2961_v6 = vrot.slane %v2960_v54, 4  ;;  %v2951_v17 = vrot.slane %v2950_v0, 4  ;;  %v2980_v20 = vsel %vm5931_vm2, %v2975_v2, %v7028_v42 }
 0x1fb   : > { %3097 = vrot.lane.b32.xlu0 %v2894_v27, %s5841_s29  ;;  %3095 = vrot.lane.b32.xlu2 %v2884_v13, %s5841_s29  ;;  %v5352_v27 = vld [vmem:[%s5920_s28 + $0xc4] sm:$0xf]  ;;  %v2983_v13 = vrot.slane %v2981_v63, 4  ;;  %v2998_v29 = vor.u32 %v2997_v10, %v2994_v9  ;;  %v5288_v26 = vld [vmem:[%s5920_s28 + $0x58] sm:$0xf]  ;;  %v3042_v44 = vrot.slane %v3040_v31, 4 }
 0x1fc   : > { %v2119_v36 = vpop.permute.xlu1 %2118  ;;  %v3008_v22 = vor.u32 %v3007_v5, %v7030_v3  ;;  %v2966_v58 = vsel %vm5931_vm2, %v2961_v6, %v2965_v7  ;;  %v3025_v35 = vshll.u32 %v5352_v27, 16  ;;  %v2956_v37 = vsel %vm5931_vm2, %v2951_v17, %v6997_v34  ;;  %v5351_v46 = vld [vmem:[%s5920_s28 + $0xc0] sm:$0xf]  ;;  %v5355_v48 = vld [vmem:[%s5920_s28 + $0xd0] sm:$0xf] }
 0x1fd   : > { %2207 = vst.msk [vmem:[#allocation2 + $0x20] sm:$0xf] %vm2198_vm12, %v2119_v36  ;;  %v2117_v40 = vpop.permute.xlu0 %2116  ;;  %v2133_v30 = vpop.permute.xlu2 %2132  ;;  %v3029_v36 = vshrl.u32 %v5352_v27, 16  ;;  %v2984_v38 = vor.u32 %v2983_v13, %v7028_v42  ;;  %v2999_v43 = vrot.slane %v2998_v29, 4  ;;  %v3016_v50 = vshrl.u32 %v5351_v46, 16 }
 0x1fe   : > { %v7005_v47 = vld [vmem:[#allocation2 + $0x10] sm:$0xf0]  ;;  %2206 = vst.msk [vmem:[#allocation2 + $0x1c] sm:$0xf] %vm2198_vm12, %v2117_v40  ;;  %v3009_v32 = vrot.slane %v3008_v22, 4  ;;  %v3046_v5 = vor.u32 %v3045_v45, %v3042_v44  ;;  %v3049_v6 = vshll.u32 %v5355_v48, 16 }
 0x1ff   : > { %2604 = vst.msk [vmem:[#allocation2 + $0x14] sm:$0xf] %vm203_vm5, %v5282_v21  ;;  %v7009_v51 = vld [vmem:[#allocation2 + $0x10] sm:$0xf]  ;;  %v5287_v40 = vld [vmem:[%s5920_s28 + $0x54] sm:$0xf]  ;;  %v3004_v7 = vsel %vm5931_vm2, %v2999_v43, %v7030_v3 }
 0x200   : > { %2603 = vst.msk [vmem:[#allocation2 + $0x10] sm:$0xf] %vm203_vm5, %v5281_v28  ;;  %v5292_v21 = vld [vmem:[%s5920_s28 + $0x70] sm:$0xf]  ;;  %v3011_v28 = vshll.u32 %v5350_v8, 16  ;;  %v3031_v49 = vrot.slane %v3029_v36, 4  ;;  %v5204_v18 = vor.u32 %v7005_v47, %v7009_v51 }
 0x201   : > { %v7020_v62 = vld [vmem:[#allocation2 + $0x30] sm:$0xf]  ;;  %2214 = vst.msk [vmem:[#allocation2 + $0x3c] sm:$0xf] %vm2198_vm12, %v2133_v30  ;;  %v7070_v30 = vrot.slane %v3025_v35, 5  ;;  %v3047_v3 = vrot.slane %v3046_v5, 4 }
 0x202   : > { %3105 = vrot.lane.b32.xlu1 %v2942_v53, %s5841_s29  ;;  %2611 = vst.msk [vmem:[#allocation2 + $0x30] sm:$0xf] %vm203_vm5, %v5289_v41  ;;  %v3013_v41 = vrot.slane %v3011_v28, 5  ;;  %v3019_v53 = vshll.u32 %v5351_v46, 16  ;;  %v5353_v57 = vld [vmem:[%s5920_s28 + $0xc8] sm:$0x1] }
 0x203   : > { %3103 = vrot.lane.b32.xlu0 %v2932_v60, %s5841_s29  ;;  %3101 = vrot.lane.b32.xlu2 %v2918_v52, %s5841_s29  ;;  %v2989_v60 = vrot.slane %v2987_v39, 5  ;;  %v3018_v52 = vrot.slane %v3016_v50, 4  ;;  %v3032_v8 = vor.u32 %v3031_v49, %v7070_v30  ;;  %v3035_v9 = vshll.u32 %v5353_v57, 16  ;;  %v5290_v17 = vld [vmem:[%s5920_s28 + $0x64] sm:$0xf] }
 0x204   : > { %v7034_v11 = vld [vmem:[#allocation2 + $0x20] sm:$0xf]  ;;  %v2125_v12 = vpop.permute.xlu1 %2124  ;;  %v3021_v0 = vrot.slane %v3019_v53, 5  ;;  %v3014_v42 = vsel %vm5931_vm2, %v3009_v32, %v3013_v41  ;;  %v3051_v13 = vrot.slane %v3049_v6, 5  ;;  %v5356_v36 = vld [vmem:[%s5920_s28 + $0xd4] sm:$0x1] }
 0x205   : > { %2607 = vst.msk [vmem:[#allocation2 + $0x20] sm:$0xf] %vm203_vm5, %v5285_v59  ;;  %v7040_v4 = vld [vmem:[#allocation2 + $0x18] sm:$0xf0]  ;;  %v2123_v16 = vpop.permute.xlu0 %2122  ;;  %v2139_v23 = vpop.permute.xlu2 %2138  ;;  %v2985_v59 = vrot.slane %v2984_v38, 4  ;;  %v3037_v22 = vrot.slane %v3035_v9, 5 }
 0x206   : > { %2606 = vst.msk [vmem:[#allocation2 + $0x1c] sm:$0xf] %vm203_vm5, %v5284_v61  ;;  %v3022_v27 = vor.u32 %v3021_v0, %v3018_v52  ;;  %v5359_v47 = vld [vmem:[%s5920_s28 + $0x20] sm:$0x1]  ;;  %v5357_v51 = vld [vmem:[%s5920_s28 + $0x18] sm:$0xe] }
 0x207   : > { %2210 = vst.msk [vmem:[#allocation2 + $0x2c] sm:$0xf] %vm2198_vm12, %v2125_v12  ;;  %v3053_v12 = vshrl.u32 %v5355_v48, 16  ;;  %v2990_v14 = vsel %vm5931_vm2, %v2985_v59, %v2989_v60  ;;  %v3059_v41 = vshll.u32 %v5356_v36, 16  ;;  %v3292_v44 = vrot.slane %v5359_v47, 5 }
 0x208   : > { %2209 = vst.msk [vmem:[#allocation2 + $0x28] sm:$0xf] %vm2198_vm12, %v2123_v16  ;;  %5262 = vmatmul.msk.bf16.gmra.mxu0 %vm2359_vm13, %v5200_v19  ;;  %v7056_v56 = vld [vmem:[#allocation2 + $0x38] sm:$0xf0]  ;;  %v5291_v16 = vld [vmem:[%s5920_s28 + $0x6c] sm:$0xf] }
 0x209   : > { %2614 = vst.msk [vmem:[#allocation2 + $0x3c] sm:$0xf] %vm203_vm5, %v5292_v21  ;;  %v3033_v21 = vrot.slane %v3032_v8, 4  ;;  %v3023_v29 = vrot.slane %v3022_v27, 4  ;;  %v3055_v31 = vrot.slane %v3053_v12, 4  ;;  %v5405_v48 = vrot.slane %v5357_v51, 9 }
 0x20a   : > { %3111 = vrot.lane.b32.xlu1 %v2980_v20, %s5841_s29  ;;  %2217 = vst.msk [vmem:[#allocation2 + $0x48] sm:$0xf] %vm2198_vm12, %v2139_v23  ;;  %v5358_v23 = vld [vmem:[%s5920_s28 + $0x1c] sm:$0xf]  ;;  %v5293_v46 = vld [vmem:[%s5920_s28 + $0x78] sm:$0xf] }
 0x20b   : > { %3109 = vrot.lane.b32.xlu0 %v2966_v58, %s5841_s29  ;;  %3107 = vrot.lane.b32.xlu2 %v2956_v37, %s5841_s29  ;;  %v5298_v58 = vld [vmem:[%s5920_s28 + $0x94] sm:$0xf]  ;;  %v3052_v37 = vsel %vm5931_vm2, %v3047_v3, %v3051_v13  ;;  %v3289_v38 = vrot.slane %v5358_v23, 5  ;;  %v3038_v39 = vsel %vm5931_vm2, %v3033_v21, %v3037_v22  ;;  %v3028_v32 = vsel %vm5931_vm2, %v3023_v29, %v7070_v30  ;;  %v5294_v45 = vld [vmem:[%s5920_s28 + $0x7c] sm:$0xf] }
 0x20c   : > { %v2131_v34 = vpop.permute.xlu1 %2130  ;;  %v5361_v49 = vld [vmem:[%s5920_s28 + $0x28] sm:$0xf]  ;;  %v3061_v53 = vrot.slane %v3059_v41, 5  ;;  %v5297_v9 = vld [vmem:[%s5920_s28 + $0x90] sm:$0xf]  ;;  %v5208_v29 = vor.u32 %v7040_v4, %v6942_v33 }
 0x20d   : > { %2213 = vst.msk [vmem:[#allocation2 + $0x38] sm:$0xf] %vm2198_vm12, %v2131_v34  ;;  %v2129_v54 = vpop.permute.xlu0 %2128  ;;  %v2145_v63 = vpop.permute.xlu2 %2144  ;;  %v3291_v43 = vrot.slane %v3289_v38, 4  ;;  %v3290_v0 = vsel %vm6106_vm6, %v5405_v48, %v3289_v38  ;;  %v3296_v5 = vrot.slane %v5361_v49, 5  ;;  %v5360_v12 = vld [vmem:[%s5920_s28 + $0x24] sm:$0xe] }
 0x20e   : > { %v7076_v61 = vld [vmem:[#allocation2 + $0x28] sm:$0xf0]  ;;  %2212 = vst.msk [vmem:[#allocation2 + $0x34] sm:$0xf] %vm2198_vm12, %v2129_v54  ;;  %v5367_v21 = vld [vmem:[%s5920_s28 + $0x40] sm:$0xf] }
 0x20f   : > { %2610 = vst.msk [vmem:[#allocation2 + $0x2c] sm:$0xf] %vm203_vm5, %v5288_v26  ;;  %v7080_v2 = vld [vmem:[#allocation2 + $0x28] sm:$0xf]  ;;  %v3293_v60 = vsel %vm6106_vm6, %v3291_v43, %v3292_v44  ;;  %v5368_v33 = vld [vmem:[%s5920_s28 + $0x44] sm:$0x1] }
 0x210   : > { %2609 = vst.msk [vmem:[#allocation2 + $0x28] sm:$0xf] %vm203_vm5, %v5287_v40  ;;  %v3056_v40 = vor.u32 %v3055_v31, %v3051_v13  ;;  %v3298_v13 = vrot.slane %v3296_v5, 4  ;;  %v5304_v31 = vld [vmem:[%s5920_s28 + $0xb8] sm:$0xf]  ;;  %v3313_v51 = vrot.slane %v5368_v33, 5 }
 0x211   : > { %v7089_v10 = vld [vmem:[#allocation2 + $0x48] sm:$0xf]  ;;  %2220 = vst.msk [vmem:[#allocation2 + $0x54] sm:$0xf] %vm2198_vm12, %v2145_v63  ;;  %v5363_v63 = vld [vmem:[%s5920_s28 + $0x30] sm:$0xe] }
 0x212   : > { %3117 = vrot.lane.b32.xlu1 %v3014_v42, %s5841_s29  ;;  %2617 = vst.msk [vmem:[#allocation2 + $0x48] sm:$0xf] %vm203_vm5, %v5295_v55  ;;  %v3057_v50 = vrot.slane %v3056_v40, 4  ;;  %v5301_v55 = vld [vmem:[%s5920_s28 + $0xa8] sm:$0xf]  ;;  %v5407_v27 = vrot.slane %v5363_v63, 9 }
 0x213   : > { %3115 = vrot.lane.b32.xlu0 %v3004_v7, %s5841_s29  ;;  %3113 = vrot.lane.b32.xlu2 %v2990_v14, %s5841_s29  ;;  %v5364_v42 = vld [vmem:[%s5920_s28 + $0x34] sm:$0xf]  ;;  %v5362_v7 = vld [vmem:[%s5920_s28 + $0x2c] sm:$0x1] }
 0x214   : > { %v7099_v19 = vld [vmem:[#allocation2 + $0x38] sm:$0xf]  ;;  %v2137_v20 = vpop.permute.xlu1 %2136  ;;  %v3062_v8 = vsel %vm5931_vm2, %v3057_v50, %v3061_v53  ;;  %v5296_v14 = vld [vmem:[%s5920_s28 + $0x88] sm:$0xf]  ;;  %v5366_v4 = vld [vmem:[%s5920_s28 + $0x3c] sm:$0xe] }
 0x215   : > { %2613 = vst.msk [vmem:[#allocation2 + $0x38] sm:$0xf] %vm203_vm5, %v5291_v16  ;;  %v7104_v24 = vld [vmem:[#allocation2 + $0x30] sm:$0xf0]  ;;  %v2135_v28 = vpop.permute.xlu0 %2134  ;;  %v2151_v35 = vpop.permute.xlu2 %2150  ;;  %v3303_v16 = vrot.slane %v5364_v42, 5  ;;  %v5408_v43 = vrot.slane %v5366_v4, 9 }
 0x216   : > { %2612 = vst.msk [vmem:[#allocation2 + $0x34] sm:$0xf] %vm203_vm5, %v5290_v17  ;;  %v5300_v40 = vld [vmem:[%s5920_s28 + $0xa0] sm:$0xf]  ;;  %v5299_v44 = vld [vmem:[%s5920_s28 + $0x9c] sm:$0xf] }
 0x217   : > { %2216 = vst.msk [vmem:[#allocation2 + $0x44] sm:$0xf] %vm2198_vm12, %v2137_v20  ;;  %v3299_v20 = vrot.slane %v5362_v7, 5  ;;  %v5303_v42 = vld [vmem:[%s5920_s28 + $0xb4] sm:$0xf] }
 0x218   : > { %2215 = vst.msk [vmem:[#allocation2 + $0x40] sm:$0xf] %vm2198_vm12, %v2135_v28  ;;  %5263 = vmatmul.msk.bf16.gmra.mxu0 %vm2359_vm13, %v5204_v18  ;;  %v7118_v26 = vld [vmem:[#allocation2 + $0x50] sm:$0xf0]  ;;  %v5406_v28 = vrot.slane %v5360_v12, 9 }
 0x219   : > { %2620 = vst.msk [vmem:[#allocation2 + $0x54] sm:$0xf] %vm203_vm5, %v5298_v58  ;;  %v3304_v58 = vsel %vm6106_vm6, %v5407_v27, %v3303_v16  ;;  %v3300_v36 = vsel %vm6106_vm6, %v3298_v13, %v3299_v20  ;;  %v5305_v33 = vld [vmem:[%s5920_s28 + $0xc0] sm:$0xf] }
 0x21a   : > { %3123 = vrot.lane.b32.xlu1 %v3052_v37, %s5841_s29  ;;  %2223 = vst.msk [vmem:[#allocation2 + $0x60] sm:$0xf] %vm2198_vm12, %v2151_v35  ;;  %v3310_v35 = vrot.slane %v5367_v21, 5  ;;  %v3297_v38 = vsel %vm6106_vm6, %v5406_v28, %v3296_v5  ;;  %v5302_v5 = vld [vmem:[%s5920_s28 + $0xac] sm:$0xf]  ;;  %v5212_v21 = vor.u32 %v6980_v15, %v7034_v11 }
 0x21b   : > { %3121 = vrot.lane.b32.xlu0 %v3038_v39, %s5841_s29  ;;  %3119 = vrot.lane.b32.xlu2 %v3028_v32, %s5841_s29  ;;  %v5365_v39 = vld [vmem:[%s5920_s28 + $0x38] sm:$0x1]  ;;  %v5370_v32 = vld [vmem:[%s5920_s28 + $0x4c] sm:$0xf] }
 0x21c   : > { %v2143_v34 = vpop.permute.xlu1 %2142  ;;  %v3312_v47 = vrot.slane %v3310_v35, 4  ;;  %v5374_v11 = vld [vmem:[%s5920_s28 + $0x5c] sm:$0x1] }
 0x21d   : > { %2219 = vst.msk [vmem:[#allocation2 + $0x50] sm:$0xf] %vm2198_vm12, %v2143_v34  ;;  %v2141_v30 = vpop.permute.xlu0 %2140  ;;  %v2157_v57 = vpop.permute.xlu2 %2156  ;;  %v3306_v34 = vrot.slane %v5365_v39, 5 }
 0x21e   : > { %v5697_v54 = vld [vmem:[#allocation2 + $0x40] sm:$0xf0]  ;;  %2218 = vst.msk [vmem:[#allocation2 + $0x4c] sm:$0xf] %vm2198_vm12, %v2141_v30  ;;  %v3317_v30 = vrot.slane %v5370_v32, 5  ;;  %v3314_v53 = vsel %vm6106_vm6, %v3312_v47, %v3313_v51  ;;  %v3327_v32 = vrot.slane %v5374_v11, 5 }
 0x21f   : > { %2616 = vst.msk [vmem:[#allocation2 + $0x44] sm:$0xf] %vm203_vm5, %v5294_v45  ;;  %v5227_v59 = vld [vmem:[#allocation2 + $0x40] sm:$0xf]  ;;  %v5379_v47 = vld [vmem:[%s5920_s28 + $0x70] sm:$0xf] }
 0x220   : > { %2615 = vst.msk [vmem:[#allocation2 + $0x40] sm:$0xf] %vm203_vm5, %v5293_v46  ;;  %v5228_v52 = vor.u32 %v5697_v54, %v5227_v59  ;;  %v3305_v46 = vrot.slane %v3303_v16, 4  ;;  %v5307_v54 = vld [vmem:[%s5920_s28 + $0xcc] sm:$0xf] }
 0x221   : > { %v7144_v6 = vld [vmem:[#allocation2 + $0x60] sm:$0xf]  ;;  %2226 = vst.msk [vmem:[#allocation2 + $0x6c] sm:$0xf] %vm2198_vm12, %v2157_v57  ;;  %v3311_v57 = vsel %vm6106_vm6, %v5408_v43, %v3310_v35  ;;  %v5372_v59 = vld [vmem:[%s5920_s28 + $0x54] sm:$0xe] }
 0x222   : > { %5269 = vmatmul.msk.bf16.vlgmr.msra.gmra.mxu2 %vm2359_vm13, %v5228_v52  ;;  %3401 = vrot.lane.b32.xlu1 %v3293_v60, %s5842_s30  ;;  %2623 = vst.msk [vmem:[#allocation2 + $0x60] sm:$0xf] %vm203_vm5, %v5301_v55  ;;  %v5373_v60 = vld [vmem:[%s5920_s28 + $0x58] sm:$0xf]  ;;  %v5371_v52 = vld [vmem:[%s5920_s28 + $0x50] sm:$0x1] }
 0x223   : > { %3399 = vrot.lane.b32.xlu0 %v3290_v0, %s5842_s30  ;;  %3125 = vrot.lane.b32.xlu2 %v3062_v8, %s5841_s29  ;;  %v3307_v0 = vsel %vm6106_vm6, %v3305_v46, %v3306_v34  ;;  %v5410_v7 = vrot.slane %v5372_v59, 9  ;;  %v3324_v8 = vrot.slane %v5373_v60, 5  ;;  %v3320_v27 = vrot.slane %v5371_v52, 5  ;;  %v5376_v16 = vld [vmem:[%s5920_s28 + $0x64] sm:$0xf]  ;;  %s5797_s29 = scalar_lea.hbm %s8165_s3, 1024 }
 0x224   : > { %v7157_v17 = vld [vmem:[#allocation2 + $0x50] sm:$0xf]  ;;  %v2149_v3 = vpop.permute.xlu1 %2148  ;;  %v3331_v28 = vrot.slane %v5376_v16, 5  ;;  %v5386_v16 = vld [vmem:[%s5920_s28 + $0x8c] sm:$0x1] }
 0x225   : > { %2619 = vst.msk [vmem:[#allocation2 + $0x50] sm:$0xf] %vm203_vm5, %v5297_v9  ;;  %v5698_v22 = vld [vmem:[#allocation2 + $0x48] sm:$0xf0]  ;;  %v2147_v23 = vpop.permute.xlu0 %2146  ;;  %v2163_v18 = vpop.permute.xlu2 %2162  ;;  %v3326_v51 = vrot.slane %v3324_v8, 4  ;;  %v5236_v46 = vor.u32 %v7118_v26, %v7157_v17 }
 0x226   : > { %2618 = vst.msk [vmem:[#allocation2 + $0x4c] sm:$0xf] %vm203_vm5, %v5296_v14  ;;  %v5232_v55 = vor.u32 %v5698_v22, %v7089_v10  ;;  %v5369_v10 = vld [vmem:[%s5920_s28 + $0x48] sm:$0xe]  ;;  %v3319_v14 = vrot.slane %v3317_v30, 4 }
 0x227   : > { %2222 = vst.msk [vmem:[#allocation2 + $0x5c] sm:$0xf] %vm2198_vm12, %v2149_v3  ;;  %v5409_v20 = vrot.slane %v5369_v10, 9 }
 0x228   : > { %2221 = vst.msk [vmem:[#allocation2 + $0x58] sm:$0xf] %vm2198_vm12, %v2147_v23  ;;  %5264 = vmatmul.msk.bf16.gmra.mxu0 %vm2359_vm13, %v5208_v29  ;;  %v7173_v37 = vld [vmem:[#allocation2 + $0x68] sm:$0xf0]  ;;  %v3325_v23 = vsel %vm6106_vm6, %v5410_v7, %v3324_v8  ;;  %v3321_v29 = vsel %vm6106_vm6, %v3319_v14, %v3320_v27  ;;  %v5216_v7 = vor.u32 %v7076_v61, %v7080_v2  ;;  %v5383_v2 = vld [vmem:[%s5920_s28 + $0x80] sm:$0x1] }
 0x229   : > { %2626 = vst.msk [vmem:[#allocation2 + $0x6c] sm:$0xf] %vm203_vm5, %v5304_v31  ;;  %v5377_v31 = vld [vmem:[%s5920_s28 + $0x68] sm:$0x1]  ;;  %v3318_v15 = vsel %vm6106_vm6, %v5409_v20, %v3317_v30  ;;  %v5382_v30 = vld [vmem:[%s5920_s28 + $0x7c] sm:$0xf] }
 0x22a   : > { %3407 = vrot.lane.b32.xlu1 %v3304_v58, %s5842_s30  ;;  %2229 = vst.msk [vmem:[#allocation2 + $0x78] sm:$0xf] %vm2198_vm12, %v2163_v18  ;;  %v5375_v18 = vld [vmem:[%s5920_s28 + $0x60] sm:$0xe]  ;;  %v3333_v58 = vrot.slane %v3331_v28, 4  ;;  %v3334_v35 = vrot.slane %v5377_v31, 5 }
 0x22b   : > { %3405 = vrot.lane.b32.xlu0 %v3300_v36, %s5842_s30  ;;  %3403 = vrot.lane.b32.xlu2 %v3297_v38, %s5842_s30  ;;  %v5306_v36 = vld [vmem:[%s5920_s28 + $0xc4] sm:$0xf]  ;;  %v5411_v38 = vrot.slane %v5375_v18, 9  ;;  %v3345_v17 = vrot.slane %v5382_v30, 5  ;;  %v3348_v18 = vrot.slane %v5383_v2, 5  ;;  %v5220_v30 = vor.u32 %v7104_v24, %v7020_v62 }
 0x22c   : > { %v2155_v41 = vpop.permute.xlu1 %2154  ;;  %v5392_v24 = vld [vmem:[%s5920_s28 + $0xa4] sm:$0x1] }
 0x22d   : > { %2225 = vst.msk [vmem:[#allocation2 + $0x68] sm:$0xf] %vm2198_vm12, %v2155_v41  ;;  %v2153_v45 = vpop.permute.xlu0 %2152  ;;  %v3066_v49 = vpop.permute.xlu2 %3065  ;;  %v3332_v34 = vsel %vm6106_vm6, %v5411_v38, %v3331_v28  ;;  %v3347_v31 = vrot.slane %v3345_v17, 4  ;;  %v5389_v38 = vld [vmem:[%s5920_s28 + $0x98] sm:$0x1] }
 0x22e   : > { %v7189_v48 = vld [vmem:[#allocation2 + $0x58] sm:$0xf0]  ;;  %2224 = vst.msk [vmem:[#allocation2 + $0x64] sm:$0xf] %vm2198_vm12, %v2153_v45  ;;  %v5381_v45 = vld [vmem:[%s5920_s28 + $0x78] sm:$0xe] }
 0x22f   : > { %2622 = vst.msk [vmem:[#allocation2 + $0x5c] sm:$0xf] %vm203_vm5, %v5300_v40  ;;  %v7193_v50 = vld [vmem:[#allocation2 + $0x58] sm:$0xf]  ;;  %v5413_v26 = vrot.slane %v5381_v45, 9 }
 0x230   : > { %2621 = vst.msk [vmem:[#allocation2 + $0x58] sm:$0xf] %vm203_vm5, %v5299_v44  ;;  %v3335_v44 = vsel %vm6106_vm6, %v3333_v58, %v3334_v35  ;;  %v5240_v58 = vor.u32 %v7189_v48, %v7193_v50  ;;  %v5477_v45 = vld [vmem:[%s5920_s28 + $0x6c] sm:$0xf] }
 0x231   : > { %v7204_v63 = vld [vmem:[#allocation2 + $0x78] sm:$0xf]  ;;  %3160 = vst.msk [vmem:[#allocation2 + $0x4] sm:$0xf] %vm767_vm7, %v3066_v49  ;;  %v3338_v49 = vrot.slane %v5379_v47, 5 }
 0x232   : > { %5270 = vmatmul.msk.bf16.gmra.mxu2 %vm2359_vm13, %v5232_v55  ;;  %3413 = vrot.lane.b32.xlu1 %v3314_v53, %s5842_s30  ;;  %2629 = vst.msk [vmem:[#allocation2 + $0x78] sm:$0xf] %vm203_vm5, %v5307_v54  ;;  %v5380_v53 = vld [vmem:[%s5920_s28 + $0x74] sm:$0x1]  ;;  %v3328_v54 = vsel %vm6106_vm6, %v3326_v51, %v3327_v32  ;;  %v5378_v55 = vld [vmem:[%s5920_s28 + $0x6c] sm:$0xe] }
 0x233   : > { %3411 = vrot.lane.b32.xlu0 %v3311_v57, %s5842_s30  ;;  %3409 = vrot.lane.b32.xlu2 %v3307_v0, %s5842_s30  ;;  %v5308_v57 = vld [vmem:[%s5920_s28 + $0xd0] sm:$0xf]  ;;  %v3340_v60 = vrot.slane %v3338_v49, 4  ;;  %v3341_v52 = vrot.slane %v5380_v53, 5  ;;  %v5385_v0 = vld [vmem:[%s5920_s28 + $0x88] sm:$0xf] }
 0x234   : > { %v7217_v9 = vld [vmem:[#allocation2 + $0x68] sm:$0xf]  ;;  %v2161_v12 = vpop.permute.xlu1 %2160  ;;  %v3352_v14 = vrot.slane %v5385_v0, 5  ;;  %v5387_v47 = vld [vmem:[%s5920_s28 + $0x90] sm:$0xe] }
 0x235   : > { %2625 = vst.msk [vmem:[#allocation2 + $0x68] sm:$0xf] %vm203_vm5, %v5303_v42  ;;  %v7222_v3 = vld [vmem:[#allocation2 + $0x60] sm:$0xf0]  ;;  %v2159_v13 = vpop.permute.xlu0 %2158  ;;  %v3072_v22 = vpop.permute.xlu2 %3071  ;;  %v3342_v27 = vsel %vm6106_vm6, %v3340_v60, %v3341_v52 }
 0x236   : > { %2624 = vst.msk [vmem:[#allocation2 + $0x64] sm:$0xf] %vm203_vm5, %v5302_v5  ;;  %v5412_v5 = vrot.slane %v5378_v55, 9  ;;  %v3354_v20 = vrot.slane %v3352_v14, 4  ;;  %v3960_v55 = vshrl.u32 %v5477_v45, 16 }
 0x237   : > { %2228 = vst.msk [vmem:[#allocation2 + $0x74] sm:$0xf] %vm2198_vm12, %v2161_v12  ;;  %v3346_v12 = vsel %vm6106_vm6, %v5413_v26, %v3345_v17  ;;  %v5395_v17 = vld [vmem:[%s5920_s28 + $0xb0] sm:$0x1] }
 0x238   : > { %2227 = vst.msk [vmem:[#allocation2 + $0x70] sm:$0xf] %vm2198_vm12, %v2159_v13  ;;  %5265 = vmatmul.msk.bf16.gmra.mxu0 %vm2359_vm13, %v5212_v21  ;;  %v5384_v13 = vld [vmem:[%s5920_s28 + $0x84] sm:$0xe]  ;;  %v3339_v61 = vsel %vm6106_vm6, %v5412_v5, %v3338_v49  ;;  %v3355_v21 = vrot.slane %v5386_v16, 5  ;;  %v3376_v52 = vrot.slane %v5395_v17, 5  ;;  %v5248_v17 = vor.u32 %v7173_v37, %v7217_v9 }
 0x239   : > { %3163 = vst.msk [vmem:[#allocation2 + $0x10] sm:$0xf] %vm767_vm7, %v3072_v22  ;;  %v3962_v0 = vrot.slane %v3960_v55, 4 }
 0x23a   : > { %3419 = vrot.lane.b32.xlu1 %v3325_v23, %s5842_s30  ;;  %v5414_v23 = vrot.slane %v5384_v13, 9  ;;  %v3356_v11 = vsel %vm6106_vm6, %v3354_v20, %v3355_v21  ;;  %v5244_v20 = vor.u32 %v7222_v3, %v7144_v6  ;;  %v5453_v6 = vld [vmem:[%s5920_s28 + $0xc] sm:$0xf] }
 0x23b   : > { %3417 = vrot.lane.b32.xlu0 %v3321_v29, %s5842_s30  ;;  %3415 = vrot.lane.b32.xlu2 %v3318_v15, %s5842_s30  ;;  %v5388_v29 = vld [vmem:[%s5920_s28 + $0x94] sm:$0xf] }
 0x23c   : > { %v3064_v4 = vpop.permute.xlu1 %3063  ;;  %v3353_v35 = vsel %vm6106_vm6, %v5414_v23, %v3352_v14 }
 0x23d   : > { %3159 = vst.msk [vmem:[#allocation2] sm:$0xf] %vm767_vm7, %v3064_v4  ;;  %v2165_v39 = vpop.permute.xlu0 %2164  ;;  %v3078_v41 = vpop.permute.xlu2 %3077  ;;  %v3359_v4 = vrot.slane %v5388_v29, 5 }
 0x23e   : > { %v7247_v40 = vld [vmem:[#allocation2 + $0x70] sm:$0xf0]  ;;  %2230 = vst.msk [vmem:[#allocation2 + $0x7c] sm:$0xf] %vm2198_vm12, %v2165_v39  ;;  %v3349_v39 = vsel %vm6106_vm6, %v3347_v31, %v3348_v18  ;;  %v5526_v18 = vld [vmem:[%s5920_s28 + $0x70] sm:$0xf] }
 0x23f   : > { %2628 = vst.msk [vmem:[#allocation2 + $0x74] sm:$0xf] %vm203_vm5, %v5306_v36  ;;  %v7251_v43 = vld [vmem:[#allocation2 + $0x70] sm:$0xf]  ;;  %v5390_v36 = vld [vmem:[%s5920_s28 + $0x9c] sm:$0xe] }
 0x240   : > { %2627 = vst.msk [vmem:[#allocation2 + $0x70] sm:$0xf] %vm203_vm5, %v5305_v33  ;;  %v5391_v33 = vld [vmem:[%s5920_s28 + $0xa0] sm:$0xf]  ;;  %v5416_v48 = vrot.slane %v5390_v36, 9  ;;  %v3361_v32 = vrot.slane %v3359_v4, 4 }
 0x241   : > { %3166 = vst.msk [vmem:[#allocation2 + $0x1c] sm:$0xf] %vm767_vm7, %v3078_v41  ;;  %v3366_v50 = vrot.slane %v5391_v33, 5  ;;  %v3362_v41 = vrot.slane %v5389_v38, 5  ;;  %v4433_v33 = vrot.slane %v5526_v18, 5  ;;  %v3771_v38 = vshll.u32 %v5453_v6, 16 }
 0x242   : > { %5271 = vmatmul.msk.bf16.gmra.mxu2 %vm2359_vm13, %v5236_v46  ;;  %3425 = vrot.lane.b32.xlu1 %v3335_v44, %s5842_s30  ;;  %v5394_v44 = vld [vmem:[%s5920_s28 + $0xac] sm:$0xf] }
 0x243   : > { %3423 = vrot.lane.b32.xlu0 %v3332_v34, %s5842_s30  ;;  %3421 = vrot.lane.b32.xlu2 %v3328_v54, %s5842_s30  ;;  %v5415_v34 = vrot.slane %v5387_v47, 9  ;;  %v3367_v53 = vsel %vm6106_vm6, %v5416_v48, %v3366_v50  ;;  %v3373_v54 = vrot.slane %v5394_v44, 5  ;;  %v3363_v26 = vsel %vm6106_vm6, %v3361_v32, %v3362_v41  ;;  %v5527_v47 = vld [vmem:[%s5920_s28 + $0x74] sm:$0x1]  ;;  %v5525_v48 = vld [vmem:[%s5920_s28 + $0x6c] sm:$0xe] }
 0x244   : > { %v3070_v59 = vpop.permute.xlu1 %3069  ;;  %v3368_v14 = vrot.slane %v3366_v50, 4  ;;  %v5437_v50 = vld [vmem:[%s5920_s28 + $0x6c] sm:$0xf]  ;;  %v3773_v44 = vrot.slane %v3771_v38, 5 }
 0x245   : > { %v7273_v42 = vld [vmem:[#allocation2 + $0x78] sm:$0xf0]  ;;  %3162 = vst.msk [vmem:[#allocation2 + $0xc] sm:$0xf] %vm767_vm7, %v3070_v59  ;;  %v3068_v10 = vpop.permute.xlu0 %3067  ;;  %v3084_v8 = vpop.permute.xlu2 %3083  ;;  %v5393_v59 = vld [vmem:[%s5920_s28 + $0xa8] sm:$0xe]  ;;  %v3360_v62 = vsel %vm6106_vm6, %v5415_v34, %v3359_v4 }
 0x246   : > { %2630 = vst.msk [vmem:[#allocation2 + $0x7c] sm:$0xf] %vm203_vm5, %v5308_v57  ;;  %v3963_v57 = vshll.u32 %v5477_v45, 16  ;;  %v3375_v60 = vrot.slane %v3373_v54, 4  ;;  %v3768_v4 = vshrl.u32 %v5453_v6, 16 }
 0x247   : > { %3161 = vst.msk [vmem:[#allocation2 + $0x8] sm:$0xf] %vm767_vm7, %v3068_v10  ;;  %v5454_v34 = vld [vmem:[%s5920_s28 + $0x10] sm:$0xf] }
 0x248   : > { %5266 = vmatmul.msk.bf16.gmra.mxu0 %vm2359_vm13, %v5216_v7  ;;  %3169 = vst.msk [vmem:[#allocation2 + $0x28] sm:$0xf] %vm767_vm7, %v3084_v8  ;;  %v3965_v10 = vrot.slane %v3963_v57, 5  ;;  %v5417_v7 = vrot.slane %v5393_v59, 9  ;;  %v5478_v8 = vld [vmem:[%s5920_s28 + $0x70] sm:$0xf]  ;;  %v3377_v13 = vsel %vm6106_vm6, %v3375_v60, %v3376_v52 }
 0x249   : > { %v3969_v2 = vshll.u32 %v5478_v8, 16  ;;  %v3770_v41 = vrot.slane %v3768_v4, 4  ;;  %v7386_v60 = vld [vmem:[%s8164_s2] ss:$0 sm:$0xff] }
 0x24a   : > { %3431 = vrot.lane.b32.xlu1 %v3346_v12, %s5842_s30  ;;  %v3374_v21 = vsel %vm6106_vm6, %v5417_v7, %v3373_v54 }
 0x24b   : > { %3429 = vrot.lane.b32.xlu0 %v3342_v27, %s5842_s30  ;;  %3427 = vrot.lane.b32.xlu2 %v3339_v61, %s5842_s30  ;;  %v3369_v27 = vrot.slane %v5392_v24, 5  ;;  %v3966_v61 = vor.u32 %v3965_v10, %v3962_v0  ;;  %v3971_v29 = vrot.slane %v3969_v2, 5  ;;  %v3774_v57 = vor.u32 %v3773_v44, %v3770_v41  ;;  %v5502_v0 = vld [vmem:[%s5920_s28 + $0x10] sm:$0xf]  ;;  %v5480_v10 = vld [vmem:[%s5920_s28 + $0x78] sm:$0xf] }
 0x24c   : > { %v3076_v22 = vpop.permute.xlu1 %3075  ;;  %v3987_v2 = vshll.u32 %v5480_v10, 16 }
 0x24d   : > { %3165 = vst.msk [vmem:[#allocation2 + $0x18] sm:$0xf] %vm767_vm7, %v3076_v22  ;;  %v3074_v28 = vpop.permute.xlu0 %3073  ;;  %v3090_v15 = vpop.permute.xlu2 %3089  ;;  %v3973_v22 = vshrl.u32 %v5478_v8, 16  ;;  %v3370_v23 = vsel %vm6106_vm6, %v3368_v14, %v3369_v27  ;;  %v3775_v37 = vrot.slane %v3774_v57, 4  ;;  %v5455_v27 = vld [vmem:[%s5920_s28 + $0x14] sm:$0x1] }
 0x24e   : > { %3164 = vst.msk [vmem:[#allocation2 + $0x14] sm:$0xf] %vm767_vm7, %v3074_v28  ;;  %v3967_v28 = vrot.slane %v3966_v61, 4  ;;  %v3984_v61 = vshrl.u32 %v5480_v10, 16  ;;  %v5482_v57 = vld [vmem:[%s5920_s28 + $0x80] sm:$0x1] }
 0x24f   : > { %3172 = vst.msk [vmem:[#allocation2 + $0x34] sm:$0xf] %vm767_vm7, %v3090_v15  ;;  %v3975_v15 = vrot.slane %v3973_v22, 4  ;;  %v5503_v22 = vld [vmem:[%s5920_s28 + $0x14] sm:$0x1] }
 0x250   : > { %v3972_v36 = vsel %vm5931_vm2, %v3967_v28, %v3971_v29  ;;  %v5421_v28 = vld [vmem:[%s5920_s28 + $0xc] sm:$0xf]  ;;  %v4380_v6 = vrot.slane %v5503_v22, 5 }
 0x252   : > { %5272 = vmatmul.msk.bf16.gmra.mxu2 %vm2359_vm13, %v5240_v58  ;;  %3437 = vrot.lane.b32.xlu1 %v3356_v11, %s5842_s30  ;;  %v5224_v11 = vor.u32 %v7056_v56, %v7099_v19  ;;  %v4435_v56 = vrot.slane %v4433_v33, 4  ;;  %v4436_v19 = vrot.slane %v5527_v47, 5 }
 0x253   : > { %3435 = vrot.lane.b32.xlu0 %v3353_v35, %s5842_s30  ;;  %3433 = vrot.lane.b32.xlu2 %v3349_v39, %s5842_s30  ;;  %v5479_v35 = vld [vmem:[%s5920_s28 + $0x74] sm:$0x1]  ;;  %v5438_v39 = vld [vmem:[%s5920_s28 + $0x70] sm:$0xf] }
 0x254   : > { %v3082_v51 = vpop.permute.xlu1 %3081  ;;  %v3979_v32 = vshll.u32 %v5479_v35, 16  ;;  %v4437_v55 = vsel %vm6106_vm6, %v4435_v56, %v4436_v19  ;;  %v5481_v35 = vld [vmem:[%s5920_s28 + $0x7c] sm:$0xf]  ;;  %v5252_v56 = vor.u32 %v7247_v40, %v7251_v43  ;;  %v5456_v43 = vld [vmem:[%s5920_s28 + $0x18] sm:$0xf] }
 0x255   : > { %3168 = vst.msk [vmem:[#allocation2 + $0x24] sm:$0xf] %vm767_vm7, %v3082_v51  ;;  %v3080_v46 = vpop.permute.xlu0 %3079  ;;  %v3096_v49 = vpop.permute.xlu2 %3095  ;;  %v3976_v51 = vor.u32 %v3975_v15, %v3971_v29  ;;  %v3989_v15 = vrot.slane %v3987_v2, 5  ;;  %v3997_v41 = vshrl.u32 %v5481_v35, 16  ;;  %v5529_v40 = vld [vmem:[%s5920_s28 + $0x7c] sm:$0xf] }
 0x256   : > { %3167 = vst.msk [vmem:[#allocation2 + $0x20] sm:$0xf] %vm767_vm7, %v3080_v46  ;;  %v5557_v46 = vrot.slane %v5525_v48, 9 }
 0x257   : > { %3175 = vst.msk [vmem:[#allocation2 + $0x40] sm:$0xf] %vm767_vm7, %v3096_v49  ;;  %v3977_v49 = vrot.slane %v3976_v51, 4  ;;  %v3993_v51 = vshll.u32 %v5481_v35, 16 }
 0x258   : > { %5267 = vmatmul.msk.bf16.gmra.mxu0 %vm2359_vm13, %v5220_v30  ;;  %v4434_v59 = vsel %vm6106_vm6, %v5557_v46, %v4433_v33 }
 0x259   : > { %v3995_v46 = vrot.slane %v3993_v51, 5  ;;  %v5458_v51 = vld [vmem:[%s5920_s28 + $0x20] sm:$0x1] }
 0x25a   : > { %3443 = vrot.lane.b32.xlu1 %v3367_v53, %s5842_s30  ;;  %v3981_v53 = vrot.slane %v3979_v32, 5 }
 0x25b   : > { %3441 = vrot.lane.b32.xlu0 %v3363_v26, %s5842_s30  ;;  %3439 = vrot.lane.b32.xlu2 %v3360_v62, %s5842_s30  ;;  %v3777_v26 = vshll.u32 %v5454_v34, 16  ;;  %v3781_v62 = vshrl.u32 %v5454_v34, 16 }
 0x25c   : > { %v3088_v5 = vpop.permute.xlu1 %3087  ;;  %v3982_v24 = vsel %vm5931_vm2, %v3977_v49, %v3981_v53  ;;  %v3999_v53 = vrot.slane %v3997_v41, 4  ;;  %v5424_v41 = vld [vmem:[%s5920_s28 + $0x1c] sm:$0xf] }
 0x25d   : > { %3171 = vst.msk [vmem:[#allocation2 + $0x30] sm:$0xf] %vm767_vm7, %v3088_v5  ;;  %v3086_v12 = vpop.permute.xlu0 %3085  ;;  %v3102_v16 = vpop.permute.xlu2 %3101  ;;  %v3779_v9 = vrot.slane %v3777_v26, 5  ;;  %v3783_v8 = vrot.slane %v3781_v62, 4  ;;  %v3795_v62 = vshll.u32 %v5456_v43, 16 }
 0x25e   : > { %3170 = vst.msk [vmem:[#allocation2 + $0x2c] sm:$0xf] %vm767_vm7, %v3086_v12  ;;  %v4000_v10 = vor.u32 %v3999_v53, %v3995_v46 }
 0x25f   : > { %3178 = vst.msk [vmem:[#allocation2 + $0x4c] sm:$0xf] %vm767_vm7, %v3102_v16  ;;  %v3780_v16 = vsel %vm5931_vm2, %v3775_v37, %v3779_v9  ;;  %v3784_v29 = vor.u32 %v3783_v8, %v3779_v9  ;;  %v5440_v37 = vld [vmem:[%s5920_s28 + $0x7c] sm:$0xf]  ;;  %v5530_v9 = vld [vmem:[%s5920_s28 + $0x80] sm:$0x1] }
 0x260   : > { %v4443_v8 = vrot.slane %v5530_v9, 5 }
 0x261   : > { %v3785_v4 = vrot.slane %v3784_v29, 4 }
 0x262   : > { %5273 = vmatmul.msk.bf16.gmra.mxu2 %vm2359_vm13, %v5244_v20  ;;  %3449 = vrot.lane.b32.xlu1 %v3377_v13, %s5842_s30  ;;  %v4377_v13 = vrot.slane %v5502_v0, 5  ;;  %v5439_v0 = vld [vmem:[%s5920_s28 + $0x78] sm:$0xf] }
 0x263   : > { %3447 = vrot.lane.b32.xlu0 %v3374_v21, %s5842_s30  ;;  %3445 = vrot.lane.b32.xlu2 %v3370_v23, %s5842_s30  ;;  %v5422_v21 = vld [vmem:[%s5920_s28 + $0x10] sm:$0xf]  ;;  %v5501_v23 = vld [vmem:[%s5920_s28 + $0xc] sm:$0xe] }
 0x264   : > { %v3094_v31 = vpop.permute.xlu1 %3093  ;;  %v4379_v18 = vrot.slane %v4377_v13, 4 }
 0x265   : > { %3174 = vst.msk [vmem:[#allocation2 + $0x3c] sm:$0xf] %vm767_vm7, %v3094_v31  ;;  %v3092_v3 = vpop.permute.xlu0 %3091  ;;  %v3108_v58 = vpop.permute.xlu2 %3107  ;;  %v3787_v31 = vshll.u32 %v5455_v27, 16 }
 0x266   : > { %3173 = vst.msk [vmem:[#allocation2 + $0x38] sm:$0xf] %vm767_vm7, %v3092_v3  ;;  %v3986_v3 = vrot.slane %v3984_v61, 4  ;;  %v4381_v48 = vsel %vm6106_vm6, %v4379_v18, %v4380_v6  ;;  %v5256_v6 = vor.u32 %v7273_v42, %v7204_v63  ;;  %v5505_v42 = vld [vmem:[%s5920_s28 + $0x1c] sm:$0xf] }
 0x267   : > { %3181 = vst.msk [vmem:[#allocation2 + $0x58] sm:$0xf] %vm767_vm7, %v3108_v58  ;;  %v5549_v58 = vrot.slane %v5501_v23, 9  ;;  %v3789_v38 = vrot.slane %v3787_v31, 5 }
 0x268   : > { %5268 = vmatmul.msk.bf16.gmra.mxu0 %vm2359_vm13, %v5224_v11 }
 0x269   : > { %v4378_v19 = vsel %vm6106_vm6, %v5549_v58, %v4377_v13  ;;  %v3790_v44 = vsel %vm5931_vm2, %v3785_v4, %v3789_v38  ;;  %v5457_v13 = vld [vmem:[%s5920_s28 + $0x1c] sm:$0xf] }
 0x26a   : > { %4183 = vrot.lane.b32.xlu1 %v3972_v36, %s5844_s5  ;;  %v3801_v31 = vshll.u32 %v5457_v13, 16 }
 0x26b   : > { %3625 = vrot.lane.b32.xlu0 %v5438_v39, %s5843_s4  ;;  %3623 = vrot.lane.b32.xlu2 %v5437_v50, %s5843_s4  ;;  %v3990_v50 = vor.u32 %v3989_v15, %v3986_v3  ;;  %v3805_v15 = vshrl.u32 %v5457_v13, 16  ;;  %v5459_v13 = vld [vmem:[%s5920_s28 + $0x24] sm:$0xf] }
 0x26c   : > { %v3100_v45 = vpop.permute.xlu1 %3099  ;;  %v3803_v35 = vrot.slane %v3801_v31, 5 }
 0x26d   : > { %3177 = vst.msk [vmem:[#allocation2 + $0x48] sm:$0xf] %vm767_vm7, %v3100_v45  ;;  %v3098_v30 = vpop.permute.xlu0 %3097  ;;  %v3114_v54 = vpop.permute.xlu2 %3113  ;;  %v3991_v45 = vrot.slane %v3990_v50, 4  ;;  %v3807_v38 = vrot.slane %v3805_v15, 4 }
 0x26e   : > { %3176 = vst.msk [vmem:[#allocation2 + $0x44] sm:$0xf] %vm767_vm7, %v3098_v30 }
 0x26f   : > { %3184 = vst.msk [vmem:[#allocation2 + $0x64] sm:$0xf] %vm767_vm7, %v3114_v54  ;;  %v3996_v26 = vsel %vm5931_vm2, %v3991_v45, %v3995_v46  ;;  %v5504_v45 = vld [vmem:[%s5920_s28 + $0x18] sm:$0xe] }
 0x270   : > { %v5423_v46 = vld [vmem:[%s5920_s28 + $0x18] sm:$0xf] }
 0x272   : > { %5274 = vmatmul.msk.bf16.gmra.mxu2 %vm2359_vm13, %v5248_v17  ;;  %4521 = vrot.lane.b32.xlu1 %v4437_v55, %s5845_s6  ;;  %v4440_v17 = vrot.slane %v5529_v40, 5  ;;  %v3811_v40 = vshll.u32 %v5458_v51, 16  ;;  %v5460_v51 = vld [vmem:[%s5920_s28 + $0x28] sm:$0xf] }
 0x273   : > { %4519 = vrot.lane.b32.xlu0 %v4434_v59, %s5845_s6  ;;  %4185 = vrot.lane.b32.xlu2 %v3982_v24, %s5844_s5  ;;  %v3792_v59 = vshrl.u32 %v5456_v43, 16 }
 0x274   : > { %v3106_v52 = vpop.permute.xlu1 %3105 }
 0x275   : > { %3180 = vst.msk [vmem:[#allocation2 + $0x54] sm:$0xf] %vm767_vm7, %v3106_v52  ;;  %v3104_v5 = vpop.permute.xlu0 %3103  ;;  %v2421_v7 = vpop.f32.mrf.mxu0  ;;  %v5528_v52 = vld [vmem:[%s5920_s28 + $0x78] sm:$0xe] }
 0x276   : > { %3179 = vst.msk [vmem:[#allocation2 + $0x50] sm:$0xf] %vm767_vm7, %v3104_v5  ;;  %v2422_v12 = vadd.f32 %v7386_v60, %v2421_v7  ;;  %v3120_v14 = vpop.permute.xlu2 %3119  ;;  %v4003_v5 = vshll.u32 %v5482_v57, 16  ;;  %v4442_v7 = vrot.slane %v4440_v17, 4  ;;  %v5550_v57 = vrot.slane %v5504_v45, 9 }
 0x277   : > { %3187 = vst.msk [vmem:[#allocation2 + $0x70] sm:$0xf] %vm767_vm7, %v3120_v14  ;;  %v3797_v14 = vrot.slane %v3795_v62, 5  ;;  %v3813_v62 = vrot.slane %v3811_v40, 5 }
 0x278   : > { %v2501_v20 = vmax.f32 %v2422_v12, 0.0  ;;  %v3794_v12 = vrot.slane %v3792_v59, 4 }
 0x27a   : > { %2534 = vst.msk [vmem:[%s7405_s24] sm:$0xff] %vm2533_vm14, %v2501_v20  ;;  %4151 = vrot.lane.b32.xlu1 %v3780_v16, %s5844_s5  ;;  %v5558_v16 = vrot.slane %v5528_v52, 9  ;;  %v4001_v20 = vrot.slane %v4000_v10, 4  ;;  %v3798_v29 = vor.u32 %v3797_v14, %v3794_v12 }
 0x27b   : > { %3593 = vrot.lane.b32.xlu0 %v5422_v21, %s5843_s4  ;;  %3591 = vrot.lane.b32.xlu2 %v5421_v28, %s5843_s4  ;;  %v4005_v21 = vrot.slane %v4003_v5, 5  ;;  %v4444_v28 = vsel %vm6106_vm6, %v4442_v7, %v4443_v8 }
 0x27c   : > { %v3112_v11 = vpop.permute.xlu1 %3111  ;;  %v4441_v3 = vsel %vm6106_vm6, %v5558_v16, %v4440_v17  ;;  %v3799_v58 = vrot.slane %v3798_v29, 4  ;;  %v5532_v16 = vld [vmem:[%s5920_s28 + $0x88] sm:$0xf]  ;;  %v5485_v29 = vld [vmem:[%s5920_s28 + $0x8c] sm:$0x1] }
 0x27d   : > { %3183 = vst.msk [vmem:[#allocation2 + $0x60] sm:$0xf] %vm767_vm7, %v3112_v11  ;;  %v3110_v36 = vpop.permute.xlu0 %3109  ;;  %v2423_v33 = vpop.f32.mrf.mxu0  ;;  %v4006_v11 = vsel %vm5931_vm2, %v4001_v20, %v4005_v21 }
 0x27e   : > { %3182 = vst.msk [vmem:[#allocation2 + $0x5c] sm:$0xf] %vm767_vm7, %v3110_v36  ;;  %v2424_v39 = vadd.f32 %v7386_v60, %v2423_v33  ;;  %v3126_v47 = vpop.permute.xlu2 %3125  ;;  %v5483_v36 = vld [vmem:[%s5920_s28 + $0x84] sm:$0xf] }
 0x27f   : > { %3190 = vst.msk [vmem:[#allocation2 + $0x7c] sm:$0xf] %vm767_vm7, %v3126_v47  ;;  %v4011_v50 = vshll.u32 %v5483_v36, 16 }
 0x280   : > { %v2502_v32 = vmax.f32 %v2424_v39, 0.0 }
 0x282   : > { %2535 = vst.msk [vmem:[%s7405_s24 + $0x8] sm:$0xff] %vm2533_vm14, %v2502_v32  ;;  %5275 = vmatmul.msk.bf16.gmra.mxu2 %vm2359_vm13, %v5252_v56  ;;  %4489 = vrot.lane.b32.xlu1 %v4381_v48, %s5845_s6  ;;  %v4008_v48 = vshrl.u32 %v5483_v36, 16  ;;  %v3804_v32 = vsel %vm5931_vm2, %v3799_v58, %v3803_v35  ;;  %v4384_v56 = vrot.slane %v5505_v42, 5  ;;  %v5533_v58 = vld [vmem:[%s5920_s28 + $0x8c] sm:$0x1] }
 0x283   : > { %4487 = vrot.lane.b32.xlu0 %v4378_v19, %s5845_s6  ;;  %4153 = vrot.lane.b32.xlu2 %v3790_v44, %s5844_s5  ;;  %v5506_v44 = vld [vmem:[%s5920_s28 + $0x20] sm:$0x1]  ;;  %v5531_v36 = vld [vmem:[%s5920_s28 + $0x84] sm:$0xe] }
 0x284   : > { %v3118_v34 = vpop.permute.xlu1 %3117  ;;  %v4010_v43 = vrot.slane %v4008_v48, 4  ;;  %v4387_v53 = vrot.slane %v5506_v44, 5  ;;  %v4385_v5 = vsel %vm6106_vm6, %v5550_v57, %v4384_v56 }
 0x285   : > { %3186 = vst.msk [vmem:[#allocation2 + $0x6c] sm:$0xf] %vm767_vm7, %v3118_v34  ;;  %v3116_v30 = vpop.permute.xlu0 %3115  ;;  %v2426_v49 = vpop.f32.mrf.mxu0  ;;  %v3808_v34 = vor.u32 %v3807_v38, %v3803_v35  ;;  %v4450_v38 = vrot.slane %v5533_v58, 5 }
 0x286   : > { %3185 = vst.msk [vmem:[#allocation2 + $0x68] sm:$0xf] %vm767_vm7, %v3116_v30  ;;  %v2427_v54 = vadd.f32 %v7386_v60, %v2426_v49  ;;  %v3404_v55 = vpop.permute.xlu2 %3403  ;;  %v4013_v30 = vrot.slane %v4011_v50, 5  ;;  %v4386_v49 = vrot.slane %v4384_v56, 4  ;;  %v5559_v50 = vrot.slane %v5531_v36, 9 }
 0x287   : > { %3497 = vst.msk [vmem:[#allocation2 + $0x8] sm:$0xf] %vm1107_vm8, %v3404_v55  ;;  %v3809_v59 = vrot.slane %v3808_v34, 4 }
 0x288   : > { %v2503_v24 = vmax.f32 %v2427_v54, 0.0  ;;  %v5484_v54 = vld [vmem:[%s5920_s28 + $0x88] sm:$0xf] }
 0x289   : > { %v4017_v9 = vshll.u32 %v5484_v54, 16  ;;  %v4021_v7 = vshrl.u32 %v5484_v54, 16  ;;  %v3814_v8 = vsel %vm5931_vm2, %v3809_v59, %v3813_v62  ;;  %v5486_v59 = vld [vmem:[%s5920_s28 + $0x90] sm:$0xf] }
 0x28a   : > { %2536 = vst.msk [vmem:[%s7405_s24 + $0x20] sm:$0xff] %vm2533_vm14, %v2503_v24  ;;  %4187 = vrot.lane.b32.xlu1 %v3996_v26, %s5844_s5 }
 0x28b   : > { %3629 = vrot.lane.b32.xlu0 %v5440_v37, %s5843_s4  ;;  %3627 = vrot.lane.b32.xlu2 %v5439_v0, %s5843_s4  ;;  %v4014_v37 = vor.u32 %v4013_v30, %v4010_v43  ;;  %v4388_v0 = vsel %vm6106_vm6, %v4386_v49, %v4387_v53  ;;  %v4019_v14 = vrot.slane %v4017_v9, 5  ;;  %v4023_v20 = vrot.slane %v4021_v7, 4 }
 0x28c   : > { %v3124_v27 = vpop.permute.xlu1 %3123  ;;  %v3825_v30 = vshll.u32 %v5460_v51, 16  ;;  %v4032_v7 = vshrl.u32 %v5486_v59, 16 }
 0x28d   : > { %3189 = vst.msk [vmem:[#allocation2 + $0x78] sm:$0xf] %vm767_vm7, %v3124_v27  ;;  %v3122_v61 = vpop.permute.xlu0 %3121  ;;  %v2428_v2 = vpop.f32.mrf.mxu0  ;;  %v4015_v12 = vrot.slane %v4014_v37, 4  ;;  %v4024_v42 = vor.u32 %v4023_v20, %v4019_v14 }
 0x28e   : > { %3188 = vst.msk [vmem:[#allocation2 + $0x74] sm:$0xf] %vm767_vm7, %v3122_v61  ;;  %v2429_v22 = vadd.f32 %v7386_v60, %v2428_v2  ;;  %v3410_v23 = vpop.permute.xlu2 %3409 }
 0x28f   : > { %3500 = vst.msk [vmem:[#allocation2 + $0x14] sm:$0xf] %vm1107_vm8, %v3410_v23  ;;  %v4020_v23 = vsel %vm5931_vm2, %v4015_v12, %v4019_v14  ;;  %v5461_v12 = vld [vmem:[%s5920_s28 + $0x2c] sm:$0x1] }
 0x290   : > { %v2504_v18 = vmax.f32 %v2429_v22, 0.0 }
 0x292   : > { %2537 = vst.msk [vmem:[%s7405_s24 + $0x28] sm:$0xff] %vm2533_vm14, %v2504_v18  ;;  %5276 = vmatmul.msk.bf16.gmra.mxu2 %vm2359_vm13, %v5256_v6  ;;  %4525 = vrot.lane.b32.xlu1 %v4444_v28, %s5845_s6  ;;  %v4447_v18 = vrot.slane %v5532_v16, 5  ;;  %v3816_v6 = vshrl.u32 %v5459_v13, 16 }
 0x293   : > { %4523 = vrot.lane.b32.xlu0 %v4441_v3, %s5845_s6  ;;  %4189 = vrot.lane.b32.xlu2 %v4006_v11, %s5844_s5  ;;  %v3819_v3 = vshll.u32 %v5459_v13, 16  ;;  %v5442_v11 = vld [vmem:[%s5920_s28 + $0x88] sm:$0xf] }
 0x294   : > { %v3402_v63 = vpop.permute.xlu1 %3401  ;;  %v4448_v53 = vsel %vm6106_vm6, %v5559_v50, %v4447_v18 }
 0x295   : > { %3496 = vst.msk [vmem:[#allocation2 + $0x4] sm:$0xf] %vm1107_vm8, %v3402_v63  ;;  %v3400_v33 = vpop.permute.xlu0 %3399  ;;  %v2431_v4 = vpop.f32.mrf.mxu0  ;;  %v5441_v63 = vld [vmem:[%s5920_s28 + $0x84] sm:$0xf] }
 0x296   : > { %3495 = vst.msk [vmem:[#allocation2] sm:$0xf] %vm1107_vm8, %v3400_v33  ;;  %v2432_v39 = vadd.f32 %v7386_v60, %v2431_v4  ;;  %v3416_v47 = vpop.permute.xlu2 %3415  ;;  %v4027_v33 = vshll.u32 %v5485_v29, 16  ;;  %v4449_v4 = vrot.slane %v4447_v18, 4  ;;  %v4034_v29 = vrot.slane %v4032_v7, 4 }
 0x297   : > { %3503 = vst.msk [vmem:[#allocation2 + $0x20] sm:$0xf] %vm1107_vm8, %v3416_v47  ;;  %v3821_v47 = vrot.slane %v3819_v3, 5  ;;  %v5487_v3 = vld [vmem:[%s5920_s28 + $0x94] sm:$0xf] }
 0x298   : > { %v2505_v19 = vmax.f32 %v2432_v39, 0.0  ;;  %v3818_v39 = vrot.slane %v3816_v6, 4  ;;  %v4451_v40 = vsel %vm6106_vm6, %v4449_v4, %v4450_v38  ;;  %v4041_v38 = vshll.u32 %v5487_v3, 16 }
 0x29a   : > { %2538 = vst.msk [vmem:[%s7405_s24 + $0x40] sm:$0xff] %vm2533_vm14, %v2505_v19  ;;  %4155 = vrot.lane.b32.xlu1 %v3804_v32, %s5844_s5  ;;  %v4025_v19 = vrot.slane %v4024_v42, 4  ;;  %v3822_v43 = vor.u32 %v3821_v47, %v3818_v39 }
 0x29b   : > { %3597 = vrot.lane.b32.xlu0 %v5424_v41, %s5843_s4  ;;  %3595 = vrot.lane.b32.xlu2 %v5423_v46, %s5843_s4  ;;  %v4029_v41 = vrot.slane %v4027_v33, 5 }
 0x29c   : > { %v3408_v55 = vpop.permute.xlu1 %3407 }
 0x29d   : > { %3499 = vst.msk [vmem:[#allocation2 + $0x10] sm:$0xf] %vm1107_vm8, %v3408_v55  ;;  %v3406_v26 = vpop.permute.xlu0 %3405  ;;  %v2433_v17 = vpop.f32.mrf.mxu0  ;;  %v3829_v55 = vshrl.u32 %v5460_v51, 16  ;;  %v4030_v57 = vsel %vm5931_vm2, %v4025_v19, %v4029_v41 }
 0x29e   : > { %3498 = vst.msk [vmem:[#allocation2 + $0xc] sm:$0xf] %vm1107_vm8, %v3406_v26  ;;  %v2434_v24 = vadd.f32 %v7386_v60, %v2433_v17  ;;  %v3422_v52 = vpop.permute.xlu2 %3421  ;;  %v3823_v26 = vrot.slane %v3822_v43, 4  ;;  %v3827_v17 = vrot.slane %v3825_v30, 5 }
 0x29f   : > { %3506 = vst.msk [vmem:[#allocation2 + $0x2c] sm:$0xf] %vm1107_vm8, %v3422_v52  ;;  %v3831_v52 = vrot.slane %v3829_v55, 4 }
 0x2a0   : > { %v2506_v10 = vmax.f32 %v2434_v24, 0.0  ;;  %v5508_v24 = vld [vmem:[%s5920_s28 + $0x28] sm:$0xf] }
 0x2a1   : > { %v4391_v16 = vrot.slane %v5508_v24, 5  ;;  %v5444_v24 = vld [vmem:[%s5920_s28 + $0x94] sm:$0xf] }
 0x2a2   : > { %2539 = vst.msk [vmem:[%s7405_s24 + $0x48] sm:$0xff] %vm2533_vm14, %v2506_v10  ;;  %4493 = vrot.lane.b32.xlu1 %v4388_v0, %s5845_s6 }
 0x2a3   : > { %4491 = vrot.lane.b32.xlu0 %v4385_v5, %s5845_s6  ;;  %4157 = vrot.lane.b32.xlu2 %v3814_v8, %s5844_s5  ;;  %v4035_v8 = vshll.u32 %v5486_v59, 16  ;;  %v4393_v18 = vrot.slane %v4391_v16, 4  ;;  %v5488_v59 = vld [vmem:[%s5920_s28 + $0x98] sm:$0x1] }
 0x2a4   : > { %v3414_v27 = vpop.permute.xlu1 %3413 }
 0x2a5   : > { %v2461_v61 = vpop.f32.mrf.mxu2  ;;  %3502 = vst.msk [vmem:[#allocation2 + $0x1c] sm:$0xf] %vm1107_vm8, %v3414_v27  ;;  %v3412_v2 = vpop.permute.xlu0 %3411  ;;  %v3828_v27 = vsel %vm5931_vm2, %v3823_v26, %v3827_v17 }
 0x2a6   : > { %v2462_v21 = vadd.f32 %v7386_v60, %v2461_v61  ;;  %3501 = vst.msk [vmem:[#allocation2 + $0x18] sm:$0xf] %vm1107_vm8, %v3412_v2  ;;  %v2436_v22 = vpop.f32.mrf.mxu0  ;;  %v3428_v28 = vpop.permute.xlu2 %3427  ;;  %v5426_v61 = vld [vmem:[%s5920_s28 + $0x28] sm:$0xf]  ;;  %v5509_v2 = vld [vmem:[%s5920_s28 + $0x2c] sm:$0x1] }
 0x2a7   : > { %v2437_v31 = vadd.f32 %v7386_v60, %v2436_v22  ;;  %3509 = vst.msk [vmem:[#allocation2 + $0x38] sm:$0xf] %vm1107_vm8, %v3428_v28  ;;  %v5425_v22 = vld [vmem:[%s5920_s28 + $0x24] sm:$0xf]  ;;  %v3835_v28 = vshll.u32 %v5461_v12, 16  ;;  %v4394_v6 = vrot.slane %v5509_v2, 5 }
 0x2a8   : > { %v2517_v15 = vmax.f32 %v2462_v21, 0.0  ;;  %v5507_v21 = vld [vmem:[%s5920_s28 + $0x24] sm:$0xe] }
 0x2a9   : > { %v2507_v35 = vmax.f32 %v2437_v31, 0.0  ;;  %v4037_v31 = vrot.slane %v4035_v8, 5  ;;  %v5443_v8 = vld [vmem:[%s5920_s28 + $0x90] sm:$0xf] }
 0x2aa   : > { %2550 = vst.msk [vmem:[%s7405_s24 + $0x100] sm:$0xff] %vm2533_vm14, %v2517_v15  ;;  %4191 = vrot.lane.b32.xlu1 %v4020_v23, %s5844_s5  ;;  %v3832_v23 = vor.u32 %v3831_v52, %v3827_v17 }
 0x2ab   : > { %2540 = vst.msk [vmem:[%s7405_s24 + $0x60] sm:$0xff] %vm2533_vm14, %v2507_v35  ;;  %3633 = vrot.lane.b32.xlu0 %v5442_v11, %s5843_s4  ;;  %3631 = vrot.lane.b32.xlu2 %v5441_v63, %s5843_s4  ;;  %v5551_v11 = vrot.slane %v5507_v21, 9  ;;  %v3837_v63 = vrot.slane %v3835_v28, 5  ;;  %v4038_v4 = vor.u32 %v4037_v31, %v4034_v29 }
 0x2ac   : > { %v3420_v48 = vpop.permute.xlu1 %3419  ;;  %v3833_v36 = vrot.slane %v3832_v23, 4  ;;  %v5722_v23 = vld [vmem:[%s8163_s1 + $0xc] sm:$0xff] }
 0x2ad   : > { %v2463_v32 = vpop.f32.mrf.mxu2  ;;  %3505 = vst.msk [vmem:[#allocation2 + $0x28] sm:$0xf] %vm1107_vm8, %v3420_v48  ;;  %v3418_v56 = vpop.permute.xlu0 %3417  ;;  %v4395_v48 = vsel %vm6106_vm6, %v4393_v18, %v4394_v6  ;;  %v4392_v51 = vsel %vm6106_vm6, %v5551_v11, %v4391_v16  ;;  %v4039_v41 = vrot.slane %v4038_v4, 4 }
 0x2ae   : > { %v2464_v44 = vadd.f32 %v7386_v60, %v2463_v32  ;;  %3504 = vst.msk [vmem:[#allocation2 + $0x24] sm:$0xf] %vm1107_vm8, %v3418_v56  ;;  %v2438_v45 = vpop.f32.mrf.mxu0  ;;  %v3434_v46 = vpop.permute.xlu2 %3433  ;;  %v4045_v56 = vshrl.u32 %v5487_v3, 16  ;;  %v3838_v19 = vsel %vm5931_vm2, %v3833_v36, %v3837_v63 }
 0x2af   : > { %v2439_v34 = vadd.f32 %v7386_v60, %v2438_v45  ;;  %3512 = vst.msk [vmem:[#allocation2 + $0x44] sm:$0xf] %vm1107_vm8, %v3434_v46  ;;  %v7582_v45 = vld [vmem:[%s5920_s28 + $0x94] sm:$0xf] }
 0x2b0   : > { %v2518_v49 = vmax.f32 %v2464_v44, 0.0  ;;  %v4043_v44 = vrot.slane %v4041_v38, 5  ;;  %v4454_v26 = vrot.slane %v7582_v45, 5 }
 0x2b1   : > { %v2508_v54 = vmax.f32 %v2439_v34, 0.0  ;;  %v5462_v34 = vld [vmem:[%s5920_s28 + $0x30] sm:$0xf] }
 0x2b2   : > { %2551 = vst.msk [vmem:[%s7405_s24 + $0x108] sm:$0xff] %vm2533_vm14, %v2518_v49  ;;  %4529 = vrot.lane.b32.xlu1 %v4451_v40, %s5845_s6  ;;  %v5567_v40 = vld [vmem:[%s8163_s1 + $0x14] sm:$0xf]  ;;  %v4047_v49 = vrot.slane %v4045_v56, 4  ;;  %v4456_v16 = vrot.slane %v4454_v26, 4 }
 0x2b3   : > { %2541 = vst.msk [vmem:[%s7405_s24 + $0x68] sm:$0xff] %vm2533_vm14, %v2508_v54  ;;  %4527 = vrot.lane.b32.xlu0 %v4448_v53, %s5845_s6  ;;  %4193 = vrot.lane.b32.xlu2 %v4030_v57, %s5844_s5  ;;  %v4740_v53 = vunpack.c.l.b16 %v5567_v40  ;;  %v4044_v57 = vsel %vm5931_vm2, %v4039_v41, %v4043_v44  ;;  %v5464_v40 = vld [vmem:[%s5920_s28 + $0x38] sm:$0x1] }
 0x2b4   : > { %v3426_v62 = vpop.permute.xlu1 %3425  ;;  %v4048_v12 = vor.u32 %v4047_v49, %v4043_v44 }
 0x2b5   : > { %v2466_v37 = vpop.f32.mrf.mxu2  ;;  %3508 = vst.msk [vmem:[#allocation2 + $0x34] sm:$0xf] %vm1107_vm8, %v3426_v62  ;;  %v3424_v9 = vpop.permute.xlu0 %3423  ;;  %v4742_v52 = vpack.c.b16 %v4740_v53, %v4740_v53 }
 0x2b6   : > { %v2467_v0 = vadd.f32 %v7386_v60, %v2466_v37  ;;  %3507 = vst.msk [vmem:[#allocation2 + $0x30] sm:$0xf] %vm1107_vm8, %v3424_v9  ;;  %v2441_v10 = vpop.f32.mrf.mxu0  ;;  %v3440_v5 = vpop.permute.xlu2 %3439  ;;  %v3840_v37 = vshrl.u32 %v5462_v34, 16  ;;  %v3843_v9 = vshll.u32 %v5462_v34, 16  ;;  %v4049_v31 = vrot.slane %v4048_v12, 4 }
 0x2b7   : > { %v2442_v14 = vadd.f32 %v7386_v60, %v2441_v10  ;;  %3515 = vst.msk [vmem:[#allocation2 + $0x50] sm:$0xf] %vm1107_vm8, %v3440_v5  ;;  %v5536_v10 = vld [vmem:[%s5920_s28 + $0x98] sm:$0x1]  ;;  %v5534_v5 = vld [vmem:[%s5920_s28 + $0x90] sm:$0xe] }
 0x2b8   : > { %v2519_v13 = vmax.f32 %v2467_v0, 0.0  ;;  %v3845_v2 = vrot.slane %v3843_v9, 5  ;;  %v5560_v21 = vrot.slane %v5534_v5, 9 }
 0x2b9   : > { %v2509_v20 = vmax.f32 %v2442_v14, 0.0  ;;  %v4051_v14 = vshll.u32 %v5488_v59, 16 }
 0x2ba   : > { %2552 = vst.msk [vmem:[%s7405_s24 + $0x120] sm:$0xff] %vm2533_vm14, %v2519_v13  ;;  %4159 = vrot.lane.b32.xlu1 %v3828_v27, %s5844_s5  ;;  %v4793_v27 = vsel %vm2408_vm11, %v4742_v52, 0  ;;  %v4457_v13 = vrot.slane %v5536_v10, 5 }
 0x2bb   : > { %2542 = vst.msk [vmem:[%s7405_s24 + $0x80] sm:$0xff] %vm2533_vm14, %v2509_v20  ;;  %3601 = vrot.lane.b32.xlu0 %v5426_v61, %s5843_s4  ;;  %3599 = vrot.lane.b32.xlu2 %v5425_v22, %s5843_s4  ;;  %v3842_v61 = vrot.slane %v3840_v37, 4  ;;  %v5463_v22 = vld [vmem:[%s5920_s28 + $0x34] sm:$0xf]  ;;  %v4053_v18 = vrot.slane %v4051_v14, 5 }
 0x2bc   : > { %v3432_v15 = vpop.permute.xlu1 %3431  ;;  %5726 = vmatpush.bf16.msra.mxu3 %v4793_v27  ;;  %4801 = vmatpush.bf16.msra.mxu1 %v4793_v27  ;;  %v3849_v36 = vshll.u32 %v5463_v22, 16  ;;  %v3853_v4 = vshrl.u32 %v5463_v22, 16 }
 0x2bd   : > { %v2468_v58 = vpop.f32.mrf.mxu2  ;;  %3511 = vst.msk [vmem:[#allocation2 + $0x40] sm:$0xf] %vm1107_vm8, %v3432_v15  ;;  %v3430_v35 = vpop.permute.xlu0 %3429  ;;  %v4054_v38 = vsel %vm5931_vm2, %v4049_v31, %v4053_v18 }
 0x2be   : > { %v2469_v42 = vadd.f32 %v7386_v60, %v2468_v58  ;;  %3510 = vst.msk [vmem:[#allocation2 + $0x3c] sm:$0xf] %vm1107_vm8, %v3430_v35  ;;  %v2443_v33 = vpop.f32.mrf.mxu0  ;;  %v3446_v39 = vpop.permute.xlu2 %3445  ;;  %v4458_v58 = vsel %vm6106_vm6, %v4456_v16, %v4457_v13  ;;  %v3846_v35 = vor.u32 %v3845_v2, %v3842_v61 }
 0x2bf   : > { %v2444_v47 = vadd.f32 %v7386_v60, %v2443_v33  ;;  %3518 = vst.msk [vmem:[#allocation2 + $0x5c] sm:$0xf] %vm1107_vm8, %v3446_v39 }
 0x2c0   : > { %v2520_v50 = vmax.f32 %v2469_v42, 0.0  ;;  %5727 = vmatpush.bf16.msra.mxu3 %v5722_v23  ;;  %4802 = vmatpush.bf16.msra.mxu1 %v5722_v23  ;;  %v4455_v42 = vsel %vm6106_vm6, %v5560_v21, %v4454_v26  ;;  %v3847_v39 = vrot.slane %v3846_v35, 4  ;;  %v5510_v26 = vld [vmem:[%s5920_s28 + $0x30] sm:$0xe] }
 0x2c1   : > { %v2510_v32 = vmax.f32 %v2444_v47, 0.0  ;;  %v3851_v47 = vrot.slane %v3849_v36, 5  ;;  %v5552_v5 = vrot.slane %v5510_v26, 9 }
 0x2c2   : > { %2553 = vst.msk [vmem:[%s7405_s24 + $0x128] sm:$0xff] %vm2533_vm14, %v2520_v50  ;;  %4497 = vrot.lane.b32.xlu1 %v4395_v48, %s5845_s6  ;;  %v5489_v48 = vld [vmem:[%s5920_s28 + $0x9c] sm:$0xf] }
 0x2c3   : > { %2543 = vst.msk [vmem:[%s7405_s24 + $0x88] sm:$0xff] %vm2533_vm14, %v2510_v32  ;;  %4495 = vrot.lane.b32.xlu0 %v4392_v51, %s5845_s6  ;;  %4161 = vrot.lane.b32.xlu2 %v3838_v19, %s5844_s5  ;;  %v5511_v51 = vld [vmem:[%s5920_s28 + $0x34] sm:$0xf]  ;;  %v3855_v19 = vrot.slane %v3853_v4, 4  ;;  %v4059_v34 = vshll.u32 %v5489_v48, 16 }
 0x2c4   : > { %v3438_v46 = vpop.permute.xlu1 %3437  ;;  %v4398_v49 = vrot.slane %v5511_v51, 5 }
 0x2c5   : > { %v2471_v43 = vpop.f32.mrf.mxu2  ;;  %3514 = vst.msk [vmem:[#allocation2 + $0x4c] sm:$0xf] %vm1107_vm8, %v3438_v46  ;;  %v3436_v30 = vpop.permute.xlu0 %3435  ;;  %v4056_v46 = vshrl.u32 %v5489_v48, 16  ;;  %v3856_v59 = vor.u32 %v3855_v19, %v3851_v47  ;;  %v4061_v37 = vrot.slane %v4059_v34, 5 }
 0x2c6   : > { %v2472_v54 = vadd.f32 %v7386_v60, %v2471_v43  ;;  %3513 = vst.msk [vmem:[#allocation2 + $0x48] sm:$0xf] %vm1107_vm8, %v3436_v30  ;;  %v2446_v55 = vpop.f32.mrf.mxu0  ;;  %v3624_v17 = vpop.permute.xlu2 %3623  ;;  %v3852_v30 = vsel %vm5931_vm2, %v3847_v39, %v3851_v47  ;;  %v4400_v9 = vrot.slane %v4398_v49, 4  ;;  %v4399_v23 = vsel %vm6106_vm6, %v5552_v5, %v4398_v49 }
 0x2c7   : > { %v2447_v62 = vadd.f32 %v7386_v60, %v2446_v55  ;;  %3703 = vst.msk [vmem:[#allocation2 + $0x40] sm:$0xf] %vm1300_vm9, %v3624_v17  ;;  %v5512_v55 = vld [vmem:[%s5920_s28 + $0x38] sm:$0x1]  ;;  %v5427_v17 = vld [vmem:[%s5920_s28 + $0x30] sm:$0xf] }
 0x2c8   : > { %v2521_v0 = vmax.f32 %v2472_v54, 0.0  ;;  %v5428_v54 = vld [vmem:[%s5920_s28 + $0x34] sm:$0xf]  ;;  %v4401_v52 = vrot.slane %v5512_v55, 5  ;;  %v3857_v12 = vrot.slane %v3856_v59, 4 }
 0x2c9   : > { %v2511_v7 = vmax.f32 %v2447_v62, 0.0  ;;  %v3859_v62 = vshll.u32 %v5464_v40, 16 }
 0x2ca   : > { %2554 = vst.msk [vmem:[%s7405_s24 + $0x140] sm:$0xff] %vm2533_vm14, %v2521_v0  ;;  %4195 = vrot.lane.b32.xlu1 %v4044_v57, %s5844_s5  ;;  %v5490_v0 = vld [vmem:[%s5920_s28 + $0xa0] sm:$0xf]  ;;  %v4402_v21 = vsel %vm6106_vm6, %v4400_v9, %v4401_v52 }
 0x2cb   : > { %2544 = vst.msk [vmem:[%s7405_s24 + $0xa0] sm:$0xff] %vm2533_vm14, %v2511_v7  ;;  %3637 = vrot.lane.b32.xlu0 %v5444_v24, %s5843_s4  ;;  %3635 = vrot.lane.b32.xlu2 %v5443_v8, %s5843_s4  ;;  %v4058_v24 = vrot.slane %v4056_v46, 4  ;;  %v3861_v14 = vrot.slane %v3859_v62, 5  ;;  %v4065_v61 = vshll.u32 %v5490_v0, 16 }
 0x2cc   : > { %v3444_v20 = vpop.permute.xlu1 %3443 }
 0x2cd   : > { %v2473_v28 = vpop.f32.mrf.mxu2  ;;  %3517 = vst.msk [vmem:[#allocation2 + $0x58] sm:$0xf] %vm1107_vm8, %v3444_v20  ;;  %v3442_v29 = vpop.permute.xlu0 %3441  ;;  %v4062_v13 = vor.u32 %v4061_v37, %v4058_v24  ;;  %v3862_v31 = vsel %vm5931_vm2, %v3857_v12, %v3861_v14 }
 0x2ce   : > { %v2474_v6 = vadd.f32 %v7386_v60, %v2473_v28  ;;  %3516 = vst.msk [vmem:[#allocation2 + $0x54] sm:$0xf] %vm1107_vm8, %v3442_v29  ;;  %v2448_v3 = vpop.f32.mrf.mxu0  ;;  %v7617_v15 = vpop.permute.xlu2 %4185  ;;  %v4069_v29 = vshrl.u32 %v5490_v0, 16 }
 0x2cf   : > { %v2449_v11 = vadd.f32 %v7386_v60, %v2448_v3  ;;  %v4063_v18 = vrot.slane %v4062_v13, 4 }
 0x2d0   : > { %v2522_v63 = vmax.f32 %v2474_v6, 0.0  ;;  %v4067_v6 = vrot.slane %v4065_v61, 5  ;;  %v4071_v36 = vrot.slane %v4069_v29, 4  ;;  %v5467_v29 = vld [vmem:[%s5920_s28 + $0x44] sm:$0x1] }
 0x2d1   : > { %v2512_v33 = vmax.f32 %v2449_v11, 0.0  ;;  %v5465_v11 = vld [vmem:[%s5920_s28 + $0x3c] sm:$0xf] }
 0x2d2   : > { %2555 = vst.msk [vmem:[%s7405_s24 + $0x148] sm:$0xff] %vm2533_vm14, %v2522_v63  ;;  %4533 = vrot.lane.b32.xlu1 %v4458_v58, %s5845_s6  ;;  %v3864_v48 = vshrl.u32 %v5465_v11, 16 }
 0x2d3   : > { %2545 = vst.msk [vmem:[%s7405_s24 + $0xa8] sm:$0xff] %vm2533_vm14, %v2512_v33  ;;  %4531 = vrot.lane.b32.xlu0 %v4455_v42, %s5845_s6  ;;  %4197 = vrot.lane.b32.xlu2 %v4054_v38, %s5844_s5  ;;  %v4068_v33 = vsel %vm5931_vm2, %v4063_v18, %v4067_v6  ;;  %v5491_v38 = vld [vmem:[%s5920_s28 + $0xa4] sm:$0x1] }
 0x2d4   : > { %v3450_v50 = vpop.permute.xlu1 %3449  ;;  %v4075_v46 = vshll.u32 %v5491_v38, 16  ;;  %v5515_v18 = vld [vmem:[%s5920_s28 + $0x44] sm:$0x1]  ;;  %v5493_v38 = vld [vmem:[%s5920_s28 + $0xac] sm:$0xf] }
 0x2d5   : > { %v2476_v32 = vpop.f32.mrf.mxu2  ;;  %3520 = vst.msk [vmem:[#allocation2 + $0x64] sm:$0xf] %vm1107_vm8, %v3450_v50  ;;  %v3448_v56 = vpop.permute.xlu0 %3447  ;;  %v3867_v50 = vshll.u32 %v5465_v11, 16  ;;  %v5429_v11 = vld [vmem:[%s5920_s28 + $0x3c] sm:$0xf] }
 0x2d6   : > { %v2477_v41 = vadd.f32 %v7386_v60, %v2476_v32  ;;  %3519 = vst.msk [vmem:[#allocation2 + $0x60] sm:$0xf] %vm1107_vm8, %v3448_v56  ;;  %v2451_v44 = vpop.f32.mrf.mxu0  ;;  %v3592_v45 = vpop.permute.xlu2 %3591  ;;  %v5446_v32 = vld [vmem:[%s5920_s28 + $0xa0] sm:$0xf]  ;;  %v5539_v56 = vld [vmem:[%s5920_s28 + $0xa4] sm:$0x1] }
 0x2d7   : > { %v2452_v43 = vadd.f32 %v7386_v60, %v2451_v44  ;;  %3687 = vst.msk [vmem:[#allocation2] sm:$0xf] %vm1300_vm9, %v3592_v45  ;;  %v5445_v44 = vld [vmem:[%s5920_s28 + $0x9c] sm:$0xf]  ;;  %v4072_v45 = vor.u32 %v4071_v36, %v4067_v6  ;;  %v4464_v40 = vrot.slane %v5539_v56, 5  ;;  %v4077_v59 = vrot.slane %v4075_v46, 5 }
 0x2d8   : > { %v2523_v53 = vmax.f32 %v2477_v41, 0.0  ;;  %v5537_v41 = vld [vmem:[%s5920_s28 + $0x9c] sm:$0xe] }
 0x2d9   : > { %v2513_v57 = vmax.f32 %v2452_v43, 0.0  ;;  %v3866_v43 = vrot.slane %v3864_v48, 4 }
 0x2da   : > { %2556 = vst.msk [vmem:[%s7405_s24 + $0x160] sm:$0xff] %vm2533_vm14, %v2523_v53  ;;  %4163 = vrot.lane.b32.xlu1 %v3852_v30, %s5844_s5  ;;  %v3869_v30 = vrot.slane %v3867_v50, 5  ;;  %v5561_v53 = vrot.slane %v5537_v41, 9 }
 0x2db   : > { %2546 = vst.msk [vmem:[%s7405_s24 + $0xc0] sm:$0xff] %vm2533_vm14, %v2513_v57  ;;  %3605 = vrot.lane.b32.xlu0 %v5428_v54, %s5843_s4  ;;  %3603 = vrot.lane.b32.xlu2 %v5427_v17, %s5843_s4  ;;  %v5466_v54 = vld [vmem:[%s5920_s28 + $0x40] sm:$0xf]  ;;  %v4073_v17 = vrot.slane %v4072_v45, 4  ;;  %v4093_v45 = vshrl.u32 %v5493_v38, 16 }
 0x2dc   : > { %v4184_v10 = vpop.permute.xlu1 %4183  ;;  %v3870_v0 = vor.u32 %v3869_v30, %v3866_v43  ;;  %v3877_v12 = vshrl.u32 %v5466_v54, 16 }
 0x2dd   : > { %v2478_v7 = vpop.f32.mrf.mxu2  ;;  %4263 = vst.msk [vmem:[#allocation2 + $0x40] sm:$0xf] %vm1861_vm10, %v4184_v10  ;;  %v3626_v8 = vpop.permute.xlu0 %3625  ;;  %v3873_v10 = vshll.u32 %v5466_v54, 16  ;;  %v5396_v54 = vld [vmem:[%s5920_s28 + $0xb4] sm:$0xe] }
 0x2de   : > { %v2479_v27 = vadd.f32 %v7386_v60, %v2478_v7  ;;  %3704 = vst.msk [vmem:[#allocation2 + $0x44] sm:$0xf] %vm1300_vm9, %v3626_v8  ;;  %v2453_v16 = vpop.f32.mrf.mxu0  ;;  %v7658_v2 = vpop.permute.xlu2 %4153  ;;  %v3871_v14 = vrot.slane %v3870_v0, 4  ;;  %v5418_v0 = vrot.slane %v5396_v54, 9 }
 0x2df   : > { %v2454_v20 = vadd.f32 %v7386_v60, %v2453_v16  ;;  %4264 = vst.msk [vmem:[#allocation2 + $0x44] sm:$0xf] %vm1861_vm10, %v7617_v15  ;;  %v5538_v15 = vld [vmem:[%s5920_s28 + $0xa0] sm:$0xf] }
 0x2e0   : > { %v2524_v22 = vmax.f32 %v2479_v27, 0.0  ;;  %v4461_v47 = vrot.slane %v5538_v15, 5  ;;  %v3875_v27 = vrot.slane %v3873_v10, 5  ;;  %v5514_v16 = vld [vmem:[%s5920_s28 + $0x40] sm:$0xf] }
 0x2e1   : > { %v2514_v28 = vmax.f32 %v2454_v20, 0.0  ;;  %v3879_v20 = vrot.slane %v3877_v12, 4  ;;  %v5513_v15 = vld [vmem:[%s5920_s28 + $0x3c] sm:$0xe] }
 0x2e2   : > { %2557 = vst.msk [vmem:[%s7405_s24 + $0x168] sm:$0xff] %vm2533_vm14, %v2524_v22  ;;  %4501 = vrot.lane.b32.xlu1 %v4402_v21, %s5845_s6  ;;  %v4463_v34 = vrot.slane %v4461_v47, 4  ;;  %v4462_v7 = vsel %vm6106_vm6, %v5561_v53, %v4461_v47  ;;  %v7723_v21 = vld [vmem:[%s8164_s2] ss:$0 sm:$0xff] }
 0x2e3   : > { %2547 = vst.msk [vmem:[%s7405_s24 + $0xc8] sm:$0xff] %vm2533_vm14, %v2514_v28  ;;  %4499 = vrot.lane.b32.xlu0 %v4399_v23, %s5845_s6  ;;  %4165 = vrot.lane.b32.xlu2 %v3862_v31, %s5844_s5  ;;  %v4405_v23 = vrot.slane %v5514_v16, 5  ;;  %v3876_v31 = vsel %vm5931_vm2, %v3871_v14, %v3875_v27 }
 0x2e4   : > { %v4522_v3 = vpop.permute.xlu1 %4521  ;;  %v4465_v52 = vsel %vm6106_vm6, %v4463_v34, %v4464_v40 }
 0x2e5   : > { %v2481_v58 = vpop.f32.mrf.mxu2  ;;  %4600 = vst.msk [vmem:[#allocation2 + $0x44] sm:$0xf] %vm2198_vm12, %v4522_v3  ;;  %v4520_v35 = vpop.permute.xlu0 %4519  ;;  %v5430_v3 = vld [vmem:[%s5920_s28 + $0x40] sm:$0xf]  ;;  %v4407_v36 = vrot.slane %v4405_v23, 4 }
 0x2e6   : > { %v2482_v63 = vadd.f32 %v7386_v60, %v2481_v58  ;;  %4599 = vst.msk [vmem:[#allocation2 + $0x40] sm:$0xf] %vm2198_vm12, %v4520_v35  ;;  %v2456_v42 = vpop.f32.mrf.mxu0  ;;  %v3628_v4 = vpop.permute.xlu2 %3627  ;;  %v3880_v58 = vor.u32 %v3879_v20, %v3875_v27  ;;  %v3883_v35 = vshll.u32 %v5467_v29, 16 }
 0x2e7   : > { %v2457_v39 = vadd.f32 %v7386_v60, %v2456_v42  ;;  %3705 = vst.msk [vmem:[#allocation2 + $0x48] sm:$0xf] %vm1300_vm9, %v3628_v4  ;;  %v5553_v42 = vrot.slane %v5513_v15, 9  ;;  %v5397_v4 = vld [vmem:[%s5920_s28 + $0xb8] sm:$0xf] }
 0x2e8   : > { %v2525_v51 = vmax.f32 %v2482_v63, 0.0  ;;  %v4408_v63 = vrot.slane %v5515_v18, 5  ;;  %v3380_v30 = vrot.slane %v5397_v4, 5  ;;  %v5468_v18 = vld [vmem:[%s5920_s28 + $0x48] sm:$0xf] }
 0x2e9   : > { %v2515_v19 = vmax.f32 %v2457_v39, 0.0  ;;  %v5492_v39 = vld [vmem:[%s5920_s28 + $0xa8] sm:$0xf]  ;;  %v4406_v43 = vsel %vm6106_vm6, %v5553_v42, %v4405_v23  ;;  %v5469_v23 = vld [vmem:[%s5920_s28 + $0x4c] sm:$0xf]  ;;  %v3888_v42 = vshrl.u32 %v5468_v18, 16 }
 0x2ea   : > { %2558 = vst.msk [vmem:[%s7405_s24 + $0x180] sm:$0xff] %vm2533_vm14, %v2525_v51  ;;  %4199 = vrot.lane.b32.xlu1 %v4068_v33, %s5844_s5  ;;  %v3881_v51 = vrot.slane %v3880_v58, 4  ;;  %v4080_v46 = vshrl.u32 %v5492_v39, 16  ;;  %v4083_v34 = vshll.u32 %v5492_v39, 16  ;;  %v3381_v16 = vsel %vm6106_vm6, %v5418_v0, %v3380_v30  ;;  %v5542_v4 = vld [vmem:[%s5920_s28 + $0xb0] sm:$0x1] }
 0x2eb   : > { %2548 = vst.msk [vmem:[%s7405_s24 + $0xe0] sm:$0xff] %vm2533_vm14, %v2515_v19  ;;  %3641 = vrot.lane.b32.xlu0 %v5446_v32, %s5843_s4  ;;  %3639 = vrot.lane.b32.xlu2 %v5445_v44, %s5843_s4  ;;  %v3885_v32 = vrot.slane %v3883_v35, 5  ;;  %v4409_v19 = vsel %vm6106_vm6, %v4407_v36, %v4408_v63  ;;  %v4089_v44 = vshll.u32 %v5493_v38, 16  ;;  %v3897_v58 = vshll.u32 %v5469_v23, 16  ;;  %v5448_v38 = vld [vmem:[%s5920_s28 + $0xac] sm:$0xf] }
 0x2ec   : > { %v4152_v49 = vpop.permute.xlu1 %4151  ;;  %v3901_v35 = vshrl.u32 %v5469_v23, 16  ;;  %v5540_v39 = vld [vmem:[%s5920_s28 + $0xa8] sm:$0xe] }
 0x2ed   : > { %v2483_v55 = vpop.f32.mrf.mxu2  ;;  %4247 = vst.msk [vmem:[#allocation2] sm:$0xf] %vm1861_vm10, %v4152_v49  ;;  %v3594_v57 = vpop.permute.xlu0 %3593  ;;  %v5714_v26 = vld [vmem:[#allocation2 + $0x40] sm:$0xff]  ;;  %v5398_v49 = vld [vmem:[%s5920_s28 + $0xbc] sm:$0x1]  ;;  %v3886_v53 = vsel %vm5931_vm2, %v3881_v51, %v3885_v32  ;;  %v4471_v32 = vrot.slane %v5542_v4, 5 }
 0x2ee   : > { %v2484_v62 = vadd.f32 %v7386_v60, %v2483_v55  ;;  %3688 = vst.msk [vmem:[#allocation2 + $0x4] sm:$0xf] %vm1300_vm9, %v3594_v57  ;;  %v2458_v24 = vpop.f32.mrf.mxu0  ;;  %v4190_v37 = vpop.permute.xlu2 %4189  ;;  %5644 = vmatmul.msk.bf16.vlgmr.msra.gmra.mxu3 %vm2359_vm13, %v5714_v26  ;;  %v4091_v55 = vrot.slane %v4089_v44, 5  ;;  %v4095_v57 = vrot.slane %v4093_v45, 4  ;;  %v4082_v26 = vrot.slane %v4080_v46, 4 }
 0x2ef   : > { %v2459_v9 = vadd.f32 %v7386_v60, %v2458_v24  ;;  %4248 = vst.msk [vmem:[#allocation2 + $0x4] sm:$0xf] %vm1861_vm10, %v7658_v2  ;;  %v4078_v60 = vsel %vm5931_vm2, %v4073_v17, %v4077_v59  ;;  %v4085_v17 = vrot.slane %v4083_v34, 5  ;;  %v3383_v24 = vrot.slane %v5398_v49, 5 }
 0x2f0   : > { %v2526_v5 = vmax.f32 %v2484_v62, 0.0  ;;  %v3382_v62 = vrot.slane %v3380_v30, 4  ;;  %v5562_v46 = vrot.slane %v5540_v39, 9 }
 0x2f1   : > { %v2516_v8 = vmax.f32 %v2459_v9, 0.0 }
 0x2f2   : > { %2559 = vst.msk [vmem:[%s7405_s24 + $0x188] sm:$0xff] %vm2533_vm14, %v2526_v5  ;;  %4537 = vrot.lane.b32.xlu1 %v4465_v52, %s5845_s6  ;;  %v3384_v27 = vsel %vm6106_vm6, %v3382_v62, %v3383_v24 }
 0x2f3   : > { %2549 = vst.msk [vmem:[%s7405_s24 + $0xe8] sm:$0xff] %vm2533_vm14, %v2516_v8  ;;  %4535 = vrot.lane.b32.xlu0 %v4462_v7, %s5845_s6  ;;  %4201 = vrot.lane.b32.xlu2 %v4078_v60, %s5844_s5  ;;  %v5447_v7 = vld [vmem:[%s5920_s28 + $0xa8] sm:$0xf]  ;;  %v4096_v8 = vor.u32 %v4095_v57, %v4091_v55  ;;  %v4086_v60 = vor.u32 %v4085_v17, %v4082_v26 }
 0x2f4   : > { %v4490_v13 = vpop.permute.xlu1 %4489 }
 0x2f5   : > { %v2486_v61 = vpop.f32.mrf.mxu2  ;;  %4584 = vst.msk [vmem:[#allocation2 + $0x4] sm:$0xf] %vm2198_vm12, %v4490_v13  ;;  %v4488_v2 = vpop.permute.xlu0 %4487  ;;  %v4097_v13 = vrot.slane %v4096_v8, 4 }
 0x2f6   : > { %v2487_v22 = vadd.f32 %v7723_v21, %v2486_v61  ;;  %4583 = vst.msk [vmem:[#allocation2] sm:$0xf] %vm2198_vm12, %v4488_v2  ;;  %v3596_v28 = vpop.permute.xlu2 %3595  ;;  %v4087_v2 = vrot.slane %v4086_v60, 4  ;;  %v5400_v60 = vld [vmem:[%s5920_s28 + $0xc4] sm:$0xf] }
 0x2f7   : > { %3689 = vst.msk [vmem:[#allocation2 + $0x8] sm:$0xf] %vm1300_vm9, %v3596_v28 }
 0x2f8   : > { %v2527_v6 = vmax.f32 %v2487_v22, 0.0  ;;  %v5541_v22 = vld [vmem:[%s5920_s28 + $0xac] sm:$0xf] }
 0x2f9   : > { %v4468_v63 = vrot.slane %v5541_v22, 5 }
 0x2fa   : > { %2560 = vst.msk [vmem:[%s7405_s24 + $0x1a0] sm:$0xff] %vm2533_vm14, %v2527_v6  ;;  %4167 = vrot.lane.b32.xlu1 %v3876_v31, %s5844_s5 }
 0x2fb   : > { %3609 = vrot.lane.b32.xlu0 %v5430_v3, %s5843_s4  ;;  %3607 = vrot.lane.b32.xlu2 %v5429_v11, %s5843_s4  ;;  %v4092_v11 = vsel %vm5931_vm2, %v4087_v2, %v4091_v55  ;;  %v4470_v51 = vrot.slane %v4468_v63, 4  ;;  %v4469_v57 = vsel %vm6106_vm6, %v5562_v46, %v4468_v63  ;;  %v5401_v63 = vld [vmem:[%s5920_s28 + $0xc8] sm:$0x1] }
 0x2fc   : > { %v4188_v33 = vpop.permute.xlu1 %4187 }
 0x2fd   : > { %v2488_v47 = vpop.f32.mrf.mxu2  ;;  %4265 = vst.msk [vmem:[#allocation2 + $0x48] sm:$0xf] %vm1861_vm10, %v4188_v33  ;;  %v3630_v48 = vpop.permute.xlu0 %3629  ;;  %v5706_v50 = vld [vmem:[#allocation2] sm:$0xff]  ;;  %v3891_v33 = vshll.u32 %v5468_v18, 16  ;;  %v4472_v54 = vsel %vm6106_vm6, %v4470_v51, %v4471_v32  ;;  %v5495_v18 = vld [vmem:[%s5920_s28 + $0xb4] sm:$0xf] }
 0x2fe   : > { %v2489_v56 = vadd.f32 %v7723_v21, %v2488_v47  ;;  %3706 = vst.msk [vmem:[#allocation2 + $0x4c] sm:$0xf] %vm1300_vm9, %v3630_v48  ;;  %v4158_v41 = vpop.permute.xlu2 %4157  ;;  %5636 = vmatmul.msk.bf16.vlgmr.msra.gmra.mxu1 %vm2359_vm13, %v5706_v50  ;;  %v3899_v47 = vrot.slane %v3897_v58, 5  ;;  %v3903_v48 = vrot.slane %v3901_v35, 4  ;;  %v4104_v35 = vshrl.u32 %v5495_v18, 16 }
 0x2ff   : > { %4266 = vst.msk [vmem:[#allocation2 + $0x4c] sm:$0xf] %vm1861_vm10, %v4190_v37  ;;  %v5494_v37 = vld [vmem:[%s5920_s28 + $0xb0] sm:$0x1] }
 0x300   : > { %v2528_v40 = vmax.f32 %v2489_v56, 0.0  ;;  %v4099_v12 = vshll.u32 %v5494_v37, 16  ;;  %v5470_v56 = vld [vmem:[%s5920_s28 + $0x50] sm:$0x1]  ;;  %v3904_v30 = vor.u32 %v3903_v48, %v3899_v47  ;;  %v4106_v51 = vrot.slane %v4104_v35, 4 }
 0x301   : > { %v3907_v49 = vshll.u32 %v5470_v56, 16 }
 0x302   : > { %2561 = vst.msk [vmem:[%s7405_s24 + $0x1a8] sm:$0xff] %vm2533_vm14, %v2528_v40  ;;  %4505 = vrot.lane.b32.xlu1 %v4409_v19, %s5845_s6  ;;  %v4101_v61 = vrot.slane %v4099_v12, 5  ;;  %v3890_v19 = vrot.slane %v3888_v42, 4  ;;  %v3905_v26 = vrot.slane %v3904_v30, 4  ;;  %v5399_v12 = vld [vmem:[%s5920_s28 + $0xc0] sm:$0xe] }
 0x303   : > { %4503 = vrot.lane.b32.xlu0 %v4406_v43, %s5845_s6  ;;  %4169 = vrot.lane.b32.xlu2 %v3886_v53, %s5844_s5  ;;  %v5431_v43 = vld [vmem:[%s5920_s28 + $0x48] sm:$0xf]  ;;  %v3909_v17 = vrot.slane %v3907_v49, 5 }
 0x304   : > { %v4526_v59 = vpop.permute.xlu1 %4525  ;;  %v4102_v15 = vsel %vm5931_vm2, %v4097_v13, %v4101_v61  ;;  %v5419_v13 = vrot.slane %v5399_v12, 9  ;;  %v3387_v61 = vrot.slane %v5400_v60, 5  ;;  %v5473_v12 = vld [vmem:[%s5920_s28 + $0x5c] sm:$0x1] }
 0x305   : > { %v2491_v9 = vpop.f32.mrf.mxu2  ;;  %4602 = vst.msk [vmem:[#allocation2 + $0x4c] sm:$0xf] %vm2198_vm12, %v4526_v59  ;;  %v4524_v52 = vpop.permute.xlu0 %4523 }
 0x306   : > { %v2492_v10 = vadd.f32 %v7723_v21, %v2491_v9  ;;  %4601 = vst.msk [vmem:[#allocation2 + $0x48] sm:$0xf] %vm2198_vm12, %v4524_v52  ;;  %v3632_v5 = vpop.permute.xlu2 %3631  ;;  %v5517_v52 = vld [vmem:[%s5920_s28 + $0x4c] sm:$0xf]  ;;  %v3389_v39 = vrot.slane %v3387_v61, 4 }
 0x307   : > { %3707 = vst.msk [vmem:[#allocation2 + $0x50] sm:$0xf] %vm1300_vm9, %v3632_v5  ;;  %v3910_v5 = vsel %vm5931_vm2, %v3905_v26, %v3909_v17  ;;  %v5472_v26 = vld [vmem:[%s5920_s28 + $0x58] sm:$0xf] }
 0x308   : > { %v2529_v14 = vmax.f32 %v2492_v10, 0.0 }
 0x30a   : > { %2562 = vst.msk [vmem:[%s7405_s24 + $0x1c0] sm:$0xff] %vm2533_vm14, %v2529_v14  ;;  %3643 = vrot.lane.b32.xlu1 %v5447_v7, %s5843_s4  ;;  %v4412_v14 = vrot.slane %v5517_v52, 5  ;;  %v3925_v52 = vshrl.u32 %v5472_v26, 16 }
 0x30b   : > { %3453 = vrot.lane.b32.xlu0 %v3384_v27, %s5842_s30  ;;  %3451 = vrot.lane.b32.xlu2 %v3381_v16, %s5842_s30  ;;  %v5518_v27 = vld [vmem:[%s5920_s28 + $0x50] sm:$0x1]  ;;  %v5516_v16 = vld [vmem:[%s5920_s28 + $0x48] sm:$0xe] }
 0x30c   : > { %v4156_v20 = vpop.permute.xlu1 %4155  ;;  %v4415_v22 = vrot.slane %v5518_v27, 5 }
 0x30d   : > { %v2493_v28 = vpop.f32.mrf.mxu2  ;;  %4249 = vst.msk [vmem:[#allocation2 + $0x8] sm:$0xf] %vm1861_vm10, %v4156_v20  ;;  %v3598_v29 = vpop.permute.xlu0 %3597  ;;  %v5715_v31 = vld [vmem:[#allocation2 + $0x48] sm:$0xff]  ;;  %v4414_v20 = vrot.slane %v4412_v14, 4 }
 0x30e   : > { %v2494_v6 = vadd.f32 %v7723_v21, %v2493_v28  ;;  %3690 = vst.msk [vmem:[#allocation2 + $0xc] sm:$0xf] %vm1300_vm9, %v3598_v29  ;;  %v4194_v3 = vpop.permute.xlu2 %4193  ;;  %5645 = vmatmul.msk.bf16.gmra.mxu3 %vm2359_vm13, %v5715_v31  ;;  %v5496_v28 = vld [vmem:[%s5920_s28 + $0xb8] sm:$0xf]  ;;  %v5554_v29 = vrot.slane %v5516_v16, 9 }
 0x30f   : > { %4250 = vst.msk [vmem:[#allocation2 + $0xc] sm:$0xf] %vm1861_vm10, %v4158_v41  ;;  %v3893_v41 = vrot.slane %v3891_v33, 5  ;;  %v5497_v33 = vld [vmem:[%s5920_s28 + $0xbc] sm:$0x1] }
 0x310   : > { %v2530_v36 = vmax.f32 %v2494_v6, 0.0  ;;  %v3388_v6 = vsel %vm6106_vm6, %v5419_v13, %v3387_v61  ;;  %v4413_v58 = vsel %vm6106_vm6, %v5554_v29, %v4412_v14  ;;  %v3927_v14 = vrot.slane %v3925_v52, 4  ;;  %v5520_v29 = vld [vmem:[%s5920_s28 + $0x58] sm:$0xf] }
 0x311   : > { %v3894_v55 = vor.u32 %v3893_v41, %v3890_v19  ;;  %v5450_v19 = vld [vmem:[%s5920_s28 + $0xb8] sm:$0xf]  ;;  %v5449_v41 = vld [vmem:[%s5920_s28 + $0xb4] sm:$0xf] }
 0x312   : > { %2563 = vst.msk [vmem:[%s7405_s24 + $0x1c8] sm:$0xff] %vm2533_vm14, %v2530_v36  ;;  %4205 = vrot.lane.b32.xlu1 %v4102_v15, %s5844_s5  ;;  %v4113_v15 = vshll.u32 %v5496_v28, 16  ;;  %v4107_v36 = vshll.u32 %v5495_v18, 16  ;;  %v3931_v18 = vshll.u32 %v5473_v12, 16 }
 0x313   : > { %4203 = vrot.lane.b32.xlu0 %v4092_v11, %s5844_s5  ;;  %3645 = vrot.lane.b32.xlu2 %v5448_v38, %s5843_s4  ;;  %v3895_v62 = vrot.slane %v3894_v55, 4  ;;  %v4117_v11 = vshrl.u32 %v5496_v28, 16  ;;  %v5519_v28 = vld [vmem:[%s5920_s28 + $0x54] sm:$0xe] }
 0x314   : > { %v4494_v50 = vpop.permute.xlu1 %4493  ;;  %v4115_v4 = vrot.slane %v4113_v15, 5  ;;  %v4109_v32 = vrot.slane %v4107_v36, 5  ;;  %v5555_v15 = vrot.slane %v5519_v28, 9  ;;  %v3933_v36 = vrot.slane %v3931_v18, 5 }
 0x315   : > { %v2496_v44 = vpop.f32.mrf.mxu2  ;;  %4586 = vst.msk [vmem:[#allocation2 + $0xc] sm:$0xf] %vm2198_vm12, %v4494_v50  ;;  %v4492_v45 = vpop.permute.xlu0 %4491  ;;  %v3900_v8 = vsel %vm5931_vm2, %v3895_v62, %v3899_v47  ;;  %v4119_v38 = vrot.slane %v4117_v11, 4  ;;  %v3390_v50 = vrot.slane %v5401_v63, 5  ;;  %v5471_v62 = vld [vmem:[%s5920_s28 + $0x54] sm:$0xf] }
 0x316   : > { %v2497_v34 = vadd.f32 %v7723_v21, %v2496_v44  ;;  %4585 = vst.msk [vmem:[#allocation2 + $0x8] sm:$0xf] %vm2198_vm12, %v4492_v45  ;;  %v3600_v40 = vpop.permute.xlu2 %3599  ;;  %v5543_v44 = vld [vmem:[%s5920_s28 + $0xb4] sm:$0xe]  ;;  %v5544_v45 = vld [vmem:[%s5920_s28 + $0xb8] sm:$0xf] }
 0x317   : > { %3691 = vst.msk [vmem:[#allocation2 + $0x10] sm:$0xf] %vm1300_vm9, %v3600_v40  ;;  %v4120_v46 = vor.u32 %v4119_v38, %v4115_v4  ;;  %v3391_v40 = vsel %vm6106_vm6, %v3389_v39, %v3390_v50  ;;  %v5563_v30 = vrot.slane %v5543_v44, 9  ;;  %v4475_v49 = vrot.slane %v5544_v45, 5  ;;  %v5403_v63 = vld [vmem:[%s5920_s28 + $0xd0] sm:$0xf] }
 0x318   : > { %v2531_v53 = vmax.f32 %v2497_v34, 0.0  ;;  %v4123_v34 = vshll.u32 %v5497_v33, 16  ;;  %v4419_v11 = vrot.slane %v5520_v29, 5 }
 0x319   : > { %v4477_v27 = vrot.slane %v4475_v49, 4 }
 0x31a   : > { %2564 = vst.msk [vmem:[%s7405_s24 + $0x1e0] sm:$0xff] %vm2533_vm14, %v2531_v53  ;;  %3611 = vrot.lane.b32.xlu1 %v5431_v43, %s5843_s4  ;;  %v4110_v43 = vor.u32 %v4109_v32, %v4106_v51  ;;  %v4125_v55 = vrot.slane %v4123_v34, 5  ;;  %v4420_v39 = vsel %vm6106_vm6, %v5555_v15, %v4419_v11  ;;  %v5404_v32 = vld [vmem:[%s5920_s28 + $0xd4] sm:$0x1]  ;;  %v5475_v15 = vld [vmem:[%s5920_s28 + $0x64] sm:$0xf] }
 0x31b   : > { %4541 = vrot.lane.b32.xlu0 %v4472_v54, %s5845_s6  ;;  %4539 = vrot.lane.b32.xlu2 %v4469_v57, %s5845_s6  ;;  %v4121_v54 = vrot.slane %v4120_v46, 4  ;;  %v3397_v45 = vrot.slane %v5404_v32, 5  ;;  %v5523_v32 = vld [vmem:[%s5920_s28 + $0x64] sm:$0xf] }
 0x31c   : > { %v4192_v59 = vpop.permute.xlu1 %4191  ;;  %v4111_v17 = vrot.slane %v4110_v43, 4 }
 0x31d   : > { %v2498_v24 = vpop.f32.mrf.mxu2  ;;  %4267 = vst.msk [vmem:[#allocation2 + $0x50] sm:$0xf] %vm1861_vm10, %v4192_v59  ;;  %v3634_v37 = vpop.permute.xlu0 %3633  ;;  %v5707_v9 = vld [vmem:[#allocation2 + $0x8] sm:$0xff] }
 0x31e   : > { %v2499_v0 = vadd.f32 %v7723_v21, %v2498_v24  ;;  %3708 = vst.msk [vmem:[#allocation2 + $0x54] sm:$0xf] %vm1300_vm9, %v3634_v37  ;;  %v4162_v10 = vpop.permute.xlu2 %4161  ;;  %5637 = vmatmul.msk.bf16.gmra.mxu1 %vm2359_vm13, %v5707_v9  ;;  %v5432_v21 = vld [vmem:[%s5920_s28 + $0x4c] sm:$0xf]  ;;  %v4476_v24 = vsel %vm6106_vm6, %v5563_v30, %v4475_v49  ;;  %v4126_v37 = vsel %vm5931_vm2, %v4121_v54, %v4125_v55  ;;  %v3921_v9 = vshll.u32 %v5472_v26, 16 }
 0x31f   : > { %4268 = vst.msk [vmem:[#allocation2 + $0x54] sm:$0xf] %vm1861_vm10, %v4194_v3  ;;  %v4416_v3 = vsel %vm6106_vm6, %v4414_v20, %v4415_v22  ;;  %v5434_v22 = vld [vmem:[%s5920_s28 + $0x58] sm:$0xf]  ;;  %v5499_v30 = vld [vmem:[%s5920_s28 + $0xc4] sm:$0xf] }
 0x320   : > { %v2532_v7 = vmax.f32 %v2499_v0, 0.0  ;;  %v4116_v0 = vsel %vm5931_vm2, %v4111_v17, %v4115_v4  ;;  %v3923_v60 = vrot.slane %v3921_v9, 5  ;;  %v4421_v54 = vrot.slane %v4419_v11, 4 }
 0x322   : > { %2565 = vst.msk [vmem:[%s7405_s24 + $0x1e8] sm:$0xff] %vm2533_vm14, %v2532_v7  ;;  %4173 = vrot.lane.b32.xlu1 %v3910_v5, %s5844_s5  ;;  %v3915_v5 = vshll.u32 %v5471_v62, 16  ;;  %v5545_v7 = vld [vmem:[%s5920_s28 + $0xbc] sm:$0x1] }
 0x323   : > { %4171 = vrot.lane.b32.xlu0 %v3900_v8, %s5844_s5  ;;  %3613 = vrot.lane.b32.xlu2 %v5432_v21, %s5843_s4  ;;  %v4478_v13 = vrot.slane %v5545_v7, 5 }
 0x324   : > { %v4530_v2 = vpop.permute.xlu1 %4529 }
 0x325   : > { %4604 = vst.msk [vmem:[#allocation2 + $0x54] sm:$0xf] %vm2198_vm12, %v4530_v2  ;;  %v4528_v23 = vpop.permute.xlu0 %4527  ;;  %v3917_v2 = vrot.slane %v3915_v5, 5  ;;  %v5474_v5 = vld [vmem:[%s5920_s28 + $0x60] sm:$0xf] }
 0x326   : > { %4603 = vst.msk [vmem:[#allocation2 + $0x50] sm:$0xf] %vm2198_vm12, %v4528_v23  ;;  %v3636_v31 = vpop.permute.xlu2 %3635  ;;  %v5433_v23 = vld [vmem:[%s5920_s28 + $0x54] sm:$0xf] }
 0x327   : > { %3709 = vst.msk [vmem:[#allocation2 + $0x58] sm:$0xf] %vm1300_vm9, %v3636_v31  ;;  %v3928_v31 = vor.u32 %v3927_v14, %v3923_v60 }
 0x329   : > { %v3929_v35 = vrot.slane %v3928_v31, 4 }
 0x32a   : > { %3455 = vrot.lane.b32.xlu1 %v3388_v6, %s5842_s30  ;;  %v4479_v6 = vsel %vm6106_vm6, %v4477_v27, %v4478_v13  ;;  %v5452_v13 = vld [vmem:[%s5920_s28 + $0xc4] sm:$0xf] }
 0x32b   : > { %4509 = vrot.lane.b32.xlu0 %v4416_v3, %s5845_s6  ;;  %4507 = vrot.lane.b32.xlu2 %v4413_v58, %s5845_s6  ;;  %v3934_v51 = vsel %vm5931_vm2, %v3929_v35, %v3933_v36 }
 0x32c   : > { %v4160_v42 = vpop.permute.xlu1 %4159 }
 0x32d   : > { %4251 = vst.msk [vmem:[#allocation2 + $0x10] sm:$0xf] %vm1861_vm10, %v4160_v42  ;;  %v3602_v47 = vpop.permute.xlu0 %3601  ;;  %v5716_v48 = vld [vmem:[#allocation2 + $0x50] sm:$0xff]  ;;  %v5498_v42 = vld [vmem:[%s5920_s28 + $0xc0] sm:$0xf] }
 0x32e   : > { %3692 = vst.msk [vmem:[#allocation2 + $0x14] sm:$0xf] %vm1300_vm9, %v3602_v47  ;;  %v4198_v56 = vpop.permute.xlu2 %4197  ;;  %5646 = vmatmul.msk.bf16.gmra.mxu3 %vm2359_vm13, %v5716_v48  ;;  %v3394_v47 = vrot.slane %v5403_v63, 5  ;;  %v4128_v48 = vshrl.u32 %v5498_v42, 16  ;;  %v4131_v50 = vshll.u32 %v5498_v42, 16 }
 0x32f   : > { %4252 = vst.msk [vmem:[#allocation2 + $0x14] sm:$0xf] %vm1861_vm10, %v4162_v10  ;;  %v3912_v10 = vshrl.u32 %v5471_v62, 16 }
 0x330   : > { %v3396_v44 = vrot.slane %v3394_v47, 4  ;;  %v4130_v46 = vrot.slane %v4128_v48, 4  ;;  %v4133_v34 = vrot.slane %v4131_v50, 5 }
 0x331   : > { %v3914_v61 = vrot.slane %v3912_v10, 4  ;;  %v5547_v10 = vld [vmem:[%s5920_s28 + $0xc4] sm:$0xf] }
 0x332   : > { %3649 = vrot.lane.b32.xlu1 %v5450_v19, %s5843_s4  ;;  %v3398_v26 = vsel %vm6106_vm6, %v3396_v44, %v3397_v45  ;;  %v4134_v17 = vor.u32 %v4133_v34, %v4130_v46  ;;  %v4482_v27 = vrot.slane %v5547_v10, 5  ;;  %v5476_v44 = vld [vmem:[%s5920_s28 + $0x68] sm:$0x1]  ;;  %v4426_v46 = vrot.slane %v5523_v32, 5  ;;  %v5436_v34 = vld [vmem:[%s5920_s28 + $0x64] sm:$0xf] }
 0x333   : > { %3647 = vrot.lane.b32.xlu0 %v5449_v41, %s5843_s4  ;;  %3457 = vrot.lane.b32.xlu2 %v3391_v40, %s5842_s30  ;;  %v3918_v3 = vor.u32 %v3917_v2, %v3914_v61  ;;  %v5521_v41 = vld [vmem:[%s5920_s28 + $0x5c] sm:$0x1]  ;;  %v5548_v61 = vld [vmem:[%s5920_s28 + $0xc8] sm:$0x1] }
 0x334   : > { %v4498_v53 = vpop.permute.xlu1 %4497  ;;  %v4422_v55 = vrot.slane %v5521_v41, 5  ;;  %v4135_v9 = vrot.slane %v4134_v17, 4  ;;  %v5546_v2 = vld [vmem:[%s5920_s28 + $0xc0] sm:$0xe]  ;;  %v4484_v28 = vrot.slane %v4482_v27, 4  ;;  %v4485_v29 = vrot.slane %v5548_v61, 5 }
 0x335   : > { %4588 = vst.msk [vmem:[#allocation2 + $0x14] sm:$0xf] %vm2198_vm12, %v4498_v53  ;;  %v4496_v57 = vpop.permute.xlu0 %4495  ;;  %v3919_v4 = vrot.slane %v3918_v3, 4  ;;  %v5564_v3 = vrot.slane %v5546_v2, 9 }
 0x336   : > { %4587 = vst.msk [vmem:[#allocation2 + $0x10] sm:$0xf] %vm2198_vm12, %v4496_v57  ;;  %v3604_v59 = vpop.permute.xlu2 %3603  ;;  %v4486_v42 = vsel %vm6106_vm6, %v4484_v28, %v4485_v29 }
 0x337   : > { %3693 = vst.msk [vmem:[#allocation2 + $0x18] sm:$0xf] %vm1300_vm9, %v3604_v59  ;;  %v3924_v19 = vsel %vm5931_vm2, %v3919_v4, %v3923_v60  ;;  %v4137_v59 = vshll.u32 %v5499_v30, 16  ;;  %v5500_v60 = vld [vmem:[%s5920_s28 + $0xc8] sm:$0x1]  ;;  %v3945_v4 = vshll.u32 %v5475_v15, 16 }
 0x339   : > { %v4139_v52 = vrot.slane %v4137_v59, 5  ;;  %v3947_v50 = vrot.slane %v3945_v4, 5 }
 0x33a   : > { %4543 = vrot.lane.b32.xlu1 %v4476_v24, %s5845_s6  ;;  %v4141_v24 = vshrl.u32 %v5499_v30, 16  ;;  %v5435_v30 = vld [vmem:[%s5920_s28 + $0x60] sm:$0xf] }
 0x33b   : > { %4209 = vrot.lane.b32.xlu0 %v4126_v37, %s5844_s5  ;;  %4207 = vrot.lane.b32.xlu2 %v4116_v0, %s5844_s5  ;;  %v4423_v37 = vsel %vm6106_vm6, %v4421_v54, %v4422_v55  ;;  %v4140_v14 = vsel %vm5931_vm2, %v4135_v9, %v4139_v52  ;;  %v4428_v54 = vrot.slane %v4426_v46, 4 }
 0x33c   : > { %v4196_v8 = vpop.permute.xlu1 %4195 }
 0x33d   : > { %4269 = vst.msk [vmem:[#allocation2 + $0x58] sm:$0xf] %vm1861_vm10, %v4196_v8  ;;  %v3638_v21 = vpop.permute.xlu0 %3637  ;;  %v5708_v16 = vld [vmem:[#allocation2 + $0x10] sm:$0xff]  ;;  %v4143_v8 = vrot.slane %v4141_v24, 4 }
 0x33e   : > { %3710 = vst.msk [vmem:[#allocation2 + $0x5c] sm:$0xf] %vm1300_vm9, %v3638_v21  ;;  %v4166_v20 = vpop.permute.xlu2 %4165  ;;  %5638 = vmatmul.msk.bf16.gmra.mxu1 %vm2359_vm13, %v5708_v16  ;;  %v3936_v21 = vshrl.u32 %v5474_v5, 16  ;;  %v3939_v16 = vshll.u32 %v5474_v5, 16 }
 0x33f   : > { %4270 = vst.msk [vmem:[#allocation2 + $0x5c] sm:$0xf] %vm1861_vm10, %v4198_v56  ;;  %v5402_v56 = vld [vmem:[%s5920_s28 + $0xcc] sm:$0xe] }
 0x340   : > { %v5420_v43 = vrot.slane %v5402_v56, 9  ;;  %v3938_v31 = vrot.slane %v3936_v21, 4  ;;  %v3941_v18 = vrot.slane %v3939_v16, 5 }
 0x342   : > { %3617 = vrot.lane.b32.xlu1 %v5434_v22, %s5843_s4  ;;  %v3395_v62 = vsel %vm6106_vm6, %v5420_v43, %v3394_v47  ;;  %v4144_v22 = vor.u32 %v4143_v8, %v4139_v52  ;;  %v5522_v43 = vld [vmem:[%s5920_s28 + $0x60] sm:$0xe]  ;;  %v7972_v52 = vld [vmem:[%s8164_s2] ss:$0 sm:$0xff] }
 0x343   : > { %3615 = vrot.lane.b32.xlu0 %v5433_v23, %s5843_s4  ;;  %4545 = vrot.lane.b32.xlu2 %v4479_v6, %s5845_s6  ;;  %v4147_v23 = vshll.u32 %v5500_v60, 16 }
 0x344   : > { %v4534_v58 = vpop.permute.xlu1 %4533  ;;  %v4145_v35 = vrot.slane %v4144_v22, 4 }
 0x345   : > { %4606 = vst.msk [vmem:[#allocation2 + $0x5c] sm:$0xf] %vm2198_vm12, %v4534_v58  ;;  %v4532_v33 = vpop.permute.xlu0 %4531  ;;  %v4149_v36 = vrot.slane %v4147_v23, 5 }
 0x346   : > { %4605 = vst.msk [vmem:[#allocation2 + $0x58] sm:$0xf] %vm2198_vm12, %v4532_v33  ;;  %v3640_v38 = vpop.permute.xlu2 %3639  ;;  %v3942_v33 = vor.u32 %v3941_v18, %v3938_v31 }
 0x347   : > { %3711 = vst.msk [vmem:[#allocation2 + $0x60] sm:$0xf] %vm1300_vm9, %v3640_v38  ;;  %v4483_v38 = vsel %vm6106_vm6, %v5564_v3, %v4482_v27  ;;  %v4150_v47 = vsel %vm5931_vm2, %v4145_v35, %v4149_v36 }
 0x348   : > { %v3943_v48 = vrot.slane %v3942_v33, 4 }
 0x34a   : > { %4511 = vrot.lane.b32.xlu1 %v4420_v39, %s5845_s6  ;;  %v3949_v39 = vshrl.u32 %v5475_v15, 16  ;;  %v3948_v45 = vsel %vm5931_vm2, %v3943_v48, %v3947_v50 }
 0x34b   : > { %4177 = vrot.lane.b32.xlu0 %v3934_v51, %s5844_s5  ;;  %4175 = vrot.lane.b32.xlu2 %v3924_v19, %s5844_s5 }
 0x34c   : > { %v4164_v40 = vpop.permute.xlu1 %4163  ;;  %v3951_v19 = vrot.slane %v3949_v39, 4 }
 0x34d   : > { %4253 = vst.msk [vmem:[#allocation2 + $0x18] sm:$0xf] %vm1861_vm10, %v4164_v40  ;;  %v3606_v49 = vpop.permute.xlu0 %3605  ;;  %v5717_v53 = vld [vmem:[#allocation2 + $0x58] sm:$0xff]  ;;  %v5524_v40 = vld [vmem:[%s5920_s28 + $0x68] sm:$0x1] }
 0x34e   : > { %3694 = vst.msk [vmem:[#allocation2 + $0x1c] sm:$0xf] %vm1300_vm9, %v3606_v49  ;;  %v4202_v57 = vpop.permute.xlu2 %4201  ;;  %5647 = vmatmul.msk.bf16.gmra.mxu3 %vm2359_vm13, %v5717_v53  ;;  %v3952_v49 = vor.u32 %v3951_v19, %v3947_v50  ;;  %v3955_v53 = vshll.u32 %v5476_v44, 16  ;;  %v4429_v55 = vrot.slane %v5524_v40, 5 }
 0x34f   : > { %4254 = vst.msk [vmem:[#allocation2 + $0x1c] sm:$0xf] %vm1861_vm10, %v4166_v20  ;;  %v5451_v20 = vld [vmem:[%s5920_s28 + $0xc0] sm:$0xf] }
 0x350   : > { %v3957_v24 = vrot.slane %v3955_v53, 5  ;;  %v4430_v9 = vsel %vm6106_vm6, %v4428_v54, %v4429_v55 }
 0x352   : > { %3461 = vrot.lane.b32.xlu1 %v3398_v26, %s5842_s30  ;;  %v5556_v26 = vrot.slane %v5522_v43, 9 }
 0x353   : > { %3459 = vrot.lane.b32.xlu0 %v3395_v62, %s5842_s30  ;;  %4513 = vrot.lane.b32.xlu2 %v4423_v37, %s5845_s6  ;;  %v3953_v62 = vrot.slane %v3952_v49, 4 }
 0x354   : > { %v4502_v0 = vpop.permute.xlu1 %4501 }
 0x355   : > { %4590 = vst.msk [vmem:[#allocation2 + $0x1c] sm:$0xf] %vm2198_vm12, %v4502_v0  ;;  %v4500_v7 = vpop.permute.xlu0 %4499  ;;  %v4427_v0 = vsel %vm6106_vm6, %v5556_v26, %v4426_v46  ;;  %v3958_v10 = vsel %vm5931_vm2, %v3953_v62, %v3957_v24 }
 0x356   : > { %4589 = vst.msk [vmem:[#allocation2 + $0x18] sm:$0xf] %vm2198_vm12, %v4500_v7  ;;  %v3608_v12 = vpop.permute.xlu2 %3607 }
 0x357   : > { %3695 = vst.msk [vmem:[#allocation2 + $0x20] sm:$0xf] %vm1300_vm9, %v3608_v12 }
 0x35a   : > { %4211 = vrot.lane.b32.xlu1 %v4140_v14, %s5844_s5 }
 0x35b   : > { %3653 = vrot.lane.b32.xlu0 %v5452_v13, %s5843_s4  ;;  %3651 = vrot.lane.b32.xlu2 %v5451_v20, %s5843_s4 }
 0x35c   : > { %v4200_v6 = vpop.permute.xlu1 %4199 }
 0x35d   : > { %4271 = vst.msk [vmem:[#allocation2 + $0x60] sm:$0xf] %vm1861_vm10, %v4200_v6  ;;  %v3642_v11 = vpop.permute.xlu0 %3641  ;;  %v5709_v58 = vld [vmem:[#allocation2 + $0x18] sm:$0xff] }
 0x35e   : > { %3712 = vst.msk [vmem:[#allocation2 + $0x64] sm:$0xf] %vm1300_vm9, %v3642_v11  ;;  %v4170_v63 = vpop.permute.xlu2 %4169  ;;  %5639 = vmatmul.msk.bf16.gmra.mxu1 %vm2359_vm13, %v5709_v58 }
 0x35f   : > { %4272 = vst.msk [vmem:[#allocation2 + $0x64] sm:$0xf] %vm1861_vm10, %v4202_v57 }
 0x362   : > { %4549 = vrot.lane.b32.xlu1 %v4486_v42, %s5845_s6 }
 0x363   : > { %4547 = vrot.lane.b32.xlu0 %v4483_v38, %s5845_s6  ;;  %4213 = vrot.lane.b32.xlu2 %v4150_v47, %s5844_s5 }
 0x364   : > { %v4538_v51 = vpop.permute.xlu1 %4537 }
 0x365   : > { %4608 = vst.msk [vmem:[#allocation2 + $0x64] sm:$0xf] %vm2198_vm12, %v4538_v51  ;;  %v4536_v56 = vpop.permute.xlu0 %4535 }
 0x366   : > { %4607 = vst.msk [vmem:[#allocation2 + $0x60] sm:$0xf] %vm2198_vm12, %v4536_v56  ;;  %v3452_v41 = vpop.permute.xlu2 %3451 }
 0x367   : > { %3521 = vst.msk [vmem:[#allocation2 + $0x68] sm:$0xf] %vm1107_vm8, %v3452_v41 }
 0x36a   : > { %4179 = vrot.lane.b32.xlu1 %v3948_v45, %s5844_s5 }
 0x36b   : > { %3621 = vrot.lane.b32.xlu0 %v5436_v34, %s5843_s4  ;;  %3619 = vrot.lane.b32.xlu2 %v5435_v30, %s5843_s4  ;;  %s5723_s4 = sshll.u32 %s5888_s16, 9  ;;  %s4950_s16 = scalar_lea.sflag [#allocation4], %s161_s11 }
 0x36c   : > { %v4168_v57 = vpop.permute.xlu1 %4167  ;;  %s4961_s10 = scalar_lea.hbm %s8165_s3, %s5723_s4 }
 0x36d   : > { %4255 = vst.msk [vmem:[#allocation2 + $0x20] sm:$0xf] %vm1861_vm10, %v4168_v57  ;;  %v3610_v17 = vpop.permute.xlu0 %3609  ;;  %v5718_v59 = vld [vmem:[#allocation2 + $0x60] sm:$0xff]  ;;  %s4964_s19 = sshll.u32 %s4961_s10, 4  ;;  %s4965_s19 = int_to_ptr.hbm [resolvable:$true] %s4964_s19 }
 0x36e   : > { %3696 = vst.msk [vmem:[#allocation2 + $0x24] sm:$0xf] %vm1300_vm9, %v3610_v17  ;;  %v3646_v37 = vpop.permute.xlu2 %3645  ;;  %5648 = vmatmul.msk.bf16.gmra.mxu3 %vm2359_vm13, %v5718_v59  ;;  %s5791_s20 = sshra.s32 %s4965_s19, 4  ;;  %s5792_s20 = int_to_ptr.hbm [resolvable:$true] %s5791_s20 }
 0x36f   : > { %4256 = vst.msk [vmem:[#allocation2 + $0x24] sm:$0xf] %vm1861_vm10, %v4170_v63  ;;  %s5793_s25 = scalar_lea.hbm %s5792_s20, 512  ;;  %p5798_p0 = scmp.lt.s32.totalorder %s5792_s20, %s8165_s3 }
 0x370   : > { %p5794_p11 = scmp.ne.s32.totalorder %s5792_s20, %s5793_s25  ;;  %p5799_p1 = scmp.lt.s32.totalorder %s5797_s29, %s5793_s25 }
 0x371   : > { %v4844_v5 = vpop.f32.mrf.mxu3 }
 0x372   : > { %4517 = vrot.lane.b32.xlu1 %v4430_v9, %s5845_s6  ;;  %v4845_v7 = vadd.f32 %v7972_v52, %v4844_v5  ;;  %p5795_p12 = pnand %p5794_p11, %p5905_p5  ;;  %p5800_p2 = por %p5799_p1, %p5798_p0 }
 0x373   : > { %4515 = vrot.lane.b32.xlu0 %v4427_v0, %s5845_s6  ;;  %4181 = vrot.lane.b32.xlu2 %v3958_v10, %s5844_s5 }
 0x374   : > { %v4506_v8 = vpop.permute.xlu1 %4505  ;;  %v4900_v12 = vmax.f32 %v4845_v7, 0.0  ;;  %p5796_p13 = pneg %p5795_p12 }
 0x375   : > { %4592 = vst.msk [vmem:[#allocation2 + $0x24] sm:$0xf] %vm2198_vm12, %v4506_v8  ;;  %v4504_v60 = vpop.permute.xlu0 %4503 }
 0x376   : > { %4591 = vst.msk [vmem:[#allocation2 + $0x20] sm:$0xf] %vm2198_vm12, %v4504_v60  ;;  %v4540_v1 = vpop.permute.xlu2 %4539  ;;  %p5801_p3 = pnand %p5800_p2, %p5796_p13 }
 0x377   : > { %5668 = vst.msk [vmem:[%s7405_s24 + $0x110] sm:$0xff] %vm2533_vm14, %v4900_v12 }
 0x379   : > { %v4846_v25 = vpop.f32.mrf.mxu3 }
 0x37a   : > { %v4847_v14 = vadd.f32 %v7972_v52, %v4846_v25 }
 0x37b   : > { %v4804_v21 = vpop.f32.mrf.mxu1 }
 0x37c   : > { %v3644_v27 = vpop.permute.xlu1 %3643  ;;  %v4901_v16 = vmax.f32 %v4847_v14, 0.0  ;;  %v4805_v61 = vadd.f32 %v7972_v52, %v4804_v21 }
 0x37d   : > { %3713 = vst.msk [vmem:[#allocation2 + $0x68] sm:$0xf] %vm1300_vm9, %v3644_v27  ;;  %v3454_v13 = vpop.permute.xlu0 %3453  ;;  %v5710_v2 = vld [vmem:[#allocation2 + $0x20] sm:$0xff] }
 0x37e   : > { %3522 = vst.msk [vmem:[#allocation2 + $0x6c] sm:$0xf] %vm1107_vm8, %v3454_v13  ;;  %v3614_v20 = vpop.permute.xlu2 %3613  ;;  %v4884_v22 = vmax.f32 %v4805_v61, 0.0  ;;  %5640 = vmatmul.msk.bf16.gmra.mxu1 %vm2359_vm13, %v5710_v2 }
 0x37f   : > { %5669 = vst.msk [vmem:[%s7405_s24 + $0x118] sm:$0xff] %vm2533_vm14, %v4901_v16 }
 0x380   : > { %3714 = vst.msk [vmem:[#allocation2 + $0x6c] sm:$0xf] %vm1300_vm9, %v3646_v37 }
 0x381   : > { %5652 = vst.msk [vmem:[%s7405_s24 + $0x10] sm:$0xff] %vm2533_vm14, %v4884_v22 }
 0x382   : > { %3698 = vst.msk [vmem:[#allocation2 + $0x2c] sm:$0xf] %vm1300_vm9, %v3614_v20 }
 0x383   : > { %v4806_v28 = vpop.f32.mrf.mxu1 }
 0x384   : > { %v4206_v23 = vpop.permute.xlu1 %4205  ;;  %v4807_v31 = vadd.f32 %v7972_v52, %v4806_v28 }
 0x385   : > { %4274 = vst.msk [vmem:[#allocation2 + $0x6c] sm:$0xf] %vm1861_vm10, %v4206_v23  ;;  %v4204_v29 = vpop.permute.xlu0 %4203 }
 0x386   : > { %4273 = vst.msk [vmem:[#allocation2 + $0x68] sm:$0xf] %vm1861_vm10, %v4204_v29  ;;  %v4508_v18 = vpop.permute.xlu2 %4507  ;;  %v4885_v6 = vmax.f32 %v4807_v31, 0.0 }
 0x387   : > { %4609 = vst.msk [vmem:[#allocation2 + $0x68] sm:$0xf] %vm2198_vm12, %v4540_v1 }
 0x388   : > { %5653 = vst.msk [vmem:[%s7405_s24 + $0x18] sm:$0xff] %vm2533_vm14, %v4885_v6 }
 0x38c   : > { %v3612_v3 = vpop.permute.xlu1 %3611 }
 0x38d   : > { %3697 = vst.msk [vmem:[#allocation2 + $0x28] sm:$0xf] %vm1300_vm9, %v3612_v3  ;;  %v4542_v15 = vpop.permute.xlu0 %4541 }
 0x38e   : > { %4610 = vst.msk [vmem:[#allocation2 + $0x6c] sm:$0xf] %vm2198_vm12, %v4542_v15  ;;  %v3458_v11 = vpop.permute.xlu2 %3457 }
 0x38f   : > { %3524 = vst.msk [vmem:[#allocation2 + $0x74] sm:$0xf] %vm1107_vm8, %v3458_v11 }
 0x391   : > { %v4849_v58 = vpop.f32.mrf.mxu3 }
 0x392   : > { %v4850_v35 = vadd.f32 %v7972_v52, %v4849_v58 }
 0x394   : > { %v4174_v36 = vpop.permute.xlu1 %4173  ;;  %v4902_v63 = vmax.f32 %v4850_v35, 0.0 }
 0x395   : > { %4258 = vst.msk [vmem:[#allocation2 + $0x2c] sm:$0xf] %vm1861_vm10, %v4174_v36  ;;  %v4172_v42 = vpop.permute.xlu0 %4171  ;;  %v5719_v33 = vld [vmem:[#allocation2 + $0x68] sm:$0xff] }
 0x396   : > { %4257 = vst.msk [vmem:[#allocation2 + $0x28] sm:$0xf] %vm1861_vm10, %v4172_v42  ;;  %v4208_v4 = vpop.permute.xlu2 %4207  ;;  %5649 = vmatmul.msk.bf16.gmra.mxu3 %vm2359_vm13, %v5719_v33 }
 0x397   : > { %5670 = vst.msk [vmem:[%s7405_s24 + $0x130] sm:$0xff] %vm2533_vm14, %v4902_v63 }
 0x398   : > { %4593 = vst.msk [vmem:[#allocation2 + $0x28] sm:$0xf] %vm2198_vm12, %v4508_v18 }
 0x399   : > { %v4851_v38 = vpop.f32.mrf.mxu3 }
 0x39a   : > { %v4852_v39 = vadd.f32 %v7972_v52, %v4851_v38 }
 0x39b   : > { %v4809_v48 = vpop.f32.mrf.mxu1 }
 0x39c   : > { %v3456_v47 = vpop.permute.xlu1 %3455  ;;  %v4903_v50 = vmax.f32 %v4852_v39, 0.0  ;;  %v4810_v32 = vadd.f32 %v7972_v52, %v4809_v48 }
 0x39d   : > { %3523 = vst.msk [vmem:[#allocation2 + $0x70] sm:$0xf] %vm1107_vm8, %v3456_v47  ;;  %v4510_v51 = vpop.permute.xlu0 %4509 }
 0x39e   : > { %4594 = vst.msk [vmem:[#allocation2 + $0x2c] sm:$0xf] %vm2198_vm12, %v4510_v51  ;;  %v4546_v56 = vpop.permute.xlu2 %4545  ;;  %v4886_v19 = vmax.f32 %v4810_v32, 0.0 }
 0x39f   : > { %5671 = vst.msk [vmem:[%s7405_s24 + $0x138] sm:$0xff] %vm2533_vm14, %v4903_v50 }
 0x3a0   : > { %5654 = vst.msk [vmem:[%s7405_s24 + $0x30] sm:$0xff] %vm2533_vm14, %v4886_v19 }
 0x3a3   : > { %v4811_v44 = vpop.f32.mrf.mxu1 }
 0x3a4   : > { %v3650_v41 = vpop.permute.xlu1 %3649  ;;  %v4812_v46 = vadd.f32 %v7972_v52, %v4811_v44 }
 0x3a5   : > { %3716 = vst.msk [vmem:[#allocation2 + $0x74] sm:$0xf] %vm1300_vm9, %v3650_v41  ;;  %v3648_v45 = vpop.permute.xlu0 %3647  ;;  %v5711_v34 = vld [vmem:[#allocation2 + $0x28] sm:$0xff] }
 0x3a6   : > { %3715 = vst.msk [vmem:[#allocation2 + $0x70] sm:$0xf] %vm1300_vm9, %v3648_v45  ;;  %v4176_v40 = vpop.permute.xlu2 %4175  ;;  %v4887_v43 = vmax.f32 %v4812_v46, 0.0  ;;  %5641 = vmatmul.msk.bf16.gmra.mxu1 %vm2359_vm13, %v5711_v34 }
 0x3a7   : > { %4275 = vst.msk [vmem:[#allocation2 + $0x70] sm:$0xf] %vm1861_vm10, %v4208_v4 }
 0x3a8   : > { %5655 = vst.msk [vmem:[%s7405_s24 + $0x38] sm:$0xff] %vm2533_vm14, %v4887_v43 }
 0x3ac   : > { %v4544_v30 = vpop.permute.xlu1 %4543 }
 0x3ad   : > { %4611 = vst.msk [vmem:[#allocation2 + $0x70] sm:$0xf] %vm2198_vm12, %v4544_v30  ;;  %v4210_v49 = vpop.permute.xlu0 %4209 }
 0x3ae   : > { %4276 = vst.msk [vmem:[#allocation2 + $0x74] sm:$0xf] %vm1861_vm10, %v4210_v49  ;;  %v4514_v53 = vpop.permute.xlu2 %4513 }
 0x3af   : > { %4612 = vst.msk [vmem:[#allocation2 + $0x74] sm:$0xf] %vm2198_vm12, %v4546_v56 }
 0x3b1   : > { %v4854_v54 = vpop.f32.mrf.mxu3 }
 0x3b2   : > { %v4855_v55 = vadd.f32 %v7972_v52, %v4854_v54 }
 0x3b4   : > { %v3618_v57 = vpop.permute.xlu1 %3617  ;;  %v4904_v26 = vmax.f32 %v4855_v55, 0.0 }
 0x3b5   : > { %3700 = vst.msk [vmem:[#allocation2 + $0x34] sm:$0xf] %vm1300_vm9, %v3618_v57  ;;  %v3616_v17 = vpop.permute.xlu0 %3615 }
 0x3b6   : > { %3699 = vst.msk [vmem:[#allocation2 + $0x30] sm:$0xf] %vm1300_vm9, %v3616_v17  ;;  %v5720_v59 = vld [vmem:[#allocation2 + $0x70] sm:$0xff]  ;;  %v3652_v62 = vpop.permute.xlu2 %3651 }
 0x3b7   : > { %5672 = vst.msk [vmem:[%s7405_s24 + $0x150] sm:$0xff] %vm2533_vm14, %v4904_v26  ;;  %5650 = vmatmul.msk.bf16.gmra.mxu3 %vm2359_vm13, %v5720_v59 }
 0x3b8   : > { %4259 = vst.msk [vmem:[#allocation2 + $0x30] sm:$0xf] %vm1861_vm10, %v4176_v40 }
 0x3b9   : > { %v4856_v24 = vpop.f32.mrf.mxu3 }
 0x3ba   : > { %v4857_v37 = vadd.f32 %v7972_v52, %v4856_v24 }
 0x3bb   : > { %v4814_v0 = vpop.f32.mrf.mxu1 }
 0x3bc   : > { %v4512_v9 = vpop.permute.xlu1 %4511  ;;  %v4905_v10 = vmax.f32 %v4857_v37, 0.0  ;;  %v4815_v7 = vadd.f32 %v7972_v52, %v4814_v0 }
 0x3bd   : > { %4595 = vst.msk [vmem:[#allocation2 + $0x30] sm:$0xf] %vm2198_vm12, %v4512_v9  ;;  %v4178_v5 = vpop.permute.xlu0 %4177 }
 0x3be   : > { %4260 = vst.msk [vmem:[#allocation2 + $0x34] sm:$0xf] %vm1861_vm10, %v4178_v5  ;;  %v4214_v8 = vpop.permute.xlu2 %4213  ;;  %v4888_v12 = vmax.f32 %v4815_v7, 0.0 }
 0x3bf   : > { %5673 = vst.msk [vmem:[%s7405_s24 + $0x158] sm:$0xff] %vm2533_vm14, %v4905_v10 }
 0x3c0   : > { %4596 = vst.msk [vmem:[#allocation2 + $0x34] sm:$0xf] %vm2198_vm12, %v4514_v53 }
 0x3c1   : > { %5656 = vst.msk [vmem:[%s7405_s24 + $0x50] sm:$0xff] %vm2533_vm14, %v4888_v12 }
 0x3c3   : > { %v4816_v1 = vpop.f32.mrf.mxu1 }
 0x3c4   : > { %v3462_v60 = vpop.permute.xlu1 %3461  ;;  %v4817_v14 = vadd.f32 %v7972_v52, %v4816_v1 }
 0x3c5   : > { %3526 = vst.msk [vmem:[#allocation2 + $0x7c] sm:$0xf] %vm1107_vm8, %v3462_v60  ;;  %v3460_v25 = vpop.permute.xlu0 %3459 }
 0x3c6   : > { %3525 = vst.msk [vmem:[#allocation2 + $0x78] sm:$0xf] %vm1107_vm8, %v3460_v25  ;;  %v3620_v27 = vpop.permute.xlu2 %3619  ;;  %v4889_v21 = vmax.f32 %v4817_v14, 0.0 }
 0x3c7   : > { %v5712_v16 = vld [vmem:[#allocation2 + $0x30] sm:$0xff]  ;;  %3717 = vst.msk [vmem:[#allocation2 + $0x78] sm:$0xf] %vm1300_vm9, %v3652_v62 }
 0x3c8   : > { %3701 = vst.msk [vmem:[#allocation2 + $0x38] sm:$0xf] %vm1300_vm9, %v3620_v27  ;;  %5642 = vmatmul.msk.bf16.gmra.mxu1 %vm2359_vm13, %v5712_v16 }
 0x3c9   : > { %5657 = vst.msk [vmem:[%s7405_s24 + $0x58] sm:$0xff] %vm2533_vm14, %v4889_v21 }
 0x3cc   : > { %v4212_v13 = vpop.permute.xlu1 %4211 }
 0x3cd   : > { %4277 = vst.msk [vmem:[#allocation2 + $0x78] sm:$0xf] %vm1861_vm10, %v4212_v13  ;;  %v3654_v61 = vpop.permute.xlu0 %3653 }
 0x3ce   : > { %3718 = vst.msk [vmem:[#allocation2 + $0x7c] sm:$0xf] %vm1300_vm9, %v3654_v61  ;;  %v4182_v35 = vpop.permute.xlu2 %4181 }
 0x3cf   : > { %4278 = vst.msk [vmem:[#allocation2 + $0x7c] sm:$0xf] %vm1861_vm10, %v4214_v8 }
 0x3d1   : > { %v4859_v2 = vpop.f32.mrf.mxu3 }
 0x3d2   : > { %v4860_v20 = vadd.f32 %v7972_v52, %v4859_v2 }
 0x3d4   : > { %v4550_v22 = vpop.permute.xlu1 %4549  ;;  %v4906_v23 = vmax.f32 %v4860_v20, 0.0 }
 0x3d5   : > { %4614 = vst.msk [vmem:[#allocation2 + $0x7c] sm:$0xf] %vm2198_vm12, %v4550_v22  ;;  %v4548_v28 = vpop.permute.xlu0 %4547 }
 0x3d6   : > { %4613 = vst.msk [vmem:[#allocation2 + $0x78] sm:$0xf] %vm2198_vm12, %v4548_v28 }
 0x3d7   : > { %5674 = vst.msk [vmem:[%s7405_s24 + $0x170] sm:$0xff] %vm2533_vm14, %v4906_v23 }
 0x3d9   : > { %v4861_v29 = vpop.f32.mrf.mxu3 }
 0x3da   : > { %v4862_v31 = vadd.f32 %v7972_v52, %v4861_v29 }
 0x3db   : > { %v4819_v6 = vpop.f32.mrf.mxu1 }
 0x3dc   : > { %v4180_v18 = vpop.permute.xlu1 %4179  ;;  %v4907_v3 = vmax.f32 %v4862_v31, 0.0  ;;  %v4820_v11 = vadd.f32 %v7972_v52, %v4819_v6 }
 0x3dd   : > { %4261 = vst.msk [vmem:[#allocation2 + $0x38] sm:$0xf] %vm1861_vm10, %v4180_v18  ;;  %v3622_v15 = vpop.permute.xlu0 %3621  ;;  %v5721_v58 = vld [vmem:[#allocation2 + $0x78] sm:$0xff] }
 0x3de   : > { %3702 = vst.msk [vmem:[#allocation2 + $0x3c] sm:$0xf] %vm1300_vm9, %v3622_v15  ;;  %v4890_v36 = vmax.f32 %v4820_v11, 0.0  ;;  %5651 = vmatmul.msk.bf16.gmra.mxu3 %vm2359_vm13, %v5721_v58 }
 0x3df   : > { %5675 = vst.msk [vmem:[%s7405_s24 + $0x178] sm:$0xff] %vm2533_vm14, %v4907_v3 }
 0x3e0   : > { %4262 = vst.msk [vmem:[#allocation2 + $0x3c] sm:$0xf] %vm1861_vm10, %v4182_v35 }
 0x3e1   : > { %5658 = vst.msk [vmem:[%s7405_s24 + $0x70] sm:$0xff] %vm2533_vm14, %v4890_v36 }
 0x3e3   : > { %v4821_v42 = vpop.f32.mrf.mxu1 }
 0x3e4   : > { %v4518_v63 = vpop.permute.xlu1 %4517  ;;  %v4822_v4 = vadd.f32 %v7972_v52, %v4821_v42 }
 0x3e5   : > { %4598 = vst.msk [vmem:[#allocation2 + $0x3c] sm:$0xf] %vm2198_vm12, %v4518_v63  ;;  %v4516_v33 = vpop.permute.xlu0 %4515 }
 0x3e6   : > { %4597 = vst.msk [vmem:[#allocation2 + $0x38] sm:$0xf] %vm2198_vm12, %v4516_v33  ;;  %v4891_v38 = vmax.f32 %v4822_v4, 0.0 }
 0x3e8   : > { %5659 = vst.msk [vmem:[%s7405_s24 + $0x78] sm:$0xff] %vm2533_vm14, %v4891_v38 }
 0x3ed   : > { %v5713_v39 = vld [vmem:[#allocation2 + $0x38] sm:$0xff] }
 0x3ee   : > { %5643 = vmatmul.msk.bf16.gmra.mxu1 %vm2359_vm13, %v5713_v39 }
 0x3f1   : > { %v4864_v47 = vpop.f32.mrf.mxu3 }
 0x3f2   : > { %v4865_v48 = vadd.f32 %v7972_v52, %v4864_v47 }
 0x3f4   : > { %v4908_v50 = vmax.f32 %v4865_v48, 0.0 }
 0x3f6   : > { %5676 = vst.msk [vmem:[%s7405_s24 + $0x190] sm:$0xff] %vm2533_vm14, %v4908_v50 }
 0x3f9   : > { %v4866_v51 = vpop.f32.mrf.mxu3 }
 0x3fa   : > { %v4867_v32 = vadd.f32 %v7972_v52, %v4866_v51 }
 0x3fb   : > { %v4824_v56 = vpop.f32.mrf.mxu1 }
 0x3fc   : > { %v4909_v19 = vmax.f32 %v4867_v32, 0.0  ;;  %v4825_v41 = vadd.f32 %v7972_v52, %v4824_v56 }
 0x3fe   : > { %5677 = vst.msk [vmem:[%s7405_s24 + $0x198] sm:$0xff] %vm2533_vm14, %v4909_v19  ;;  %v4892_v44 = vmax.f32 %v4825_v41, 0.0 }
 0x400   : > { %5660 = vst.msk [vmem:[%s7405_s24 + $0x90] sm:$0xff] %vm2533_vm14, %v4892_v44 }
 0x403   : > { %v4826_v45 = vpop.f32.mrf.mxu1 }
 0x404   : > { %v4827_v46 = vadd.f32 %v7972_v52, %v4826_v45 }
 0x406   : > { %v4893_v34 = vmax.f32 %v4827_v46, 0.0 }
 0x408   : > { %5661 = vst.msk [vmem:[%s7405_s24 + $0x98] sm:$0xff] %vm2533_vm14, %v4893_v34 }
 0x419   : > { %v4869_v40 = vpop.f32.mrf.mxu3 }
 0x41a   : > { %v4870_v43 = vadd.f32 %v7972_v52, %v4869_v40 }
 0x41c   : > { %v4910_v30 = vmax.f32 %v4870_v43, 0.0 }
 0x41e   : > { %5678 = vst.msk [vmem:[%s7405_s24 + $0x1b0] sm:$0xff] %vm2533_vm14, %v4910_v30 }
 0x421   : > { %v4871_v49 = vpop.f32.mrf.mxu3 }
 0x422   : > { %v4872_v53 = vadd.f32 %v7972_v52, %v4871_v49 }
 0x423   : > { %v4829_v54 = vpop.f32.mrf.mxu1 }
 0x424   : > { %v4911_v55 = vmax.f32 %v4872_v53, 0.0  ;;  %v4830_v57 = vadd.f32 %v7972_v52, %v4829_v54 }
 0x426   : > { %5679 = vst.msk [vmem:[%s7405_s24 + $0x1b8] sm:$0xff] %vm2533_vm14, %v4911_v55  ;;  %v4894_v26 = vmax.f32 %v4830_v57, 0.0 }
 0x428   : > { %5662 = vst.msk [vmem:[%s7405_s24 + $0xb0] sm:$0xff] %vm2533_vm14, %v4894_v26 }
 0x42b   : > { %v4831_v17 = vpop.f32.mrf.mxu1 }
 0x42c   : > { %v4832_v59 = vadd.f32 %v7972_v52, %v4831_v17 }
 0x42e   : > { %v4895_v62 = vmax.f32 %v4832_v59, 0.0 }
 0x430   : > { %5663 = vst.msk [vmem:[%s7405_s24 + $0xb8] sm:$0xff] %vm2533_vm14, %v4895_v62 }
 0x43a   : > { %v4874_v24 = vpop.f32.mrf.mxu3 }
 0x43b   : > { %v4875_v37 = vadd.f32 %v7972_v52, %v4874_v24 }
 0x43d   : > { %v4912_v9 = vmax.f32 %v4875_v37, 0.0 }
 0x43f   : > { %5680 = vst.msk [vmem:[%s7405_s24 + $0x1d0] sm:$0xff] %vm2533_vm14, %v4912_v9 }
 0x442   : > { %v4876_v0 = vpop.f32.mrf.mxu3 }
 0x443   : > { %v4877_v10 = vadd.f32 %v7972_v52, %v4876_v0 }
 0x445   : > { %v4913_v5 = vmax.f32 %v4877_v10, 0.0  ;;  %v4834_v7 = vpop.f32.mrf.mxu1 }
 0x446   : > { %v4835_v8 = vadd.f32 %v7972_v52, %v4834_v7 }
 0x447   : > { %5681 = vst.msk [vmem:[%s7405_s24 + $0x1d8] sm:$0xff] %vm2533_vm14, %v4913_v5 }
 0x448   : > { %v4896_v12 = vmax.f32 %v4835_v8, 0.0 }
 0x44a   : > { %5664 = vst.msk [vmem:[%s7405_s24 + $0xd0] sm:$0xff] %vm2533_vm14, %v4896_v12 }
 0x44d   : > { %v4836_v60 = vpop.f32.mrf.mxu1 }
 0x44e   : > { %v4837_v1 = vadd.f32 %v7972_v52, %v4836_v60 }
 0x450   : > { %v4897_v25 = vmax.f32 %v4837_v1, 0.0 }
 0x452   : > { %5665 = vst.msk [vmem:[%s7405_s24 + $0xd8] sm:$0xff] %vm2533_vm14, %v4897_v25 }
 0x461   : > { %v4879_v14 = vpop.f32.mrf.mxu3 }
 0x462   : > { %v4880_v27 = vadd.f32 %v7972_v52, %v4879_v14 }
 0x464   : > { %v4914_v21 = vmax.f32 %v4880_v27, 0.0 }
 0x466   : > { %5682 = vst.msk [vmem:[%s7405_s24 + $0x1f0] sm:$0xff] %vm2533_vm14, %v4914_v21 }
 0x469   : > { %v4881_v16 = vpop.f32.mrf.mxu3 }
 0x46a   : > { %v4882_v13 = vadd.f32 %v7972_v52, %v4881_v16 }
 0x46b   : > { %v4839_v61 = vpop.f32.mrf.mxu1 }
 0x46c   : > { %v4915_v2 = vmax.f32 %v4882_v13, 0.0  ;;  %v4840_v20 = vadd.f32 %v7972_v52, %v4839_v61 }
 0x46e   : > { %5683 = vst.msk [vmem:[%s7405_s24 + $0x1f8] sm:$0xff] %vm2533_vm14, %v4915_v2  ;;  %v4898_v22 = vmax.f32 %v4840_v20, 0.0 }
 0x470   : > { %5666 = vst.msk [vmem:[%s7405_s24 + $0xf0] sm:$0xff] %vm2533_vm14, %v4898_v22 }
 0x473   : > { %v4841_v23 = vpop.f32.mrf.mxu1 }
 0x474   : > { %v4842_v28 = vadd.f32 %v7972_v52, %v4841_v23 }
 0x476   : > { %v4899_v29 = vmax.f32 %v4842_v28, 0.0 }
 0x478   : > { %5667 = vst.msk [vmem:[%s7405_s24 + $0xf8] sm:$0xff] %vm2533_vm14, %v4899_v29 }
 0x479   : > { %5804 = shalt.err (!%p5801_p3)
}
 0x47a   : > { %s5846_s11 = smov 128  }
 0x47b   : > { %5729 = dma.vmem_to_hbm [thread:$0]  (%p5905_p5), %s4963_s17, 8192, %s4965_s19, %s4950_s16, %s5846_s11, %s5846_s11, %s5842_s30  }
 0x47c PF: > { %p5735_p4 = scmp.ge.s32.totalorder %s5839_s15, 2  ;;  %s4979_s24 = sand.u32 1, %s5827_s12  }
 0x47d   : > { %s4980_s28 = scalar_lea.sflag [#allocation4], %s4979_s24 }
 0x47e   : > { %p5732_p7 = pnand %p5735_p4, %p5909_p6 }
 0x480   : > { %p5733_p8 = pneg %p5732_p7 }
 0x482   : > { %5822 = dma.done.wait (%p5733_p8), %s4980_s28, 8192  }
 0x483   : > { %5824 = vsyncadd (%p5733_p8), %s4980_s28, 4294959104  ;;  %p13_p9 = scmp.ge.s32.totalorder %s5892_s18, 4   ;;  %s8172_s12 = smov %s5831_s13 }
 0x484   : > { %s8173_s13 = smov %s5835_s14  ;;  %s8174_s14 = smov %s5903_s21 }
 0x485   : > { %s8175_s15 = smov %s5892_s18  ;;  %15 = sbr.rel (!%p13_p9) target bundleno = 3 (0x3), region = 71 }
 0x48a   :  { %4986 = vsyncpa [#allocation4], 1 }
 0x48b   :  { %4988 = vsyncpa [#allocation4 + $0x1], 1 }

</bundles_post_ra>
